<compile_context>
chip_gen: v5e
topology: v5e:2x2
jax: 0.10.0
libtpu: 0.0.40
codegen_flags: <defaults>
</compile_context>

<pallas_src>
import jax
import jax.numpy as jnp
from jax.experimental import pallas as pl
from jax.experimental.pallas import tpu as pltpu


# ---------------------------------------------------------------------------
# Kernels
# ---------------------------------------------------------------------------
def party_mlp_fused_kernel(x_ref, w1_ref, b1_ref, w2_ref, b2_ref, o_ref):
    # Grid = (batch tiles,).  Whole W1/W2 resident in VMEM; single pass,
    # no accumulator, no reduction axis.
    h = jnp.dot(x_ref[...], w1_ref[...], preferred_element_type=jnp.float32)
    h = jnp.maximum(h + b1_ref[...], 0.0)                 # b1 is f32
    out = jnp.dot(h.astype(w2_ref.dtype), w2_ref[...],
                  preferred_element_type=jnp.float32) + b2_ref[...]
    o_ref[...] = out.astype(o_ref.dtype)


def party_mlp_tiled_kernel(x_ref, w1_ref, b1_ref, w2_ref, b2_ref, o_ref, *acc):
    # Grid = (batch tiles [parallel], hidden tiles [reduction, last axis]).
    # f32 outputs accumulate directly into o_ref (no scratch); non-f32 outputs
    # use the f32 VMEM scratch passed in *acc and cast once at the end.
    acc_ref = acc[0] if acc else o_ref
    j = pl.program_id(1)

    @pl.when(j == 0)
    def _init():
        # Seed with b2 (f32) so the output bias is added exactly once.
        acc_ref[...] = jnp.broadcast_to(b2_ref[...], acc_ref.shape)

    # First layer on this hidden slice: h_j = relu(x @ W1[:, j_tile] + b1[j_tile])
    h = jnp.dot(x_ref[...], w1_ref[...], preferred_element_type=jnp.float32)
    h = jnp.maximum(h + b1_ref[...], 0.0)

    # Second layer partial product, accumulated in f32: acc += h_j @ W2[j_tile, :]
    acc_ref[...] += jnp.dot(h.astype(w2_ref.dtype), w2_ref[...],
                            preferred_element_type=jnp.float32)

    if acc:  # non-f32 output: cast the f32 accumulator once, on the last step
        @pl.when(j == pl.num_programs(1) - 1)
        def _finalize():
            o_ref[...] = acc_ref[...].astype(o_ref.dtype)


# ---------------------------------------------------------------------------
# Wrapper
# ---------------------------------------------------------------------------
def _vmem_capacity_bytes():
    try:
        return int(pltpu.get_tpu_info().vmem_capacity_bytes)
    except Exception:
        return 64 * 2**20  # conservative: v7x has the smallest per-TC VMEM


def _build_party_call(B_pad, D_in, D_hid, D_out, compute_dtype, out_dtype,
                      tile_b, tile_h, vmem_limit):
    tiled = tile_h < D_hid
    n_b = B_pad // tile_b
    out_is_f32 = jnp.dtype(out_dtype) == jnp.float32

    if tiled:
        grid = (n_b, D_hid // tile_h)
        in_specs = [
            # x: batch tile, full (lane-dense) feature dim; resident over j.
            pl.BlockSpec((tile_b, D_in), lambda i, j: (i, 0)),
            # W1 column slab / b1 slab for hidden slice j.
            pl.BlockSpec((D_in, tile_h), lambda i, j: (0, j)),
            pl.BlockSpec((1, tile_h), lambda i, j: (0, j)),
            # W2 row slab for hidden slice j.
            pl.BlockSpec((tile_h, D_out), lambda i, j: (j, 0)),
            # b2: constant block (f32).
            pl.BlockSpec((1, D_out), lambda i, j: (0, 0)),
        ]
        # Output block constant across the reduction axis -> accumulator.
        out_specs = pl.BlockSpec((tile_b, D_out), lambda i, j: (i, 0))
        scratch_shapes = ([] if out_is_f32
                          else [pltpu.VMEM((tile_b, D_out), jnp.float32)])
        kernel = party_mlp_tiled_kernel
        semantics = ("parallel", "arbitrary")
    else:
        grid = (n_b,)
        in_specs = [
            pl.BlockSpec((tile_b, D_in), lambda i: (i, 0)),
            pl.BlockSpec((D_in, D_hid), lambda i: (0, 0)),
            pl.BlockSpec((1, D_hid), lambda i: (0, 0)),
            pl.BlockSpec((D_hid, D_out), lambda i: (0, 0)),
            pl.BlockSpec((1, D_out), lambda i: (0, 0)),
        ]
        out_specs = pl.BlockSpec((tile_b, D_out), lambda i: (i, 0))
        scratch_shapes = []
        kernel = party_mlp_fused_kernel
        semantics = ("parallel",)

    cd_size = jnp.dtype(compute_dtype).itemsize
    out_size = jnp.dtype(out_dtype).itemsize
    flops = 2 * B_pad * D_in * D_hid + 2 * B_pad * D_hid * D_out
    bytes_accessed = (cd_size * (B_pad * D_in + D_in * D_hid + D_hid * D_out)
                      + 4 * (D_hid + D_out)
                      + out_size * B_pad * D_out)

    return pl.pallas_call(
        kernel,
        out_shape=jax.ShapeDtypeStruct((B_pad, D_out), out_dtype),
        grid_spec=pltpu.PrefetchScalarGridSpec(
            num_scalar_prefetch=0,
            grid=grid,
            in_specs=in_specs,
            out_specs=out_specs,
            scratch_shapes=scratch_shapes,
        ),
        compiler_params=pltpu.CompilerParams(
            dimension_semantics=semantics,
            vmem_limit_bytes=int(vmem_limit),
        ),
        cost_estimate=pl.CostEstimate(
            flops=int(flops), transcendentals=0,
            bytes_accessed=int(bytes_accessed)),
    )


def party_forward(x, w1, b1, w2, b2, *, max_tile_b=256, tile_h=None):
    B, D_in = x.shape
    D_hid = w1.shape[1]
    D_out = w2.shape[1]
    out_dtype = x.dtype
    compute_dtype = x.dtype  # pass bf16 x for bf16 MXU operands (f32 accum inside)

    # Lane-dense blocks require 128-aligned feature dims.
    assert D_in % 128 == 0 and D_hid % 128 == 0 and D_out % 128 == 0, (
        "pad feature dims to multiples of 128 for lane-dense blocks")

    cd_size = jnp.dtype(compute_dtype).itemsize
    out_size = jnp.dtype(out_dtype).itemsize

    # ---- batch tiling: >=2 tiles (both v7x TensorCores) with minimal padding.
    row = 16 if cd_size < 4 else 8            # sublane packing for sub-32-bit
    n_tiles = max(2, pl.cdiv(B, max_tile_b)) if B >= 2 * row else 1
    tile_b = max(row, row * pl.cdiv(B, row * n_tiles))
    B_pad = tile_b * n_tiles

    # ---- hidden tiling: collapse the reduction axis if the weights fit VMEM.
    vmem_budget = int(0.75 * _vmem_capacity_bytes())   # ~25% headroom

    def working_set(th, tiled):
        # Double-buffered pipeline blocks (conservative: constant blocks too).
        blocks = 2 * (tile_b * D_in * cd_size          # x tile
                      + D_in * th * cd_size            # W1 column slab
                      + th * 4                         # b1 (f32)
                      + th * D_out * cd_size           # W2 row slab
                      + D_out * 4                      # b2 (f32)
                      + tile_b * D_out * out_size)     # output tile
        h_bytes = tile_b * th * 4                      # implicit f32 h intermediate
        if cd_size < 4:
            h_bytes += tile_b * th * cd_size           # bf16 cast copy of h
        acc_bytes = tile_b * D_out * 4 if (tiled and out_size < 4) else 0
        return blocks + h_bytes + acc_bytes

    if tile_h is None:
        if working_set(D_hid, tiled=False) <= vmem_budget:
            tile_h = D_hid                             # 1-D grid over batch
        else:
            # Largest 128-multiple divisor of D_hid whose working set fits.
            tile_h = 128
            for d in range(D_hid - 128, 0, -128):
                if D_hid % d == 0 and working_set(d, tiled=True) <= vmem_budget:
                    tile_h = d
                    break
    else:
        assert D_hid % tile_h == 0 and tile_h % 128 == 0, "bad forced tile_h"

    vmem_limit = min(vmem_budget,
                     max(16 * 2**20,
                         int(1.5 * working_set(tile_h, tile_h < D_hid))))

    # ---- pad the batch so every grid step gets a full tile (sliced off on return).
    x_p = x if B_pad == B else jnp.pad(x, ((0, B_pad - B), (0, 0)))

    args = (x_p,
            w1.astype(compute_dtype),
            b1.astype(jnp.float32).reshape(1, D_hid),   # biases stay f32
            w2.astype(compute_dtype),
            b2.astype(jnp.float32).reshape(1, D_out))

    call = _build_party_call(B_pad, D_in, D_hid, D_out, compute_dtype,
                             out_dtype, tile_b, tile_h, vmem_limit)
    return call(*args)[:B]


def party_forward_ref(x, w1, b1, w2, b2):
    h = jnp.maximum(x @ w1 + b1, 0.0)
    return h @ w2 + b2


if __name__ == "__main__":
    # Lane-dense, MXU-friendly sizes: every feature dim a multiple of 128 and
    # B chosen so the batch grid has 2 parallel steps (both v7x TensorCores).
    B, D_in, D_hid, D_out = 512, 256, 512, 128

    key = jax.random.PRNGKey(0)
    kx, k1, k2, k3, k4 = jax.random.split(key, 5)

    # Deterministic synthetic parameters (stand-in for the wrapped Model).
    x = jax.random.normal(kx, (B, D_in), dtype=jnp.float32)
    w1 = jax.random.normal(k1, (D_in, D_hid), dtype=jnp.float32) * 0.05
    b1 = jax.random.normal(k2, (1, D_hid), dtype=jnp.float32) * 0.05
    w2 = jax.random.normal(k3, (D_hid, D_out), dtype=jnp.float32) * 0.05
    b2 = jax.random.normal(k4, (1, D_out), dtype=jnp.float32) * 0.05

    ref = party_forward_ref(x, w1, b1, w2, b2)

    # f32 path, fused (adaptive tile_h collapses the reduction axis): exact.
    out = jax.block_until_ready(party_forward(x, w1, b1, w2, b2))
    assert out.shape == (B, D_out)
    assert jnp.allclose(out, ref, atol=5e-4, rtol=5e-4), "f32 fused mismatch"

    # f32 path, forced hidden tiling (exercises accumulate-into-o_ref): exact.
    out_t = jax.block_until_ready(party_forward(x, w1, b1, w2, b2, tile_h=128))
    assert jnp.allclose(out_t, ref, atol=5e-4, rtol=5e-4), "f32 tiled mismatch"

    # bf16 operands (v6e/v7x MXU sweet spot), f32 accumulation: loose tolerance.
    x_bf16 = x.astype(jnp.bfloat16)
    out_bf16 = jax.block_until_ready(party_forward(x_bf16, w1, b1, w2, b2))
    assert out_bf16.shape == (B, D_out)
    assert jnp.allclose(out_bf16.astype(jnp.float32), ref, atol=0.1, rtol=0.1), \
        "bf16 fused mismatch"

    # bf16 operands + forced tiling (exercises the f32 scratch accumulator path).
    out_bf16_t = jax.block_until_ready(
        party_forward(x_bf16, w1, b1, w2, b2, tile_h=128))
    assert jnp.allclose(out_bf16_t.astype(jnp.float32), ref, atol=0.1, rtol=0.1), \
        "bf16 tiled mismatch"

    print("KERNEL_OK")
</pallas_src>

<mosaic_0001>
module attributes {stable_mosaic.version = 11 : i64} {
  func.func @party_mlp_fused_kernel(%arg0: i32, %arg1: memref<256x256xf32, #tpu.memory_space<vmem>>, %arg2: memref<256x512xf32, #tpu.memory_space<vmem>>, %arg3: memref<1x512xf32, #tpu.memory_space<vmem>>, %arg4: memref<512x128xf32, #tpu.memory_space<vmem>>, %arg5: memref<1x128xf32, #tpu.memory_space<vmem>>, %arg6: memref<256x128xf32, #tpu.memory_space<vmem>>) attributes {dimension_semantics = [#tpu.dimension_semantics<parallel>], iteration_bounds = array<i64: 2>, scalar_prefetch = 0 : i64, scratch_operands = 0 : i64, tpu.core_type = #tpu.core_type<tc>, window_params = [{transform_indices = @transform_0, window_bounds = array<i64: 256, 256>}, {pipeline_mode = #tpu.pipeline_mode<synchronous>, transform_indices = @transform_1, window_bounds = array<i64: 256, 512>}, {pipeline_mode = #tpu.pipeline_mode<synchronous>, transform_indices = @transform_2, window_bounds = array<i64: 1, 512>}, {pipeline_mode = #tpu.pipeline_mode<synchronous>, transform_indices = @transform_3, window_bounds = array<i64: 512, 128>}, {pipeline_mode = #tpu.pipeline_mode<synchronous>, transform_indices = @transform_4, window_bounds = array<i64: 1, 128>}, {transform_indices = @transform_5, window_bounds = array<i64: 256, 128>}]} {
    %c0 = arith.constant 0 : index
    %c0_0 = arith.constant 0 : index
    %0 = vector.load %arg1[%c0, %c0_0] : memref<256x256xf32, #tpu.memory_space<vmem>>, vector<256x256xf32>
    %c0_1 = arith.constant 0 : index
    %c0_2 = arith.constant 0 : index
    %1 = vector.load %arg2[%c0_1, %c0_2] : memref<256x512xf32, #tpu.memory_space<vmem>>, vector<256x512xf32>
    %cst = arith.constant dense<0.000000e+00> : vector<256x512xf32>
    %2 = tpu.matmul %0, %1, %cst {dimension_numbers = #tpu.dot_dimension_numbers<[1], [0], [0], [1], [0, 0, 1, 1], [], []>} : vector<256x256xf32>, vector<256x512xf32>, vector<256x512xf32> -> vector<256x512xf32>
    %c0_3 = arith.constant 0 : index
    %c0_4 = arith.constant 0 : index
    %3 = vector.load %arg3[%c0_3, %c0_4] : memref<1x512xf32, #tpu.memory_space<vmem>>, vector<1x512xf32>
    %4 = vector.broadcast %3 : vector<1x512xf32> to vector<256x512xf32>
    %5 = arith.addf %2, %4 : vector<256x512xf32>
    %cst_5 = arith.constant 0.000000e+00 : f32
    %6 = vector.broadcast %cst_5 : f32 to vector<256x512xf32>
    %7 = arith.maximumf %5, %6 : vector<256x512xf32>
    %c0_6 = arith.constant 0 : index
    %c0_7 = arith.constant 0 : index
    %8 = vector.load %arg4[%c0_6, %c0_7] : memref<512x128xf32, #tpu.memory_space<vmem>>, vector<512x128xf32>
    %cst_8 = arith.constant dense<0.000000e+00> : vector<256x128xf32>
    %9 = tpu.matmul %7, %8, %cst_8 {dimension_numbers = #tpu.dot_dimension_numbers<[1], [0], [0], [1], [0, 0, 1, 1], [], []>} : vector<256x512xf32>, vector<512x128xf32>, vector<256x128xf32> -> vector<256x128xf32>
    %c0_9 = arith.constant 0 : index
    %c0_10 = arith.constant 0 : index
    %10 = vector.load %arg5[%c0_9, %c0_10] : memref<1x128xf32, #tpu.memory_space<vmem>>, vector<1x128xf32>
    %11 = vector.broadcast %10 : vector<1x128xf32> to vector<256x128xf32>
    %12 = arith.addf %9, %11 : vector<256x128xf32>
    %c0_11 = arith.constant 0 : index
    %c0_12 = arith.constant 0 : index
    %13 = vector.load %arg6[%c0_11, %c0_12] : memref<256x128xf32, #tpu.memory_space<vmem>>, vector<256x128xf32>
    tpu.vector_store %arg6[%c0_11, %c0_12], %12 {strides = array<i32>} : memref<256x128xf32, #tpu.memory_space<vmem>>, vector<256x128xf32>,
    return
  }
  func.func @transform_0(%arg0: i32) -> (i32, i32) {
    %c0_i32 = arith.constant 0 : i32
    %c0_i32_0 = arith.constant 0 : i32
    return %arg0, %c0_i32 : i32, i32
  }
  func.func @transform_1(%arg0: i32) -> (i32, i32) {
    %c0_i32 = arith.constant 0 : i32
    %c0_i32_0 = arith.constant 0 : i32
    %c0_i32_1 = arith.constant 0 : i32
    return %c0_i32, %c0_i32_0 : i32, i32
  }
  func.func @transform_2(%arg0: i32) -> (i32, i32) {
    %c0_i32 = arith.constant 0 : i32
    %c0_i32_0 = arith.constant 0 : i32
    %c0_i32_1 = arith.constant 0 : i32
    return %c0_i32, %c0_i32_0 : i32, i32
  }
  func.func @transform_3(%arg0: i32) -> (i32, i32) {
    %c0_i32 = arith.constant 0 : i32
    %c0_i32_0 = arith.constant 0 : i32
    %c0_i32_1 = arith.constant 0 : i32
    return %c0_i32, %c0_i32_0 : i32, i32
  }
  func.func @transform_4(%arg0: i32) -> (i32, i32) {
    %c0_i32 = arith.constant 0 : i32
    %c0_i32_0 = arith.constant 0 : i32
    %c0_i32_1 = arith.constant 0 : i32
    return %c0_i32, %c0_i32_0 : i32, i32
  }
  func.func @transform_5(%arg0: i32) -> (i32, i32) {
    %c0_i32 = arith.constant 0 : i32
    %c0_i32_0 = arith.constant 0 : i32
    return %arg0, %c0_i32 : i32, i32
  }
}

</mosaic_0001>

<bundles_post_ra>
// kernel: tpu_custom_call.1
= control target key start
LH: loop header
LB: loop body
LE: loop exit
PB: predicated region body
PF: predicated region fallthrough
CT: control target
= control target key end

     0   :  { %10 = vsyncpa [#allocation3], 0  ;;  %s3947_s0 = inlined_call_operand.hbm [shape: f32[512,256], index: 0, kind: input, shape index: {}]   ;;  %s3948_s1 = inlined_call_operand.hbm [shape: f32[256,512], index: 1, kind: input, shape index: {}]   ;;  %s3949_s2 = inlined_call_operand.hbm [shape: f32[1,512], index: 2, kind: input, shape index: {}]   ;;  %s3950_s3 = inlined_call_operand.hbm [shape: f32[512,128], index: 3, kind: input, shape index: {}]   ;;  %s3951_s4 = inlined_call_operand.vmem [shape: f32[1,128], index: 4, kind: input, shape index: {}]   ;;  %s3952_s5 = inlined_call_operand.hbm [shape: f32[512,128], index: 5, kind: output, shape index: {}]  }
   0x1   :  { %12 = vsyncpa [#allocation3 + $0x1], 0 }
   0x2   :  { %13 = vsyncpa [#allocation6], 0 }
   0x3   :  { %14 = vsyncpa [#allocation9], 0 }
   0x4   :  { %15 = vsyncpa [#allocation4], 0 }
   0x5   :  { %17 = vsyncpa [#allocation4 + $0x1], 0  ;;  %s2548_s18 = smov 0   ;;  %s2550_s19 = smov 0  }
   0x6   :  { %s2552_s20 = smov 0   ;;  %s2554_s21 = smov 0  }
   0x7 LB: > { %s2569_s22 = sadd.s32 4294967295, %s2505_s21   ;;  %s2200_s23 = sadd.s32 4294967294, %s2505_s21   ;;  %s2505_s21 = sphi %s2554_s21, %s4217_s21   ;;  %s2501_s20 = sphi %s2552_s20, %s4216_s20   ;;  %s2497_s19 = sphi %s2550_s19, %s4215_s19   ;;  %s2493_s18 = sphi %s2548_s18, %s4214_s18  }
   0x8   : > { %p43_p0 = scmp.ne.s32.totalorder %s2497_s19, %s2493_s18  ;;  %p44_p1 = scmp.eq.s32.totalorder %s2569_s22, 0 }
   0x9   : > { %p151_p2 = scmp.eq.s32.totalorder %s2569_s22, 1  ;;  %p157_p3 = scmp.eq.s32.totalorder %s2200_s23, 1 }
   0xa   : > { %p2578_p4 = por %p44_p1, %p43_p0  ;;  %p2201_p5 = scmp.ge.s32.totalorder %s2505_s21, 1 }
   0xb   : > { %p2583_p6 = por %p157_p3, %p43_p0  ;;  %p164_p7 = scmp.lt.s32.totalorder %s2505_s21, 3 }
   0xc   : > { %s175_s28 = sshll.u32 %s3948_s1, 4  ;;  %s2507_s30 = smov [#allocation5]   ;;  %s176_s28 = int_to_ptr.hbm [resolvable:$true] %s175_s28 }
   0xd   : > { %p2591_p8 = pnand %p2201_p5, %p164_p7  ;;  %s177_s6 = sshll.u32 %s2507_s30, 4  ;;  %s178_s6 = int_to_ptr.vmem [resolvable:$true] %s177_s6 }
   0xe   : > { %s190_s10 = sshll.u32 %s3949_s2, 4  ;;  %s2508_s11 = smov 512   ;;  %s191_s10 = int_to_ptr.hbm [resolvable:$true] %s190_s10 }
   0xf   : > { %p2240_p9 = pneg %p2591_p8  ;;  %s2509_s12 = smov 32  }
  0x10   : > { %s2510_s13 = smov [#allocation7]   ;;  %s201_s17 = sshll.u32 %s3950_s3, 4  ;;  %s202_s17 = int_to_ptr.hbm [resolvable:$true] %s201_s17 }
  0x11   : > { %p2599_p10 = pnand %p2240_p9, %p44_p1  ;;  %s192_s14 = sshll.u32 %s2510_s13, 4  ;;  %s193_s14 = int_to_ptr.vmem [resolvable:$true] %s192_s14 }
  0x12   : > { %s2511_s23 = smov [#allocation8]   ;;  %s2512_s27 = smov 128  }
  0x13   : > { %2243 = dma.hbm_to_vmem [thread:$0]  (!%p2599_p10), %s176_s28, 16384, %s178_s6, [#allocation6], %s2508_s11, %s2508_s11, %s2509_s12  }
  0x14   : > { %2246 = dma.hbm_to_vmem [thread:$0]  (!%p2599_p10), %s191_s10, 64, %s193_s14, [#allocation6]  }
  0x15   : > { %s203_s26 = sshll.u32 %s2511_s23, 4  ;;  %s2513_s28 = smov 8   ;;  %s204_s26 = int_to_ptr.vmem [resolvable:$true] %s203_s26 }
  0x16   : > { %2249 = dma.hbm_to_vmem [thread:$0]  (!%p2599_p10), %s202_s17, 8192, %s204_s26, [#allocation9], %s2512_s27, %s2512_s27, %s2513_s28  }
  0x17   : > { %s2617_s30 = sadd.s32 1, %s2505_s21   ;;  %s30_s8 = sadd.s32 1, %s2501_s20 }
  0x18   : > { %s27_s6 = ssub.s32 %s2505_s21, %s2617_s30  ;;  %p37_p13 = scmp.ne.s32.totalorder %s2501_s20, %s2497_s19 }
  0x19   : > { %p28_p12 = scmp.eq.s32.totalorder %s27_s6, 0  ;;  %p38_p0 = scmp.eq.s32.totalorder %s2505_s21, 0 }
  0x1a   : > { %p2261_p3 = scmp.lt.s32.totalorder %s2505_s21, 2  ;;  %p2631_p7 = por %p151_p2, %p37_p13 }
  0x1b   : > { %s2627_s9 = scalar_select %p28_p12, %s2501_s20, %s30_s8  }
  0x1c   : > { %p39_p5 = por %p38_p0, %p37_p13  ;;  %s220_s7 = sand.u32 1, %s2501_s20  }
  0x1d   : > { %s2222_s11 = sshll.u32 %s2505_s21, 9  ;;  %s2206_s12 = sshll.u32 %s220_s7, 9 }
  0x1e   : > { %s230_s15 = scalar_lea.hbm %s3947_s0, %s2222_s11  ;;  %s224_s17 = scalar_lea.vmem [#allocation2], %s2206_s12 }
  0x1f   : > { %s231_s16 = sshll.u32 %s230_s15, 4  ;;  %s233_s23 = sshll.u32 %s224_s17, 4  ;;  %s232_s16 = int_to_ptr.hbm [resolvable:$true] %s231_s16  ;;  %s234_s23 = int_to_ptr.vmem [resolvable:$true] %s233_s23 }
  0x20   : > { %p2642_p9 = pnand %p2261_p3, %p39_p5  ;;  %s221_s27 = scalar_lea.sflag [#allocation3], %s220_s7 }
  0x21   : > { %s2401_s28 = sshra.s32 %s232_s16, 4  ;;  %s2408_s12 = scalar_lea.hbm %s3947_s0, 1024  ;;  %s2402_s28 = int_to_ptr.hbm [resolvable:$true] %s2401_s28 }
  0x22   : > { %s2403_s6 = scalar_lea.hbm %s2402_s28, 512  ;;  %p2405_p10 = pneg %p2642_p9 }
  0x23   : > { %p2404_p2 = scmp.ne.s32.totalorder %s2402_s28, %s2403_s6  ;;  %p2409_p0 = scmp.lt.s32.totalorder %s2402_s28, %s3947_s0 }
  0x24   : > { %p2410_p3 = scmp.lt.s32.totalorder %s2408_s12, %s2403_s6 }
  0x25   : > { %p2406_p12 = pnand %p2405_p10, %p2404_p2 }
  0x26   : > { %p2411_p5 = por %p2410_p3, %p2409_p0 }
  0x27   : > { %p2407_p13 = pneg %p2406_p12 }
  0x29   : > { %p2412_p11 = pnand %p2411_p5, %p2407_p13 }
  0x2b   : > { %2415 = shalt.err (!%p2412_p11)
}
  0x2c   : > { %s2514_s7 = smov 256   ;;  %s2515_s15 = smov 16  }
  0x2d   : > { %2253 = dma.hbm_to_vmem [thread:$0]  (!%p2642_p9), %s232_s16, 8192, %s234_s23, %s221_s27, %s2514_s7, %s2514_s7, %s2515_s15  }
  0x2e   : > { %245 = sbr.rel (%p2591_p8) target bundleno = 993 (0x3e1), region = 40 }
  0x33   : > { %s2659_s17 = sand.u32 1, %s2497_s19  }
  0x34   : > { %s2211_s8 = sshll.u32 %s2659_s17, 9  ;;  %s248_s28 = scalar_lea.sflag [#allocation3], %s2659_s17 }
  0x35   : > { %s2663_s6 = scalar_lea.vmem [#allocation2], %s2211_s8 }
  0x36   : > { %2476 = dma.done.wait (%p2578_p4), %s248_s28, 8192  }
  0x37   : > { %2478 = vsyncadd (%p2578_p4), %s248_s28, 4294959104 }
  0x38   : > { %2480 = dma.done.wait (%p44_p1), [#allocation6], 16448  }
  0x39   : > { %2482 = vsyncadd (%p44_p1), [#allocation6], 4294950848 }
  0x3a   : > { %2484 = dma.done.wait (%p44_p1), [#allocation9], 8192  }
  0x3b   : > { %2486 = vsyncadd (%p44_p1), [#allocation9], 4294959104  ;;  %v420_v0 = vld [vmem:[#allocation5 + $0x1e0] sm:$0xff]  ;;  %v421_v2 = vld [vmem:[#allocation5 + $0x1e8] sm:$0xff]  ;;  %s2215_s16 = sshll.u32 %s2659_s17, 8  ;;  %s2223_s26 = sshll.u32 %s2569_s22, 8 }
  0x3c   : > { %v484_v1 = vld [vmem:[#allocation5 + $0x3e0] sm:$0xff]  ;;  %498 = vmatpush.msra.mxu0 %v420_v0  ;;  %v485_v3 = vld [vmem:[#allocation5 + $0x3e8] sm:$0xff]  ;;  %724 = vmatpush.msra.mxu2 %v421_v2  ;;  %v423_v2 = vld [vmem:[#allocation5 + $0x1f8] sm:$0xff]  ;;  %s3741_s23 = scalar_lea.vmem [#allocation10], %s2215_s16  ;;  %s2094_s12 = scalar_lea.hbm %s3952_s5, %s2223_s26 }
  0x3d   : > { %611 = vmatpush.msra.mxu1 %v484_v1  ;;  %v416_v4 = vld [vmem:[#allocation5 + $0x1c0] sm:$0xff]  ;;  %837 = vmatpush.msra.mxu3 %v485_v3  ;;  %v417_v6 = vld [vmem:[#allocation5 + $0x1c8] sm:$0xff]  ;;  %v422_v3 = vld [vmem:[#allocation5 + $0x1f0] sm:$0xff]  ;;  %s2095_s13 = sshll.u32 %s3741_s23, 4  ;;  %s2097_s14 = sshll.u32 %s2094_s12, 4  ;;  %s2096_s13 = int_to_ptr.vmem [resolvable:$true] %s2095_s13  ;;  %s2098_s14 = int_to_ptr.hbm [resolvable:$true] %s2097_s14 }
  0x3e   : > { %v480_v5 = vld [vmem:[#allocation5 + $0x3c0] sm:$0xff]  ;;  %v481_v7 = vld [vmem:[#allocation5 + $0x3c8] sm:$0xff]  ;;  %499 = vmatpush.msra.mxu0 %v416_v4  ;;  %725 = vmatpush.msra.mxu2 %v417_v6  ;;  %v487_v4 = vld [vmem:[#allocation5 + $0x3f8] sm:$0xff]  ;;  %s2083_s22 = scalar_lea.sflag [#allocation4], %s2659_s17  ;;  %s2445_s7 = sshra.s32 %s2098_s14, 4  ;;  %s2446_s7 = int_to_ptr.hbm [resolvable:$true] %s2445_s7 }
  0x3f   : > { %v412_v8 = vld [vmem:[#allocation5 + $0x1a0] sm:$0xff]  ;;  %612 = vmatpush.msra.mxu1 %v480_v5  ;;  %v413_v10 = vld [vmem:[#allocation5 + $0x1a8] sm:$0xff]  ;;  %838 = vmatpush.msra.mxu3 %v481_v7  ;;  %v486_v5 = vld [vmem:[#allocation5 + $0x3f0] sm:$0xff]  ;;  %s2447_s15 = scalar_lea.hbm %s2446_s7, 256  ;;  %p2452_p11 = scmp.lt.s32.totalorder %s2446_s7, %s3952_s5 }
  0x40   : > { %v476_v9 = vld [vmem:[#allocation5 + $0x3a0] sm:$0xff]  ;;  %v477_v11 = vld [vmem:[#allocation5 + $0x3a8] sm:$0xff]  ;;  %500 = vmatpush.msra.mxu0 %v412_v8  ;;  %726 = vmatpush.msra.mxu2 %v413_v10  ;;  %v419_v6 = vld [vmem:[#allocation5 + $0x1d8] sm:$0xff]  ;;  %p2448_p1 = scmp.ne.s32.totalorder %s2446_s7, %s2447_s15 }
  0x41   : > { %v408_v12 = vld [vmem:[#allocation5 + $0x180] sm:$0xff]  ;;  %613 = vmatpush.msra.mxu1 %v476_v9  ;;  %v409_v14 = vld [vmem:[#allocation5 + $0x188] sm:$0xff]  ;;  %839 = vmatpush.msra.mxu3 %v477_v11  ;;  %v418_v7 = vld [vmem:[#allocation5 + $0x1d0] sm:$0xff] }
  0x42   : > { %v472_v13 = vld [vmem:[#allocation5 + $0x380] sm:$0xff]  ;;  %v473_v15 = vld [vmem:[#allocation5 + $0x388] sm:$0xff]  ;;  %501 = vmatpush.msra.mxu0 %v408_v12  ;;  %727 = vmatpush.msra.mxu2 %v409_v14  ;;  %v483_v8 = vld [vmem:[#allocation5 + $0x3d8] sm:$0xff]  ;;  %p2449_p4 = pnand %p2448_p1, %p2631_p7 }
  0x43   : > { %v404_v16 = vld [vmem:[#allocation5 + $0x160] sm:$0xff]  ;;  %614 = vmatpush.msra.mxu1 %v472_v13  ;;  %v405_v18 = vld [vmem:[#allocation5 + $0x168] sm:$0xff]  ;;  %840 = vmatpush.msra.mxu3 %v473_v15  ;;  %v482_v9 = vld [vmem:[#allocation5 + $0x3d0] sm:$0xff] }
  0x44   : > { %v468_v17 = vld [vmem:[#allocation5 + $0x360] sm:$0xff]  ;;  %v469_v19 = vld [vmem:[#allocation5 + $0x368] sm:$0xff]  ;;  %502 = vmatpush.msra.mxu0 %v404_v16  ;;  %728 = vmatpush.msra.mxu2 %v405_v18  ;;  %v415_v10 = vld [vmem:[#allocation5 + $0x1b8] sm:$0xff]  ;;  %p2450_p8 = pneg %p2449_p4 }
  0x45   : > { %v400_v20 = vld [vmem:[#allocation5 + $0x140] sm:$0xff]  ;;  %615 = vmatpush.msra.mxu1 %v468_v17  ;;  %v401_v22 = vld [vmem:[#allocation5 + $0x148] sm:$0xff]  ;;  %841 = vmatpush.msra.mxu3 %v469_v19  ;;  %v414_v11 = vld [vmem:[#allocation5 + $0x1b0] sm:$0xff] }
  0x46   : > { %v464_v21 = vld [vmem:[#allocation5 + $0x340] sm:$0xff]  ;;  %v465_v23 = vld [vmem:[#allocation5 + $0x348] sm:$0xff]  ;;  %503 = vmatpush.msra.mxu0 %v400_v20  ;;  %729 = vmatpush.msra.mxu2 %v401_v22  ;;  %v479_v12 = vld [vmem:[#allocation5 + $0x3b8] sm:$0xff] }
  0x47   : > { %v396_v24 = vld [vmem:[#allocation5 + $0x120] sm:$0xff]  ;;  %616 = vmatpush.msra.mxu1 %v464_v21  ;;  %v397_v26 = vld [vmem:[#allocation5 + $0x128] sm:$0xff]  ;;  %842 = vmatpush.msra.mxu3 %v465_v23  ;;  %v478_v13 = vld [vmem:[#allocation5 + $0x3b0] sm:$0xff] }
  0x48   : > { %v460_v25 = vld [vmem:[#allocation5 + $0x320] sm:$0xff]  ;;  %v461_v27 = vld [vmem:[#allocation5 + $0x328] sm:$0xff]  ;;  %504 = vmatpush.msra.mxu0 %v396_v24  ;;  %730 = vmatpush.msra.mxu2 %v397_v26  ;;  %v2688_v14 = vld [vmem:[%s2663_s6 + $0x10] sm:$0xff] }
  0x49   : > { %v392_v28 = vld [vmem:[#allocation5 + $0x100] sm:$0xff]  ;;  %617 = vmatpush.msra.mxu1 %v460_v25  ;;  %v393_v30 = vld [vmem:[#allocation5 + $0x108] sm:$0xff]  ;;  %843 = vmatpush.msra.mxu3 %v461_v27  ;;  %v2691_v15 = vld [vmem:[%s2663_s6 + $0x18] sm:$0xff] }
  0x4a   : > { %v456_v29 = vld [vmem:[#allocation5 + $0x300] sm:$0xff]  ;;  %v457_v31 = vld [vmem:[#allocation5 + $0x308] sm:$0xff]  ;;  %505 = vmatpush.msra.mxu0 %v392_v28  ;;  %731 = vmatpush.msra.mxu2 %v393_v30  ;;  %v411_v18 = vld [vmem:[#allocation5 + $0x198] sm:$0xff] }
  0x4b   : > { %v388_v32 = vld [vmem:[#allocation5 + $0xe0] sm:$0xff]  ;;  %618 = vmatpush.msra.mxu1 %v456_v29  ;;  %v389_v34 = vld [vmem:[#allocation5 + $0xe8] sm:$0xff]  ;;  %844 = vmatpush.msra.mxu3 %v457_v31  ;;  %v410_v19 = vld [vmem:[#allocation5 + $0x190] sm:$0xff] }
  0x4c   : > { %v452_v33 = vld [vmem:[#allocation5 + $0x2e0] sm:$0xff]  ;;  %v453_v35 = vld [vmem:[#allocation5 + $0x2e8] sm:$0xff]  ;;  %506 = vmatpush.msra.mxu0 %v388_v32  ;;  %732 = vmatpush.msra.mxu2 %v389_v34  ;;  %v475_v20 = vld [vmem:[#allocation5 + $0x398] sm:$0xff] }
  0x4d   : > { %v384_v36 = vld [vmem:[#allocation5 + $0xc0] sm:$0xff]  ;;  %619 = vmatpush.msra.mxu1 %v452_v33  ;;  %v385_v38 = vld [vmem:[#allocation5 + $0xc8] sm:$0xff]  ;;  %845 = vmatpush.msra.mxu3 %v453_v35  ;;  %v474_v21 = vld [vmem:[#allocation5 + $0x390] sm:$0xff] }
  0x4e   : > { %v448_v37 = vld [vmem:[#allocation5 + $0x2c0] sm:$0xff]  ;;  %v449_v39 = vld [vmem:[#allocation5 + $0x2c8] sm:$0xff]  ;;  %507 = vmatpush.msra.mxu0 %v384_v36  ;;  %733 = vmatpush.msra.mxu2 %v385_v38  ;;  %v2708_v22 = vld [vmem:[%s2663_s6 + $0x30] sm:$0xff] }
  0x4f   : > { %v380_v40 = vld [vmem:[#allocation5 + $0xa0] sm:$0xff]  ;;  %620 = vmatpush.msra.mxu1 %v448_v37  ;;  %v381_v42 = vld [vmem:[#allocation5 + $0xa8] sm:$0xff]  ;;  %846 = vmatpush.msra.mxu3 %v449_v39  ;;  %v2711_v23 = vld [vmem:[%s2663_s6 + $0x38] sm:$0xff] }
  0x50   : > { %v444_v41 = vld [vmem:[#allocation5 + $0x2a0] sm:$0xff]  ;;  %v445_v43 = vld [vmem:[#allocation5 + $0x2a8] sm:$0xff]  ;;  %508 = vmatpush.msra.mxu0 %v380_v40  ;;  %734 = vmatpush.msra.mxu2 %v381_v42  ;;  %v407_v26 = vld [vmem:[#allocation5 + $0x178] sm:$0xff] }
  0x51   : > { %v376_v44 = vld [vmem:[#allocation5 + $0x80] sm:$0xff]  ;;  %621 = vmatpush.msra.mxu1 %v444_v41  ;;  %v377_v46 = vld [vmem:[#allocation5 + $0x88] sm:$0xff]  ;;  %847 = vmatpush.msra.mxu3 %v445_v43  ;;  %v406_v27 = vld [vmem:[#allocation5 + $0x170] sm:$0xff] }
  0x52   : > { %v440_v45 = vld [vmem:[#allocation5 + $0x280] sm:$0xff]  ;;  %v441_v47 = vld [vmem:[#allocation5 + $0x288] sm:$0xff]  ;;  %509 = vmatpush.msra.mxu0 %v376_v44  ;;  %735 = vmatpush.msra.mxu2 %v377_v46  ;;  %v471_v28 = vld [vmem:[#allocation5 + $0x378] sm:$0xff] }
  0x53   : > { %v372_v48 = vld [vmem:[#allocation5 + $0x60] sm:$0xff]  ;;  %622 = vmatpush.msra.mxu1 %v440_v45  ;;  %v373_v50 = vld [vmem:[#allocation5 + $0x68] sm:$0xff]  ;;  %848 = vmatpush.msra.mxu3 %v441_v47  ;;  %v470_v29 = vld [vmem:[#allocation5 + $0x370] sm:$0xff] }
  0x54   : > { %v436_v49 = vld [vmem:[#allocation5 + $0x260] sm:$0xff]  ;;  %v437_v51 = vld [vmem:[#allocation5 + $0x268] sm:$0xff]  ;;  %510 = vmatpush.msra.mxu0 %v372_v48  ;;  %736 = vmatpush.msra.mxu2 %v373_v50  ;;  %v2728_v30 = vld [vmem:[%s2663_s6 + $0x50] sm:$0xff] }
  0x55   : > { %v368_v52 = vld [vmem:[#allocation5 + $0x40] sm:$0xff]  ;;  %623 = vmatpush.msra.mxu1 %v436_v49  ;;  %v369_v54 = vld [vmem:[#allocation5 + $0x48] sm:$0xff]  ;;  %849 = vmatpush.msra.mxu3 %v437_v51  ;;  %v2731_v31 = vld [vmem:[%s2663_s6 + $0x58] sm:$0xff] }
  0x56   : > { %v432_v53 = vld [vmem:[#allocation5 + $0x240] sm:$0xff]  ;;  %v433_v55 = vld [vmem:[#allocation5 + $0x248] sm:$0xff]  ;;  %511 = vmatpush.msra.mxu0 %v368_v52  ;;  %737 = vmatpush.msra.mxu2 %v369_v54  ;;  %v403_v34 = vld [vmem:[#allocation5 + $0x158] sm:$0xff] }
  0x57   : > { %v364_v56 = vld [vmem:[#allocation5 + $0x20] sm:$0xff]  ;;  %624 = vmatpush.msra.mxu1 %v432_v53  ;;  %v365_v58 = vld [vmem:[#allocation5 + $0x28] sm:$0xff]  ;;  %850 = vmatpush.msra.mxu3 %v433_v55  ;;  %v402_v35 = vld [vmem:[#allocation5 + $0x150] sm:$0xff] }
  0x58   : > { %v428_v57 = vld [vmem:[#allocation5 + $0x220] sm:$0xff]  ;;  %v429_v59 = vld [vmem:[#allocation5 + $0x228] sm:$0xff]  ;;  %512 = vmatpush.msra.mxu0 %v364_v56  ;;  %738 = vmatpush.msra.mxu2 %v365_v58  ;;  %v467_v36 = vld [vmem:[#allocation5 + $0x358] sm:$0xff] }
  0x59   : > { %v360_v60 = vld [vmem:[#allocation5] sm:$0xff]  ;;  %625 = vmatpush.msra.mxu1 %v428_v57  ;;  %v361_v62 = vld [vmem:[#allocation5 + $0x8] sm:$0xff]  ;;  %851 = vmatpush.msra.mxu3 %v429_v59  ;;  %v466_v37 = vld [vmem:[#allocation5 + $0x350] sm:$0xff] }
  0x5a   : > { %v424_v61 = vld [vmem:[#allocation5 + $0x200] sm:$0xff]  ;;  %v425_v63 = vld [vmem:[#allocation5 + $0x208] sm:$0xff]  ;;  %513 = vmatpush.msra.mxu0 %v360_v60  ;;  %739 = vmatpush.msra.mxu2 %v361_v62  ;;  %v2748_v38 = vld [vmem:[%s2663_s6 + $0x70] sm:$0xff] }
  0x5b   : > { %v2678_v0 = vld [vmem:[%s2663_s6] sm:$0xff]  ;;  %v2681_v1 = vld [vmem:[%s2663_s6 + $0x8] sm:$0xff]  ;;  %626 = vmatpush.msra.mxu1 %v424_v61  ;;  %852 = vmatpush.msra.mxu3 %v425_v63  ;;  %v2751_v39 = vld [vmem:[%s2663_s6 + $0x78] sm:$0xff] }
  0x5c   : > { %514 = vmatmul.f32.vlgmr.msra.gmra.mxu0 %v2678_v0  ;;  %627 = vmatmul.f32.vlgmr.msra.gmra.mxu1 %v2681_v1  ;;  %v2698_v16 = vld [vmem:[%s2663_s6 + $0x20] sm:$0xff]  ;;  %v2701_v17 = vld [vmem:[%s2663_s6 + $0x28] sm:$0xff]  ;;  %v399_v42 = vld [vmem:[#allocation5 + $0x138] sm:$0xff] }
  0x5d   : > { %740 = vmatmul.f32.vlgmr.msra.gmra.mxu2 %v2678_v0  ;;  %853 = vmatmul.f32.vlgmr.msra.gmra.mxu3 %v2681_v1  ;;  %v2718_v24 = vld [vmem:[%s2663_s6 + $0x40] sm:$0xff]  ;;  %v2721_v25 = vld [vmem:[%s2663_s6 + $0x48] sm:$0xff]  ;;  %v398_v43 = vld [vmem:[#allocation5 + $0x130] sm:$0xff] }
  0x5e   : > { %1176 = vmatpush.msrb.mxu2 %v423_v2  ;;  %950 = vmatpush.msrb.mxu0 %v422_v3  ;;  %v2738_v32 = vld [vmem:[%s2663_s6 + $0x60] sm:$0xff]  ;;  %v2741_v33 = vld [vmem:[%s2663_s6 + $0x68] sm:$0xff]  ;;  %v463_v44 = vld [vmem:[#allocation5 + $0x338] sm:$0xff] }
  0x5f   : > { %1289 = vmatpush.msrb.mxu3 %v487_v4  ;;  %1063 = vmatpush.msrb.mxu1 %v486_v5  ;;  %v2758_v40 = vld [vmem:[%s2663_s6 + $0x80] sm:$0xff]  ;;  %v2761_v41 = vld [vmem:[%s2663_s6 + $0x88] sm:$0xff]  ;;  %v462_v45 = vld [vmem:[#allocation5 + $0x330] sm:$0xff] }
  0x60   : > { %1177 = vmatpush.msrb.mxu2 %v419_v6  ;;  %951 = vmatpush.msrb.mxu0 %v418_v7  ;;  %v2768_v46 = vld [vmem:[%s2663_s6 + $0x90] sm:$0xff]  ;;  %v2771_v47 = vld [vmem:[%s2663_s6 + $0x98] sm:$0xff]  ;;  %v2778_v48 = vld [vmem:[%s2663_s6 + $0xa0] sm:$0xff] }
  0x61   : > { %1290 = vmatpush.msrb.mxu3 %v483_v8  ;;  %1064 = vmatpush.msrb.mxu1 %v482_v9  ;;  %v2781_v49 = vld [vmem:[%s2663_s6 + $0xa8] sm:$0xff]  ;;  %v395_v50 = vld [vmem:[#allocation5 + $0x118] sm:$0xff]  ;;  %v394_v51 = vld [vmem:[#allocation5 + $0x110] sm:$0xff] }
  0x62   : > { %1178 = vmatpush.msrb.mxu2 %v415_v10  ;;  %952 = vmatpush.msrb.mxu0 %v414_v11  ;;  %v459_v52 = vld [vmem:[#allocation5 + $0x318] sm:$0xff]  ;;  %v458_v53 = vld [vmem:[#allocation5 + $0x310] sm:$0xff]  ;;  %v2798_v56 = vld [vmem:[%s2663_s6 + $0xc0] sm:$0xff] }
  0x63   : > { %1291 = vmatpush.msrb.mxu3 %v479_v12  ;;  %1065 = vmatpush.msrb.mxu1 %v478_v13  ;;  %v2788_v54 = vld [vmem:[%s2663_s6 + $0xb0] sm:$0xff]  ;;  %v2791_v55 = vld [vmem:[%s2663_s6 + $0xb8] sm:$0xff]  ;;  %v2801_v57 = vld [vmem:[%s2663_s6 + $0xc8] sm:$0xff] }
  0x64   : > { %517 = vmatmul.f32.gmra.mxu0 %v2688_v14  ;;  %630 = vmatmul.f32.gmra.mxu1 %v2691_v15  ;;  %v391_v58 = vld [vmem:[#allocation5 + $0xf8] sm:$0xff]  ;;  %v390_v59 = vld [vmem:[#allocation5 + $0xf0] sm:$0xff]  ;;  %v2818_v2 = vld [vmem:[%s2663_s6 + $0xe0] sm:$0xff] }
  0x65   : > { %743 = vmatmul.f32.gmra.mxu2 %v2688_v14  ;;  %856 = vmatmul.f32.gmra.mxu3 %v2691_v15  ;;  %v455_v60 = vld [vmem:[#allocation5 + $0x2f8] sm:$0xff]  ;;  %v2808_v61 = vld [vmem:[%s2663_s6 + $0xd0] sm:$0xff]  ;;  %v2821_v3 = vld [vmem:[%s2663_s6 + $0xe8] sm:$0xff] }
  0x66   : > { %1179 = vmatpush.msrb.mxu2 %v411_v18  ;;  %953 = vmatpush.msrb.mxu0 %v410_v19  ;;  %v2811_v62 = vld [vmem:[%s2663_s6 + $0xd8] sm:$0xff]  ;;  %v454_v63 = vld [vmem:[#allocation5 + $0x2f0] sm:$0xff]  ;;  %v2842_v12 = vld [vmem:[%s2663_s6 + $0x100] sm:$0xff] }
  0x67   : > { %1292 = vmatpush.msrb.mxu3 %v475_v20  ;;  %1066 = vmatpush.msrb.mxu1 %v474_v21  ;;  %v387_v4 = vld [vmem:[#allocation5 + $0xd8] sm:$0xff]  ;;  %v386_v5 = vld [vmem:[#allocation5 + $0xd0] sm:$0xff]  ;;  %v2845_v13 = vld [vmem:[%s2663_s6 + $0x108] sm:$0xff] }
  0x68   : > { %1180 = vmatpush.msrb.mxu2 %v407_v26  ;;  %954 = vmatpush.msrb.mxu0 %v406_v27  ;;  %v451_v6 = vld [vmem:[#allocation5 + $0x2d8] sm:$0xff]  ;;  %v2828_v7 = vld [vmem:[%s2663_s6 + $0xf0] sm:$0xff]  ;;  %v2847_v18 = vld [vmem:[#allocation7] sm:$0xf] }
  0x69   : > { %1293 = vmatpush.msrb.mxu3 %v471_v28  ;;  %1067 = vmatpush.msrb.mxu1 %v470_v29  ;;  %v2831_v8 = vld [vmem:[%s2663_s6 + $0xf8] sm:$0xff]  ;;  %v450_v9 = vld [vmem:[#allocation5 + $0x2d0] sm:$0xff]  ;;  %v2854_v19 = vperm.slane %v2847_v18, 1 }
  0x6a   : > { %1181 = vmatpush.msrb.mxu2 %v403_v34  ;;  %955 = vmatpush.msrb.mxu0 %v402_v35  ;;  %v383_v20 = vld [vmem:[#allocation5 + $0xb8] sm:$0xff]  ;;  %v382_v21 = vld [vmem:[#allocation5 + $0xb0] sm:$0xff] }
  0x6b   : > { %1294 = vmatpush.msrb.mxu3 %v467_v36  ;;  %1068 = vmatpush.msrb.mxu1 %v466_v37  ;;  %v447_v26 = vld [vmem:[#allocation5 + $0x2b8] sm:$0xff]  ;;  %v2862_v36 = vld [vmem:[%s2663_s6 + $0x110] sm:$0xff] }
  0x6c   : > { %520 = vmatmul.f32.gmra.mxu0 %v2698_v16  ;;  %633 = vmatmul.f32.gmra.mxu1 %v2701_v17  ;;  %v2865_v37 = vld [vmem:[%s2663_s6 + $0x118] sm:$0xff] }
  0x6d   : > { %746 = vmatmul.f32.gmra.mxu2 %v2698_v16  ;;  %859 = vmatmul.f32.gmra.mxu3 %v2701_v17 }
  0x6e   : > { %1182 = vmatpush.msrb.mxu2 %v399_v42  ;;  %956 = vmatpush.msrb.mxu0 %v398_v43  ;;  %v446_v43 = vld [vmem:[#allocation5 + $0x2b0] sm:$0xff] }
  0x6f   : > { %1295 = vmatpush.msrb.mxu3 %v463_v44  ;;  %1069 = vmatpush.msrb.mxu1 %v462_v45 }
  0x70   : > { %1183 = vmatpush.msrb.mxu2 %v395_v50  ;;  %957 = vmatpush.msrb.mxu0 %v394_v51 }
  0x71   : > { %1296 = vmatpush.msrb.mxu3 %v459_v52  ;;  %1070 = vmatpush.msrb.mxu1 %v458_v53  ;;  %v2879_v53 = vld [vmem:[%s2663_s6 + $0x120] sm:$0xff] }
  0x72   : > { %1184 = vmatpush.msrb.mxu2 %v391_v58  ;;  %958 = vmatpush.msrb.mxu0 %v390_v59  ;;  %v2882_v58 = vld [vmem:[%s2663_s6 + $0x128] sm:$0xff] }
  0x73   : > { %1297 = vmatpush.msrb.mxu3 %v455_v60  ;;  %1071 = vmatpush.msrb.mxu1 %v454_v63  ;;  %v379_v60 = vld [vmem:[#allocation5 + $0x98] sm:$0xff]  ;;  %v378_v63 = vld [vmem:[#allocation5 + $0x90] sm:$0xff] }
  0x74   : > { %523 = vmatmul.f32.gmra.mxu0 %v2708_v22  ;;  %636 = vmatmul.f32.gmra.mxu1 %v2711_v23 }
  0x75   : > { %749 = vmatmul.f32.gmra.mxu2 %v2708_v22  ;;  %862 = vmatmul.f32.gmra.mxu3 %v2711_v23 }
  0x76   : > { %1185 = vmatpush.msrb.mxu2 %v387_v4  ;;  %959 = vmatpush.msrb.mxu0 %v386_v5  ;;  %v443_v4 = vld [vmem:[#allocation5 + $0x298] sm:$0xff] }
  0x77   : > { %1298 = vmatpush.msrb.mxu3 %v451_v6  ;;  %1072 = vmatpush.msrb.mxu1 %v450_v9 }
  0x78   : > { %1186 = vmatpush.msrb.mxu2 %v383_v20  ;;  %960 = vmatpush.msrb.mxu0 %v382_v21 }
  0x79   : > { %1299 = vmatpush.msrb.mxu3 %v447_v26  ;;  %1073 = vmatpush.msrb.mxu1 %v446_v43  ;;  %v2896_v26 = vld [vmem:[%s2663_s6 + $0x130] sm:$0xff] }
  0x7a   : > { %1187 = vmatpush.msrb.mxu2 %v379_v60  ;;  %961 = vmatpush.msrb.mxu0 %v378_v63  ;;  %v2913_v63 = vld [vmem:[%s2663_s6 + $0x140] sm:$0xff] }
  0x7b   : > { %1300 = vmatpush.msrb.mxu3 %v443_v4  ;;  %v2916_v4 = vld [vmem:[%s2663_s6 + $0x148] sm:$0xff] }
  0x7c   : > { %526 = vmatmul.f32.gmra.mxu0 %v2718_v24  ;;  %639 = vmatmul.f32.gmra.mxu1 %v2721_v25 }
  0x7d   : > { %752 = vmatmul.f32.gmra.mxu2 %v2718_v24  ;;  %865 = vmatmul.f32.gmra.mxu3 %v2721_v25 }
  0x84   : > { %529 = vmatmul.f32.gmra.mxu0 %v2728_v30  ;;  %642 = vmatmul.f32.gmra.mxu1 %v2731_v31 }
  0x85   : > { %755 = vmatmul.f32.gmra.mxu2 %v2728_v30  ;;  %868 = vmatmul.f32.gmra.mxu3 %v2731_v31 }
  0x8c   : > { %532 = vmatmul.f32.gmra.mxu0 %v2738_v32  ;;  %645 = vmatmul.f32.gmra.mxu1 %v2741_v33 }
  0x8d   : > { %758 = vmatmul.f32.gmra.mxu2 %v2738_v32  ;;  %871 = vmatmul.f32.gmra.mxu3 %v2741_v33 }
  0x94   : > { %535 = vmatmul.f32.gmra.mxu0 %v2748_v38  ;;  %648 = vmatmul.f32.gmra.mxu1 %v2751_v39 }
  0x95   : > { %761 = vmatmul.f32.gmra.mxu2 %v2748_v38  ;;  %874 = vmatmul.f32.gmra.mxu3 %v2751_v39 }
  0x9c   : > { %538 = vmatmul.f32.gmra.mxu0 %v2758_v40  ;;  %651 = vmatmul.f32.gmra.mxu1 %v2761_v41 }
  0x9d   : > { %764 = vmatmul.f32.gmra.mxu2 %v2758_v40  ;;  %877 = vmatmul.f32.gmra.mxu3 %v2761_v41 }
  0xa4   : > { %541 = vmatmul.f32.gmra.mxu0 %v2768_v46  ;;  %654 = vmatmul.f32.gmra.mxu1 %v2771_v47 }
  0xa5   : > { %767 = vmatmul.f32.gmra.mxu2 %v2768_v46  ;;  %880 = vmatmul.f32.gmra.mxu3 %v2771_v47 }
  0xac   : > { %544 = vmatmul.f32.gmra.mxu0 %v2778_v48  ;;  %657 = vmatmul.f32.gmra.mxu1 %v2781_v49 }
  0xad   : > { %770 = vmatmul.f32.gmra.mxu2 %v2778_v48  ;;  %883 = vmatmul.f32.gmra.mxu3 %v2781_v49 }
  0xb4   : > { %547 = vmatmul.f32.gmra.mxu0 %v2788_v54  ;;  %660 = vmatmul.f32.gmra.mxu1 %v2791_v55 }
  0xb5   : > { %773 = vmatmul.f32.gmra.mxu2 %v2788_v54  ;;  %886 = vmatmul.f32.gmra.mxu3 %v2791_v55 }
  0xbc   : > { %550 = vmatmul.f32.gmra.mxu0 %v2798_v56  ;;  %663 = vmatmul.f32.gmra.mxu1 %v2801_v57 }
  0xbd   : > { %776 = vmatmul.f32.gmra.mxu2 %v2798_v56  ;;  %889 = vmatmul.f32.gmra.mxu3 %v2801_v57 }
  0xc4   : > { %553 = vmatmul.f32.gmra.mxu0 %v2808_v61  ;;  %666 = vmatmul.f32.gmra.mxu1 %v2811_v62 }
  0xc5   : > { %779 = vmatmul.f32.gmra.mxu2 %v2808_v61  ;;  %892 = vmatmul.f32.gmra.mxu3 %v2811_v62 }
  0xcc   : > { %556 = vmatmul.f32.gmra.mxu0 %v2818_v2  ;;  %669 = vmatmul.f32.gmra.mxu1 %v2821_v3 }
  0xcd   : > { %782 = vmatmul.f32.gmra.mxu2 %v2818_v2  ;;  %895 = vmatmul.f32.gmra.mxu3 %v2821_v3 }
  0xd4   : > { %559 = vmatmul.f32.gmra.mxu0 %v2828_v7  ;;  %672 = vmatmul.f32.gmra.mxu1 %v2831_v8 }
  0xd5   : > { %785 = vmatmul.f32.gmra.mxu2 %v2828_v7  ;;  %898 = vmatmul.f32.gmra.mxu3 %v2831_v8 }
  0xd9   : > { %v2837_v10 = vpop.f32.mrf.mxu0  ;;  %v2839_v11 = vpop.f32.mrf.mxu1 }
  0xda   : > { %3983 = vst [vmem:[#allocation15_spill] sm:$0xff] %v2837_v10 }
  0xdb   : > { %3984 = vst [vmem:[#allocation16_spill] sm:$0xff] %v2839_v11 }
  0xdc   : > { %562 = vmatmul.f32.gmra.mxu0 %v2842_v12  ;;  %675 = vmatmul.f32.gmra.mxu1 %v2845_v13 }
  0xdd   : > { %788 = vmatmul.f32.gmra.mxu2 %v2842_v12  ;;  %901 = vmatmul.f32.gmra.mxu3 %v2845_v13 }
  0xe0   : > { %v741_v27 = vpop.f32.mrf.mxu2  ;;  %v854_v28 = vpop.f32.mrf.mxu3 }
  0xe1   : > { %v742_v29 = vadd.f32 %v741_v27, %v2854_v19  ;;  %v2857_v34 = vpop.f32.mrf.mxu0  ;;  %v2859_v35 = vpop.f32.mrf.mxu1  ;;  %v2899_v27 = vld [vmem:[%s2663_s6 + $0x138] sm:$0xff] }
  0xe2   : > { %3985 = vst [vmem:[#allocation17_spill] sm:$0xff] %v2857_v34  ;;  %v2998_v34 = vld [vmem:[%s2663_s6 + $0x190] sm:$0xff] }
  0xe3   : > { %3986 = vst [vmem:[#allocation18_spill] sm:$0xff] %v2859_v35  ;;  %v2867_v42 = vadd.f32 %v854_v28, %v742_v29  ;;  %v442_v29 = vld [vmem:[#allocation5 + $0x290] sm:$0xff] }
  0xe4   : > { %565 = vmatmul.f32.gmra.mxu0 %v2862_v36  ;;  %678 = vmatmul.f32.gmra.mxu1 %v2865_v37  ;;  %4011 = vst [vmem:[#allocation43_spill] sm:$0xff] %v2998_v34 }
  0xe5   : > { %3987 = vst [vmem:[#allocation19_spill] sm:$0xff] %v2867_v42  ;;  %791 = vmatmul.f32.gmra.mxu2 %v2862_v36  ;;  %904 = vmatmul.f32.gmra.mxu3 %v2865_v37  ;;  %v3001_v42 = vld [vmem:[%s2663_s6 + $0x198] sm:$0xff] }
  0xe6   : > { %1074 = vmatpush.msrb.mxu1 %v442_v29  ;;  %v439_v29 = vld [vmem:[#allocation5 + $0x278] sm:$0xff]  ;;  %4012 = vst [vmem:[#allocation44_spill] sm:$0xff] %v3001_v42 }
  0xe7   : > { %1301 = vmatpush.msrb.mxu3 %v439_v29 }
  0xe8   : > { %v744_v44 = vpop.f32.mrf.mxu2  ;;  %v857_v45 = vpop.f32.mrf.mxu3 }
  0xe9   : > { %v745_v50 = vadd.f32 %v744_v44, %v2854_v19  ;;  %v2874_v51 = vpop.f32.mrf.mxu0  ;;  %v2876_v52 = vpop.f32.mrf.mxu1 }
  0xea   : > { %3988 = vst [vmem:[#allocation20_spill] sm:$0xff] %v2874_v51  ;;  %v2967_v51 = vld [vmem:[%s2663_s6 + $0x178] sm:$0xff] }
  0xeb   : > { %3989 = vst [vmem:[#allocation21_spill] sm:$0xff] %v2876_v52  ;;  %v2884_v59 = vadd.f32 %v857_v45, %v745_v50  ;;  %v2964_v52 = vld [vmem:[%s2663_s6 + $0x170] sm:$0xff] }
  0xec   : > { %568 = vmatmul.f32.gmra.mxu0 %v2879_v53  ;;  %681 = vmatmul.f32.gmra.mxu1 %v2882_v58 }
  0xed   : > { %3990 = vst [vmem:[#allocation22_spill] sm:$0xff] %v2884_v59  ;;  %794 = vmatmul.f32.gmra.mxu2 %v2879_v53  ;;  %907 = vmatmul.f32.gmra.mxu3 %v2882_v58 }
  0xf0   : > { %v747_v5 = vpop.f32.mrf.mxu2  ;;  %v860_v6 = vpop.f32.mrf.mxu3 }
  0xf1   : > { %v748_v9 = vadd.f32 %v747_v5, %v2854_v19  ;;  %v2891_v20 = vpop.f32.mrf.mxu0  ;;  %v2893_v21 = vpop.f32.mrf.mxu1 }
  0xf2   : > { %3991 = vst [vmem:[#allocation23_spill] sm:$0xff] %v2891_v20 }
  0xf3   : > { %3992 = vst [vmem:[#allocation24_spill] sm:$0xff] %v2893_v21  ;;  %v2901_v28 = vadd.f32 %v860_v6, %v748_v9  ;;  %v375_v6 = vld [vmem:[#allocation5 + $0x78] sm:$0xff]  ;;  %v374_v9 = vld [vmem:[#allocation5 + $0x70] sm:$0xff] }
  0xf4   : > { %571 = vmatmul.f32.gmra.mxu0 %v2896_v26  ;;  %684 = vmatmul.f32.gmra.mxu1 %v2899_v27  ;;  %v2933_v21 = vld [vmem:[%s2663_s6 + $0x158] sm:$0xff] }
  0xf5   : > { %3993 = vst [vmem:[#allocation25_spill] sm:$0xff] %v2901_v28  ;;  %797 = vmatmul.f32.gmra.mxu2 %v2896_v26  ;;  %910 = vmatmul.f32.gmra.mxu3 %v2899_v27 }
  0xf6   : > { %1188 = vmatpush.msrb.mxu2 %v375_v6  ;;  %962 = vmatpush.msrb.mxu0 %v374_v9  ;;  %v438_v6 = vld [vmem:[#allocation5 + $0x270] sm:$0xff] }
  0xf7   : > { %1075 = vmatpush.msrb.mxu1 %v438_v6  ;;  %v371_v6 = vld [vmem:[#allocation5 + $0x58] sm:$0xff] }
  0xf8   : > { %v750_v43 = vpop.f32.mrf.mxu2  ;;  %v863_v44 = vpop.f32.mrf.mxu3  ;;  %1189 = vmatpush.msrb.mxu2 %v371_v6 }
  0xf9   : > { %v751_v45 = vadd.f32 %v750_v43, %v2854_v19  ;;  %v2908_v50 = vpop.f32.mrf.mxu0  ;;  %v2910_v60 = vpop.f32.mrf.mxu1 }
  0xfa   : > { %3994 = vst [vmem:[#allocation26_spill] sm:$0xff] %v2908_v50 }
  0xfb   : > { %3995 = vst [vmem:[#allocation27_spill] sm:$0xff] %v2910_v60  ;;  %v2918_v5 = vadd.f32 %v863_v44, %v751_v45 }
  0xfc   : > { %574 = vmatmul.f32.gmra.mxu0 %v2913_v63  ;;  %687 = vmatmul.f32.gmra.mxu1 %v2916_v4 }
  0xfd   : > { %3996 = vst [vmem:[#allocation28_spill] sm:$0xff] %v2918_v5  ;;  %800 = vmatmul.f32.gmra.mxu2 %v2913_v63  ;;  %913 = vmatmul.f32.gmra.mxu3 %v2916_v4  ;;  %v2930_v5 = vld [vmem:[%s2663_s6 + $0x150] sm:$0xff] }
 0x100   : > { %v753_v43 = vpop.f32.mrf.mxu2  ;;  %v866_v60 = vpop.f32.mrf.mxu3 }
 0x101   : > { %v754_v44 = vadd.f32 %v753_v43, %v2854_v19  ;;  %v2925_v45 = vpop.f32.mrf.mxu0  ;;  %v2927_v50 = vpop.f32.mrf.mxu1 }
 0x102   : > { %3997 = vst [vmem:[#allocation29_spill] sm:$0xff] %v2925_v45 }
 0x103   : > { %3998 = vst [vmem:[#allocation30_spill] sm:$0xff] %v2927_v50  ;;  %v2935_v20 = vadd.f32 %v866_v60, %v754_v44  ;;  %v2947_v60 = vld [vmem:[%s2663_s6 + $0x160] sm:$0xff]  ;;  %v2950_v44 = vld [vmem:[%s2663_s6 + $0x168] sm:$0xff] }
 0x104   : > { %577 = vmatmul.f32.gmra.mxu0 %v2930_v5  ;;  %690 = vmatmul.f32.gmra.mxu1 %v2933_v21 }
 0x105   : > { %3999 = vst [vmem:[#allocation31_spill] sm:$0xff] %v2935_v20  ;;  %803 = vmatmul.f32.gmra.mxu2 %v2930_v5  ;;  %916 = vmatmul.f32.gmra.mxu3 %v2933_v21 }
 0x108   : > { %v756_v9 = vpop.f32.mrf.mxu2  ;;  %v869_v29 = vpop.f32.mrf.mxu3 }
 0x109   : > { %v757_v43 = vadd.f32 %v756_v9, %v2854_v19  ;;  %v2942_v50 = vpop.f32.mrf.mxu0  ;;  %v2944_v45 = vpop.f32.mrf.mxu1  ;;  %v370_v9 = vld [vmem:[#allocation5 + $0x50] sm:$0xff] }
 0x10a   : > { %4000 = vst [vmem:[#allocation32_spill] sm:$0xff] %v2942_v50  ;;  %v435_v50 = vld [vmem:[#allocation5 + $0x258] sm:$0xff]  ;;  %963 = vmatpush.msrb.mxu0 %v370_v9 }
 0x10b   : > { %4001 = vst [vmem:[#allocation33_spill] sm:$0xff] %v2944_v45  ;;  %v2952_v20 = vadd.f32 %v869_v29, %v757_v43  ;;  %1302 = vmatpush.msrb.mxu3 %v435_v50  ;;  %v434_v50 = vld [vmem:[#allocation5 + $0x250] sm:$0xff] }
 0x10c   : > { %580 = vmatmul.f32.gmra.mxu0 %v2947_v60  ;;  %693 = vmatmul.f32.gmra.mxu1 %v2950_v44 }
 0x10d   : > { %4002 = vst [vmem:[#allocation34_spill] sm:$0xff] %v2952_v20  ;;  %806 = vmatmul.f32.gmra.mxu2 %v2947_v60  ;;  %919 = vmatmul.f32.gmra.mxu3 %v2950_v44 }
 0x10e   : > { %1076 = vmatpush.msrb.mxu1 %v434_v50  ;;  %v367_v50 = vld [vmem:[#allocation5 + $0x38] sm:$0xff] }
 0x10f   : > { %1190 = vmatpush.msrb.mxu2 %v367_v50 }
 0x110   : > { %v759_v45 = vpop.f32.mrf.mxu2  ;;  %v872_v28 = vpop.f32.mrf.mxu3 }
 0x111   : > { %v760_v29 = vadd.f32 %v759_v45, %v2854_v19  ;;  %v2959_v43 = vpop.f32.mrf.mxu0  ;;  %v2961_v20 = vpop.f32.mrf.mxu1 }
 0x112   : > { %4003 = vst [vmem:[#allocation35_spill] sm:$0xff] %v2959_v43 }
 0x113   : > { %4004 = vst [vmem:[#allocation36_spill] sm:$0xff] %v2961_v20  ;;  %v2969_v59 = vadd.f32 %v872_v28, %v760_v29  ;;  %v2981_v28 = vld [vmem:[%s2663_s6 + $0x180] sm:$0xff]  ;;  %v2984_v29 = vld [vmem:[%s2663_s6 + $0x188] sm:$0xff] }
 0x114   : > { %583 = vmatmul.f32.gmra.mxu0 %v2964_v52  ;;  %696 = vmatmul.f32.gmra.mxu1 %v2967_v51 }
 0x115   : > { %4005 = vst [vmem:[#allocation37_spill] sm:$0xff] %v2969_v59  ;;  %809 = vmatmul.f32.gmra.mxu2 %v2964_v52  ;;  %922 = vmatmul.f32.gmra.mxu3 %v2967_v51 }
 0x118   : > { %v762_v45 = vpop.f32.mrf.mxu2  ;;  %v875_v6 = vpop.f32.mrf.mxu3 }
 0x119   : > { %v763_v9 = vadd.f32 %v762_v45, %v2854_v19  ;;  %v2976_v20 = vpop.f32.mrf.mxu0  ;;  %v2978_v43 = vpop.f32.mrf.mxu1  ;;  %v366_v45 = vld [vmem:[#allocation5 + $0x30] sm:$0xff] }
 0x11a   : > { %4006 = vst [vmem:[#allocation38_spill] sm:$0xff] %v2976_v20  ;;  %v431_v20 = vld [vmem:[#allocation5 + $0x238] sm:$0xff]  ;;  %964 = vmatpush.msrb.mxu0 %v366_v45 }
 0x11b   : > { %4007 = vst [vmem:[#allocation39_spill] sm:$0xff] %v2978_v43  ;;  %v2986_v59 = vadd.f32 %v875_v6, %v763_v9  ;;  %1303 = vmatpush.msrb.mxu3 %v431_v20  ;;  %v430_v20 = vld [vmem:[#allocation5 + $0x230] sm:$0xff] }
 0x11c   : > { %586 = vmatmul.f32.gmra.mxu0 %v2981_v28  ;;  %699 = vmatmul.f32.gmra.mxu1 %v2984_v29 }
 0x11d   : > { %4008 = vst [vmem:[#allocation40_spill] sm:$0xff] %v2986_v59  ;;  %812 = vmatmul.f32.gmra.mxu2 %v2981_v28  ;;  %925 = vmatmul.f32.gmra.mxu3 %v2984_v29 }
 0x11e   : > { %1077 = vmatpush.msrb.mxu1 %v430_v20  ;;  %v363_v20 = vld [vmem:[#allocation5 + $0x18] sm:$0xff] }
 0x11f   : > { %1191 = vmatpush.msrb.mxu2 %v363_v20 }
 0x120   : > { %v765_v43 = vpop.f32.mrf.mxu2  ;;  %v878_v35 = vpop.f32.mrf.mxu3 }
 0x121   : > { %v766_v6 = vadd.f32 %v765_v43, %v2854_v19  ;;  %v2993_v9 = vpop.f32.mrf.mxu0  ;;  %v2995_v59 = vpop.f32.mrf.mxu1 }
 0x122   : > { %4009 = vst [vmem:[#allocation41_spill] sm:$0xff] %v2993_v9 }
 0x123   : > { %4010 = vst [vmem:[#allocation42_spill] sm:$0xff] %v2995_v59  ;;  %v3003_v11 = vadd.f32 %v878_v35, %v766_v6  ;;  %v3015_v35 = vld [vmem:[%s2663_s6 + $0x1a0] sm:$0xff]  ;;  %v3018_v6 = vld [vmem:[%s2663_s6 + $0x1a8] sm:$0xff] }
 0x124   : > { %589 = vmatmul.f32.gmra.mxu0 %v2998_v34  ;;  %702 = vmatmul.f32.gmra.mxu1 %v3001_v42  ;;  %4016 = vst [vmem:[#allocation48_spill] sm:$0xff] %v3015_v35 }
 0x125   : > { %4013 = vst [vmem:[#allocation45_spill] sm:$0xff] %v3003_v11  ;;  %815 = vmatmul.f32.gmra.mxu2 %v2998_v34  ;;  %928 = vmatmul.f32.gmra.mxu3 %v3001_v42  ;;  %v3032_v42 = vld [vmem:[%s2663_s6 + $0x1b0] sm:$0xff]  ;;  %v3103_v34 = vld [vmem:[%s2663_s6 + $0x1f8] sm:$0xff] }
 0x126   : > { %4017 = vst [vmem:[#allocation49_spill] sm:$0xff] %v3018_v6 }
 0x127   : > { %4021 = vst [vmem:[#allocation53_spill] sm:$0xff] %v3032_v42 }
 0x128   : > { %v768_v43 = vpop.f32.mrf.mxu2  ;;  %v881_v50 = vpop.f32.mrf.mxu3  ;;  %4040 = vst [vmem:[#allocation72_spill] sm:$0xff] %v3103_v34 }
 0x129   : > { %v769_v45 = vadd.f32 %v768_v43, %v2854_v19  ;;  %v3010_v59 = vpop.f32.mrf.mxu0  ;;  %v3012_v9 = vpop.f32.mrf.mxu1  ;;  %v362_v43 = vld [vmem:[#allocation5 + $0x10] sm:$0xff] }
 0x12a   : > { %4014 = vst [vmem:[#allocation46_spill] sm:$0xff] %v3010_v59  ;;  %v427_v59 = vld [vmem:[#allocation5 + $0x218] sm:$0xff]  ;;  %965 = vmatpush.msrb.mxu0 %v362_v43 }
 0x12b   : > { %4015 = vst [vmem:[#allocation47_spill] sm:$0xff] %v3012_v9  ;;  %v3020_v11 = vadd.f32 %v881_v50, %v769_v45  ;;  %1304 = vmatpush.msrb.mxu3 %v427_v59  ;;  %v426_v59 = vld [vmem:[#allocation5 + $0x210] sm:$0xff] }
 0x12c   : > { %592 = vmatmul.f32.gmra.mxu0 %v3015_v35  ;;  %705 = vmatmul.f32.gmra.mxu1 %v3018_v6 }
 0x12d   : > { %4018 = vst [vmem:[#allocation50_spill] sm:$0xff] %v3020_v11  ;;  %818 = vmatmul.f32.gmra.mxu2 %v3015_v35  ;;  %931 = vmatmul.f32.gmra.mxu3 %v3018_v6  ;;  %v3035_v35 = vld [vmem:[%s2663_s6 + $0x1b8] sm:$0xff] }
 0x12e   : > { %4022 = vst [vmem:[#allocation54_spill] sm:$0xff] %v3035_v35  ;;  %1078 = vmatpush.msrb.mxu1 %v426_v59  ;;  %v1577_v59 = vld [vmem:[#allocation8 + $0x178] sm:$0xff] }
 0x12f   : > { %1824 = vmatpush.msra.mxu2 %v1577_v59 }
 0x130   : > { %v771_v9 = vpop.f32.mrf.mxu2  ;;  %v884_v10 = vpop.f32.mrf.mxu3 }
 0x131   : > { %v772_v50 = vadd.f32 %v771_v9, %v2854_v19  ;;  %v3027_v45 = vpop.f32.mrf.mxu0  ;;  %v3029_v11 = vpop.f32.mrf.mxu1 }
 0x132   : > { %4019 = vst [vmem:[#allocation51_spill] sm:$0xff] %v3027_v45 }
 0x133   : > { %4020 = vst [vmem:[#allocation52_spill] sm:$0xff] %v3029_v11  ;;  %v3037_v6 = vadd.f32 %v884_v10, %v772_v50  ;;  %v3049_v10 = vld [vmem:[%s2663_s6 + $0x1c0] sm:$0xff]  ;;  %v3052_v50 = vld [vmem:[%s2663_s6 + $0x1c8] sm:$0xff] }
 0x134   : > { %595 = vmatmul.f32.gmra.mxu0 %v3032_v42  ;;  %708 = vmatmul.f32.gmra.mxu1 %v3035_v35  ;;  %4026 = vst [vmem:[#allocation58_spill] sm:$0xff] %v3049_v10 }
 0x135   : > { %4023 = vst [vmem:[#allocation55_spill] sm:$0xff] %v3037_v6  ;;  %821 = vmatmul.f32.gmra.mxu2 %v3032_v42  ;;  %934 = vmatmul.f32.gmra.mxu3 %v3035_v35  ;;  %v3066_v42 = vld [vmem:[%s2663_s6 + $0x1d0] sm:$0xff] }
 0x136   : > { %4027 = vst [vmem:[#allocation59_spill] sm:$0xff] %v3052_v50 }
 0x137   : > { %4031 = vst [vmem:[#allocation63_spill] sm:$0xff] %v3066_v42 }
 0x138   : > { %v774_v9 = vpop.f32.mrf.mxu2  ;;  %v887_v20 = vpop.f32.mrf.mxu3 }
 0x139   : > { %v775_v43 = vadd.f32 %v774_v9, %v2854_v19  ;;  %v3044_v11 = vpop.f32.mrf.mxu0  ;;  %v3046_v45 = vpop.f32.mrf.mxu1  ;;  %v1545_v9 = vld [vmem:[#allocation8 + $0x78] sm:$0xff] }
 0x13a   : > { %4024 = vst [vmem:[#allocation56_spill] sm:$0xff] %v3044_v11  ;;  %v1593_v11 = vld [vmem:[#allocation8 + $0x1f8] sm:$0xff]  ;;  %1598 = vmatpush.msra.mxu0 %v1545_v9 }
 0x13b   : > { %4025 = vst [vmem:[#allocation57_spill] sm:$0xff] %v3046_v45  ;;  %v3054_v6 = vadd.f32 %v887_v20, %v775_v43  ;;  %1937 = vmatpush.msra.mxu3 %v1593_v11  ;;  %v1561_v11 = vld [vmem:[#allocation8 + $0xf8] sm:$0xff] }
 0x13c   : > { %598 = vmatmul.f32.gmra.mxu0 %v3049_v10  ;;  %711 = vmatmul.f32.gmra.mxu1 %v3052_v50 }
 0x13d   : > { %4028 = vst [vmem:[#allocation60_spill] sm:$0xff] %v3054_v6  ;;  %824 = vmatmul.f32.gmra.mxu2 %v3049_v10  ;;  %937 = vmatmul.f32.gmra.mxu3 %v3052_v50  ;;  %v3069_v10 = vld [vmem:[%s2663_s6 + $0x1d8] sm:$0xff] }
 0x13e   : > { %4032 = vst [vmem:[#allocation64_spill] sm:$0xff] %v3069_v10  ;;  %1711 = vmatpush.msra.mxu1 %v1561_v11  ;;  %v1576_v11 = vld [vmem:[#allocation8 + $0x170] sm:$0xff] }
 0x13f   : > { %1825 = vmatpush.msra.mxu2 %v1576_v11 }
 0x140   : > { %v777_v45 = vpop.f32.mrf.mxu2  ;;  %v890_v35 = vpop.f32.mrf.mxu3 }
 0x141   : > { %v778_v20 = vadd.f32 %v777_v45, %v2854_v19  ;;  %v3061_v43 = vpop.f32.mrf.mxu0  ;;  %v3063_v6 = vpop.f32.mrf.mxu1 }
 0x142   : > { %4029 = vst [vmem:[#allocation61_spill] sm:$0xff] %v3061_v43 }
 0x143   : > { %4030 = vst [vmem:[#allocation62_spill] sm:$0xff] %v3063_v6  ;;  %v3071_v50 = vadd.f32 %v890_v35, %v778_v20  ;;  %v3083_v35 = vld [vmem:[%s2663_s6 + $0x1e0] sm:$0xff]  ;;  %v3086_v20 = vld [vmem:[%s2663_s6 + $0x1e8] sm:$0xff] }
 0x144   : > { %601 = vmatmul.f32.gmra.mxu0 %v3066_v42  ;;  %714 = vmatmul.f32.gmra.mxu1 %v3069_v10  ;;  %4036 = vst [vmem:[#allocation68_spill] sm:$0xff] %v3083_v35 }
 0x145   : > { %4033 = vst [vmem:[#allocation65_spill] sm:$0xff] %v3071_v50  ;;  %827 = vmatmul.f32.gmra.mxu2 %v3066_v42  ;;  %940 = vmatmul.f32.gmra.mxu3 %v3069_v10  ;;  %v3100_v42 = vld [vmem:[%s2663_s6 + $0x1f0] sm:$0xff]  ;;  %s2451_s6 = scalar_lea.hbm %s3952_s5, 512 }
 0x146   : > { %p2453_p9 = scmp.lt.s32.totalorder %s2451_s6, %s2447_s15 }
 0x148   : > { %v780_v45 = vpop.f32.mrf.mxu2  ;;  %v893_v59 = vpop.f32.mrf.mxu3  ;;  %p2454_p2 = por %p2453_p9, %p2452_p11 }
 0x149   : > { %v781_v9 = vadd.f32 %v780_v45, %v2854_v19  ;;  %v3078_v6 = vpop.f32.mrf.mxu0  ;;  %v3080_v43 = vpop.f32.mrf.mxu1  ;;  %v1544_v45 = vld [vmem:[#allocation8 + $0x70] sm:$0xff] }
 0x14a   : > { %4034 = vst [vmem:[#allocation66_spill] sm:$0xff] %v3078_v6  ;;  %v1592_v6 = vld [vmem:[#allocation8 + $0x1f0] sm:$0xff]  ;;  %1599 = vmatpush.msra.mxu0 %v1544_v45  ;;  %p2455_p10 = pnand %p2454_p2, %p2450_p8 }
 0x14b   : > { %4035 = vst [vmem:[#allocation67_spill] sm:$0xff] %v3080_v43  ;;  %v3088_v50 = vadd.f32 %v893_v59, %v781_v9  ;;  %1938 = vmatpush.msra.mxu3 %v1592_v6  ;;  %v1560_v6 = vld [vmem:[#allocation8 + $0xf0] sm:$0xff] }
 0x14c   : > { %604 = vmatmul.f32.gmra.mxu0 %v3083_v35  ;;  %717 = vmatmul.f32.gmra.mxu1 %v3086_v20 }
 0x14d   : > { %4037 = vst [vmem:[#allocation69_spill] sm:$0xff] %v3088_v50  ;;  %830 = vmatmul.f32.gmra.mxu2 %v3083_v35  ;;  %943 = vmatmul.f32.gmra.mxu3 %v3086_v20 }
 0x14e   : > { %1712 = vmatpush.msra.mxu1 %v1560_v6  ;;  %v1543_v6 = vld [vmem:[#allocation8 + $0x68] sm:$0xff] }
 0x14f   : > { %1600 = vmatpush.msra.mxu0 %v1543_v6 }
 0x150   : > { %v783_v43 = vpop.f32.mrf.mxu2  ;;  %v896_v10 = vpop.f32.mrf.mxu3 }
 0x151   : > { %v784_v59 = vadd.f32 %v783_v43, %v2854_v19  ;;  %v3095_v9 = vpop.f32.mrf.mxu0  ;;  %v3097_v50 = vpop.f32.mrf.mxu1 }
 0x152   : > { %4038 = vst [vmem:[#allocation70_spill] sm:$0xff] %v3095_v9 }
 0x153   : > { %4039 = vst [vmem:[#allocation71_spill] sm:$0xff] %v3097_v50  ;;  %v3105_v35 = vadd.f32 %v896_v10, %v784_v59  ;;  %v1575_v59 = vld [vmem:[#allocation8 + $0x168] sm:$0xff] }
 0x154   : > { %607 = vmatmul.f32.gmra.mxu0 %v3100_v42  ;;  %720 = vmatmul.f32.gmra.mxu1 %v3103_v34 }
 0x155   : > { %4041 = vst [vmem:[#allocation73_spill] sm:$0xff] %v3105_v35  ;;  %833 = vmatmul.f32.gmra.mxu2 %v3100_v42  ;;  %946 = vmatmul.f32.gmra.mxu3 %v3103_v34  ;;  %v1591_v35 = vld [vmem:[#allocation8 + $0x1e8] sm:$0xff] }
 0x156   : > { %1826 = vmatpush.msra.mxu2 %v1575_v59  ;;  %1939 = vmatpush.msra.mxu3 %v1591_v35 }
 0x158   : > { %v786_v43 = vpop.f32.mrf.mxu2  ;;  %v899_v11 = vpop.f32.mrf.mxu3 }
 0x159   : > { %v787_v45 = vadd.f32 %v786_v43, %v2854_v19  ;;  %v3112_v50 = vpop.f32.mrf.mxu0  ;;  %v3114_v9 = vpop.f32.mrf.mxu1 }
 0x15a   : > { %4042 = vst [vmem:[#allocation74_spill] sm:$0xff] %v3112_v50 }
 0x15b   : > { %4043 = vst [vmem:[#allocation75_spill] sm:$0xff] %v3114_v9  ;;  %v3116_v10 = vadd.f32 %v899_v11, %v787_v45 }
 0x15c   : > { %966 = vmatmul.f32.vlgmr.msrb.gmra.mxu0 %v2678_v0  ;;  %1079 = vmatmul.f32.vlgmr.msrb.gmra.mxu1 %v2681_v1 }
 0x15d   : > { %4044 = vst [vmem:[#allocation76_spill] sm:$0xff] %v3116_v10  ;;  %1192 = vmatmul.f32.vlgmr.msrb.gmra.mxu2 %v2678_v0  ;;  %1305 = vmatmul.f32.vlgmr.msrb.gmra.mxu3 %v2681_v1  ;;  %v1559_v0 = vld [vmem:[#allocation8 + $0xe8] sm:$0xff] }
 0x15e   : > { %1713 = vmatpush.msra.mxu1 %v1559_v0 }
 0x160   : > { %v789_v43 = vpop.f32.mrf.mxu2  ;;  %v902_v34 = vpop.f32.mrf.mxu3 }
 0x161   : > { %v790_v9 = vadd.f32 %v789_v43, %v2854_v19  ;;  %v3123_v11 = vpop.f32.mrf.mxu0  ;;  %v3125_v45 = vpop.f32.mrf.mxu1 }
 0x162   : > { %4045 = vst [vmem:[#allocation77_spill] sm:$0xff] %v3123_v11 }
 0x163   : > { %4046 = vst [vmem:[#allocation78_spill] sm:$0xff] %v3125_v45  ;;  %v3127_v50 = vadd.f32 %v902_v34, %v790_v9  ;;  %v1590_v9 = vld [vmem:[#allocation8 + $0x1e0] sm:$0xff] }
 0x164   : > { %969 = vmatmul.f32.gmra.mxu0 %v2688_v14  ;;  %1082 = vmatmul.f32.gmra.mxu1 %v2691_v15 }
 0x165   : > { %4047 = vst [vmem:[#allocation79_spill] sm:$0xff] %v3127_v50  ;;  %1195 = vmatmul.f32.gmra.mxu2 %v2688_v14  ;;  %1308 = vmatmul.f32.gmra.mxu3 %v2691_v15  ;;  %v1574_v14 = vld [vmem:[#allocation8 + $0x160] sm:$0xff] }
 0x166   : > { %v1542_v15 = vld [vmem:[#allocation8 + $0x60] sm:$0xff]  ;;  %1827 = vmatpush.msra.mxu2 %v1574_v14  ;;  %1940 = vmatpush.msra.mxu3 %v1590_v9 }
 0x167   : > { %1601 = vmatpush.msra.mxu0 %v1542_v15 }
 0x168   : > { %v792_v1 = vpop.f32.mrf.mxu2  ;;  %v905_v35 = vpop.f32.mrf.mxu3 }
 0x169   : > { %v793_v59 = vadd.f32 %v792_v1, %v2854_v19  ;;  %v3134_v6 = vpop.f32.mrf.mxu0  ;;  %v3136_v43 = vpop.f32.mrf.mxu1 }
 0x16a   : > { %4048 = vst [vmem:[#allocation80_spill] sm:$0xff] %v3134_v6 }
 0x16b   : > { %4049 = vst [vmem:[#allocation81_spill] sm:$0xff] %v3136_v43  ;;  %v3138_v34 = vadd.f32 %v905_v35, %v793_v59 }
 0x16c   : > { %972 = vmatmul.f32.gmra.mxu0 %v2698_v16  ;;  %1085 = vmatmul.f32.gmra.mxu1 %v2701_v17 }
 0x16d   : > { %4050 = vst [vmem:[#allocation82_spill] sm:$0xff] %v3138_v34  ;;  %1198 = vmatmul.f32.gmra.mxu2 %v2698_v16  ;;  %1311 = vmatmul.f32.gmra.mxu3 %v2701_v17  ;;  %v1558_v16 = vld [vmem:[#allocation8 + $0xe0] sm:$0xff] }
 0x16e   : > { %1714 = vmatpush.msra.mxu1 %v1558_v16 }
 0x170   : > { %v795_v0 = vpop.f32.mrf.mxu2  ;;  %v908_v1 = vpop.f32.mrf.mxu3 }
 0x171   : > { %v796_v43 = vadd.f32 %v795_v0, %v2854_v19  ;;  %v3145_v35 = vpop.f32.mrf.mxu0  ;;  %v3147_v59 = vpop.f32.mrf.mxu1 }
 0x172   : > { %4051 = vst [vmem:[#allocation83_spill] sm:$0xff] %v3145_v35 }
 0x173   : > { %4052 = vst [vmem:[#allocation84_spill] sm:$0xff] %v3147_v59  ;;  %v3149_v6 = vadd.f32 %v908_v1, %v796_v43  ;;  %v1589_v1 = vld [vmem:[#allocation8 + $0x1d8] sm:$0xff] }
 0x174   : > { %975 = vmatmul.f32.gmra.mxu0 %v2708_v22  ;;  %1088 = vmatmul.f32.gmra.mxu1 %v2711_v23 }
 0x175   : > { %4053 = vst [vmem:[#allocation85_spill] sm:$0xff] %v3149_v6  ;;  %1201 = vmatmul.f32.gmra.mxu2 %v2708_v22  ;;  %1314 = vmatmul.f32.gmra.mxu3 %v2711_v23  ;;  %v1573_v22 = vld [vmem:[#allocation8 + $0x158] sm:$0xff] }
 0x176   : > { %v1541_v23 = vld [vmem:[#allocation8 + $0x58] sm:$0xff]  ;;  %1828 = vmatpush.msra.mxu2 %v1573_v22  ;;  %1941 = vmatpush.msra.mxu3 %v1589_v1 }
 0x177   : > { %1602 = vmatpush.msra.mxu0 %v1541_v23 }
 0x178   : > { %v798_v17 = vpop.f32.mrf.mxu2  ;;  %v911_v14 = vpop.f32.mrf.mxu3 }
 0x179   : > { %v799_v15 = vadd.f32 %v798_v17, %v2854_v19  ;;  %v3156_v9 = vpop.f32.mrf.mxu0  ;;  %v3158_v0 = vpop.f32.mrf.mxu1 }
 0x17a   : > { %4054 = vst [vmem:[#allocation86_spill] sm:$0xff] %v3156_v9 }
 0x17b   : > { %4055 = vst [vmem:[#allocation87_spill] sm:$0xff] %v3158_v0  ;;  %v3160_v43 = vadd.f32 %v911_v14, %v799_v15 }
 0x17c   : > { %978 = vmatmul.f32.gmra.mxu0 %v2718_v24  ;;  %1091 = vmatmul.f32.gmra.mxu1 %v2721_v25 }
 0x17d   : > { %4056 = vst [vmem:[#allocation88_spill] sm:$0xff] %v3160_v43  ;;  %1204 = vmatmul.f32.gmra.mxu2 %v2718_v24  ;;  %1317 = vmatmul.f32.gmra.mxu3 %v2721_v25  ;;  %v1557_v24 = vld [vmem:[#allocation8 + $0xd8] sm:$0xff] }
 0x17e   : > { %1715 = vmatpush.msra.mxu1 %v1557_v24 }
 0x180   : > { %v801_v16 = vpop.f32.mrf.mxu2  ;;  %v914_v17 = vpop.f32.mrf.mxu3 }
 0x181   : > { %v802_v0 = vadd.f32 %v801_v16, %v2854_v19  ;;  %v3167_v14 = vpop.f32.mrf.mxu0  ;;  %v3169_v15 = vpop.f32.mrf.mxu1 }
 0x182   : > { %4057 = vst [vmem:[#allocation89_spill] sm:$0xff] %v3167_v14 }
 0x183   : > { %4058 = vst [vmem:[#allocation90_spill] sm:$0xff] %v3169_v15  ;;  %v3171_v9 = vadd.f32 %v914_v17, %v802_v0  ;;  %v1588_v17 = vld [vmem:[#allocation8 + $0x1d0] sm:$0xff] }
 0x184   : > { %981 = vmatmul.f32.gmra.mxu0 %v2728_v30  ;;  %1094 = vmatmul.f32.gmra.mxu1 %v2731_v31 }
 0x185   : > { %4059 = vst [vmem:[#allocation91_spill] sm:$0xff] %v3171_v9  ;;  %1207 = vmatmul.f32.gmra.mxu2 %v2728_v30  ;;  %1320 = vmatmul.f32.gmra.mxu3 %v2731_v31  ;;  %v1572_v30 = vld [vmem:[#allocation8 + $0x150] sm:$0xff] }
 0x186   : > { %v1540_v31 = vld [vmem:[#allocation8 + $0x50] sm:$0xff]  ;;  %1829 = vmatpush.msra.mxu2 %v1572_v30  ;;  %1942 = vmatpush.msra.mxu3 %v1588_v17 }
 0x187   : > { %1603 = vmatpush.msra.mxu0 %v1540_v31 }
 0x188   : > { %v804_v25 = vpop.f32.mrf.mxu2  ;;  %v917_v22 = vpop.f32.mrf.mxu3 }
 0x189   : > { %v805_v23 = vadd.f32 %v804_v25, %v2854_v19  ;;  %v3178_v1 = vpop.f32.mrf.mxu0  ;;  %v3180_v16 = vpop.f32.mrf.mxu1 }
 0x18a   : > { %4060 = vst [vmem:[#allocation92_spill] sm:$0xff] %v3178_v1 }
 0x18b   : > { %4061 = vst [vmem:[#allocation93_spill] sm:$0xff] %v3180_v16  ;;  %v3182_v0 = vadd.f32 %v917_v22, %v805_v23 }
 0x18c   : > { %984 = vmatmul.f32.gmra.mxu0 %v2738_v32  ;;  %1097 = vmatmul.f32.gmra.mxu1 %v2741_v33 }
 0x18d   : > { %4062 = vst [vmem:[#allocation94_spill] sm:$0xff] %v3182_v0  ;;  %1210 = vmatmul.f32.gmra.mxu2 %v2738_v32  ;;  %1323 = vmatmul.f32.gmra.mxu3 %v2741_v33  ;;  %v1556_v32 = vld [vmem:[#allocation8 + $0xd0] sm:$0xff] }
 0x18e   : > { %1716 = vmatpush.msra.mxu1 %v1556_v32 }
 0x190   : > { %v807_v24 = vpop.f32.mrf.mxu2  ;;  %v920_v25 = vpop.f32.mrf.mxu3 }
 0x191   : > { %v808_v16 = vadd.f32 %v807_v24, %v2854_v19  ;;  %v3189_v22 = vpop.f32.mrf.mxu0  ;;  %v3191_v23 = vpop.f32.mrf.mxu1 }
 0x192   : > { %4063 = vst [vmem:[#allocation95_spill] sm:$0xff] %v3189_v22 }
 0x193   : > { %4064 = vst [vmem:[#allocation96_spill] sm:$0xff] %v3191_v23  ;;  %v3193_v1 = vadd.f32 %v920_v25, %v808_v16  ;;  %v1587_v25 = vld [vmem:[#allocation8 + $0x1c8] sm:$0xff]  ;;  %v4098_v23 = vld [vmem:[#allocation59_spill] sm:$0xff] }
 0x194   : > { %987 = vmatmul.f32.gmra.mxu0 %v2748_v38  ;;  %1100 = vmatmul.f32.gmra.mxu1 %v2751_v39 }
 0x195   : > { %4065 = vst [vmem:[#allocation97_spill] sm:$0xff] %v3193_v1  ;;  %1213 = vmatmul.f32.gmra.mxu2 %v2748_v38  ;;  %1326 = vmatmul.f32.gmra.mxu3 %v2751_v39  ;;  %v1571_v38 = vld [vmem:[#allocation8 + $0x148] sm:$0xff] }
 0x196   : > { %v1539_v39 = vld [vmem:[#allocation8 + $0x48] sm:$0xff]  ;;  %1830 = vmatpush.msra.mxu2 %v1571_v38  ;;  %1943 = vmatpush.msra.mxu3 %v1587_v25 }
 0x197   : > { %1604 = vmatpush.msra.mxu0 %v1539_v39 }
 0x198   : > { %v810_v33 = vpop.f32.mrf.mxu2  ;;  %v923_v30 = vpop.f32.mrf.mxu3 }
 0x199   : > { %v811_v31 = vadd.f32 %v810_v33, %v2854_v19  ;;  %v3200_v17 = vpop.f32.mrf.mxu0  ;;  %v3202_v24 = vpop.f32.mrf.mxu1 }
 0x19a   : > { %4066 = vst [vmem:[#allocation98_spill] sm:$0xff] %v3200_v17 }
 0x19b   : > { %4067 = vst [vmem:[#allocation99_spill] sm:$0xff] %v3202_v24  ;;  %v3204_v16 = vadd.f32 %v923_v30, %v811_v31 }
 0x19c   : > { %990 = vmatmul.f32.gmra.mxu0 %v2758_v40  ;;  %1103 = vmatmul.f32.gmra.mxu1 %v2761_v41 }
 0x19d   : > { %4068 = vst [vmem:[#allocation100_spill] sm:$0xff] %v3204_v16  ;;  %1216 = vmatmul.f32.gmra.mxu2 %v2758_v40  ;;  %1329 = vmatmul.f32.gmra.mxu3 %v2761_v41  ;;  %v1555_v40 = vld [vmem:[#allocation8 + $0xc8] sm:$0xff] }
 0x19e   : > { %1717 = vmatpush.msra.mxu1 %v1555_v40 }
 0x1a0   : > { %v813_v32 = vpop.f32.mrf.mxu2  ;;  %v926_v33 = vpop.f32.mrf.mxu3 }
 0x1a1   : > { %v814_v24 = vadd.f32 %v813_v32, %v2854_v19  ;;  %v3211_v30 = vpop.f32.mrf.mxu0  ;;  %v3213_v31 = vpop.f32.mrf.mxu1 }
 0x1a2   : > { %4069 = vst [vmem:[#allocation101_spill] sm:$0xff] %v3211_v30 }
 0x1a3   : > { %4070 = vst [vmem:[#allocation102_spill] sm:$0xff] %v3213_v31  ;;  %v3215_v17 = vadd.f32 %v926_v33, %v814_v24  ;;  %v1586_v33 = vld [vmem:[#allocation8 + $0x1c0] sm:$0xff] }
 0x1a4   : > { %993 = vmatmul.f32.gmra.mxu0 %v2768_v46  ;;  %1106 = vmatmul.f32.gmra.mxu1 %v2771_v47 }
 0x1a5   : > { %4071 = vst [vmem:[#allocation103_spill] sm:$0xff] %v3215_v17  ;;  %1219 = vmatmul.f32.gmra.mxu2 %v2768_v46  ;;  %1332 = vmatmul.f32.gmra.mxu3 %v2771_v47  ;;  %v1570_v46 = vld [vmem:[#allocation8 + $0x140] sm:$0xff]  ;;  %v4095_v17 = vld [vmem:[#allocation53_spill] sm:$0xff] }
 0x1a6   : > { %v1538_v47 = vld [vmem:[#allocation8 + $0x40] sm:$0xff]  ;;  %1831 = vmatpush.msra.mxu2 %v1570_v46  ;;  %1944 = vmatpush.msra.mxu3 %v1586_v33 }
 0x1a7   : > { %1605 = vmatpush.msra.mxu0 %v1538_v47 }
 0x1a8   : > { %v816_v41 = vpop.f32.mrf.mxu2  ;;  %v929_v38 = vpop.f32.mrf.mxu3 }
 0x1a9   : > { %v817_v39 = vadd.f32 %v816_v41, %v2854_v19  ;;  %v3222_v25 = vpop.f32.mrf.mxu0  ;;  %v3224_v32 = vpop.f32.mrf.mxu1 }
 0x1aa   : > { %4072 = vst [vmem:[#allocation104_spill] sm:$0xff] %v3222_v25 }
 0x1ab   : > { %4073 = vst [vmem:[#allocation105_spill] sm:$0xff] %v3224_v32  ;;  %v3226_v24 = vadd.f32 %v929_v38, %v817_v39 }
 0x1ac   : > { %996 = vmatmul.f32.gmra.mxu0 %v2778_v48  ;;  %1109 = vmatmul.f32.gmra.mxu1 %v2781_v49 }
 0x1ad   : > { %4074 = vst [vmem:[#allocation106_spill] sm:$0xff] %v3226_v24  ;;  %1222 = vmatmul.f32.gmra.mxu2 %v2778_v48  ;;  %1335 = vmatmul.f32.gmra.mxu3 %v2781_v49  ;;  %v1554_v48 = vld [vmem:[#allocation8 + $0xc0] sm:$0xff] }
 0x1ae   : > { %1718 = vmatpush.msra.mxu1 %v1554_v48 }
 0x1b0   : > { %v819_v40 = vpop.f32.mrf.mxu2  ;;  %v932_v41 = vpop.f32.mrf.mxu3 }
 0x1b1   : > { %v820_v32 = vadd.f32 %v819_v40, %v2854_v19  ;;  %v3233_v38 = vpop.f32.mrf.mxu0  ;;  %v3235_v39 = vpop.f32.mrf.mxu1 }
 0x1b2   : > { %4075 = vst [vmem:[#allocation107_spill] sm:$0xff] %v3233_v38 }
 0x1b3   : > { %4076 = vst [vmem:[#allocation108_spill] sm:$0xff] %v3235_v39  ;;  %v3237_v25 = vadd.f32 %v932_v41, %v820_v32  ;;  %v1585_v41 = vld [vmem:[#allocation8 + $0x1b8] sm:$0xff]  ;;  %v4091_v39 = vld [vmem:[#allocation43_spill] sm:$0xff] }
 0x1b4   : > { %999 = vmatmul.f32.gmra.mxu0 %v2788_v54  ;;  %1112 = vmatmul.f32.gmra.mxu1 %v2791_v55 }
 0x1b5   : > { %4077 = vst [vmem:[#allocation109_spill] sm:$0xff] %v3237_v25  ;;  %1225 = vmatmul.f32.gmra.mxu2 %v2788_v54  ;;  %1338 = vmatmul.f32.gmra.mxu3 %v2791_v55  ;;  %v1569_v54 = vld [vmem:[#allocation8 + $0x138] sm:$0xff]  ;;  %v4094_v25 = vld [vmem:[#allocation49_spill] sm:$0xff] }
 0x1b6   : > { %v1537_v55 = vld [vmem:[#allocation8 + $0x38] sm:$0xff]  ;;  %1832 = vmatpush.msra.mxu2 %v1569_v54  ;;  %1945 = vmatpush.msra.mxu3 %v1585_v41 }
 0x1b7   : > { %1606 = vmatpush.msra.mxu0 %v1537_v55 }
 0x1b8   : > { %v822_v49 = vpop.f32.mrf.mxu2  ;;  %v935_v46 = vpop.f32.mrf.mxu3 }
 0x1b9   : > { %v823_v47 = vadd.f32 %v822_v49, %v2854_v19  ;;  %v3244_v33 = vpop.f32.mrf.mxu0  ;;  %v3246_v40 = vpop.f32.mrf.mxu1 }
 0x1ba   : > { %4078 = vst [vmem:[#allocation110_spill] sm:$0xff] %v3244_v33 }
 0x1bb   : > { %4079 = vst [vmem:[#allocation111_spill] sm:$0xff] %v3246_v40  ;;  %v3248_v32 = vadd.f32 %v935_v46, %v823_v47 }
 0x1bc   : > { %1002 = vmatmul.f32.gmra.mxu0 %v2798_v56  ;;  %1115 = vmatmul.f32.gmra.mxu1 %v2801_v57 }
 0x1bd   : > { %4080 = vst [vmem:[#allocation112_spill] sm:$0xff] %v3248_v32  ;;  %1228 = vmatmul.f32.gmra.mxu2 %v2798_v56  ;;  %1341 = vmatmul.f32.gmra.mxu3 %v2801_v57  ;;  %v1553_v56 = vld [vmem:[#allocation8 + $0xb8] sm:$0xff] }
 0x1be   : > { %1719 = vmatpush.msra.mxu1 %v1553_v56 }
 0x1c0   : > { %v825_v48 = vpop.f32.mrf.mxu2  ;;  %v938_v49 = vpop.f32.mrf.mxu3 }
 0x1c1   : > { %v826_v40 = vadd.f32 %v825_v48, %v2854_v19  ;;  %v3255_v46 = vpop.f32.mrf.mxu0  ;;  %v3257_v47 = vpop.f32.mrf.mxu1 }
 0x1c2   : > { %4081 = vst [vmem:[#allocation113_spill] sm:$0xff] %v3255_v46 }
 0x1c3   : > { %4082 = vst [vmem:[#allocation114_spill] sm:$0xff] %v3257_v47  ;;  %v3259_v33 = vadd.f32 %v938_v49, %v826_v40  ;;  %v1584_v49 = vld [vmem:[#allocation8 + $0x1b0] sm:$0xff] }
 0x1c4   : > { %1005 = vmatmul.f32.gmra.mxu0 %v2808_v61  ;;  %1118 = vmatmul.f32.gmra.mxu1 %v2811_v62 }
 0x1c5   : > { %4083 = vst [vmem:[#allocation115_spill] sm:$0xff] %v3259_v33  ;;  %1231 = vmatmul.f32.gmra.mxu2 %v2808_v61  ;;  %1344 = vmatmul.f32.gmra.mxu3 %v2811_v62  ;;  %v1568_v61 = vld [vmem:[#allocation8 + $0x130] sm:$0xff] }
 0x1c6   : > { %v1536_v62 = vld [vmem:[#allocation8 + $0x30] sm:$0xff]  ;;  %1833 = vmatpush.msra.mxu2 %v1568_v61  ;;  %1946 = vmatpush.msra.mxu3 %v1584_v49 }
 0x1c7   : > { %1607 = vmatpush.msra.mxu0 %v1536_v62 }
 0x1c8   : > { %v828_v57 = vpop.f32.mrf.mxu2  ;;  %v941_v54 = vpop.f32.mrf.mxu3 }
 0x1c9   : > { %v829_v55 = vadd.f32 %v828_v57, %v2854_v19  ;;  %v3266_v41 = vpop.f32.mrf.mxu0  ;;  %v3268_v48 = vpop.f32.mrf.mxu1 }
 0x1ca   : > { %4084 = vst [vmem:[#allocation116_spill] sm:$0xff] %v3266_v41 }
 0x1cb   : > { %4085 = vst [vmem:[#allocation117_spill] sm:$0xff] %v3268_v48  ;;  %v3270_v40 = vadd.f32 %v941_v54, %v829_v55 }
 0x1cc   : > { %1008 = vmatmul.f32.gmra.mxu0 %v2818_v2  ;;  %1121 = vmatmul.f32.gmra.mxu1 %v2821_v3 }
 0x1cd   : > { %4086 = vst [vmem:[#allocation118_spill] sm:$0xff] %v3270_v40  ;;  %1234 = vmatmul.f32.gmra.mxu2 %v2818_v2  ;;  %1347 = vmatmul.f32.gmra.mxu3 %v2821_v3  ;;  %v1552_v2 = vld [vmem:[#allocation8 + $0xb0] sm:$0xff] }
 0x1ce   : > { %1720 = vmatpush.msra.mxu1 %v1552_v2 }
 0x1d0   : > { %v831_v56 = vpop.f32.mrf.mxu2  ;;  %v944_v57 = vpop.f32.mrf.mxu3 }
 0x1d1   : > { %v832_v48 = vadd.f32 %v831_v56, %v2854_v19  ;;  %v3277_v54 = vpop.f32.mrf.mxu0  ;;  %v3279_v55 = vpop.f32.mrf.mxu1 }
 0x1d2   : > { %4087 = vst [vmem:[#allocation119_spill] sm:$0xff] %v3277_v54 }
 0x1d3   : > { %4088 = vst [vmem:[#allocation120_spill] sm:$0xff] %v3279_v55  ;;  %v3281_v41 = vadd.f32 %v944_v57, %v832_v48  ;;  %v1535_v57 = vld [vmem:[#allocation8 + $0x28] sm:$0xff] }
 0x1d4   : > { %1011 = vmatmul.f32.gmra.mxu0 %v2828_v7  ;;  %1124 = vmatmul.f32.gmra.mxu1 %v2831_v8 }
 0x1d5   : > { %4089 = vst [vmem:[#allocation121_spill] sm:$0xff] %v3281_v41  ;;  %1237 = vmatmul.f32.gmra.mxu2 %v2828_v7  ;;  %1350 = vmatmul.f32.gmra.mxu3 %v2831_v8  ;;  %v3299_v7 = vperm.slane %v2847_v18, 3  ;;  %v1567_v8 = vld [vmem:[#allocation8 + $0x128] sm:$0xff] }
 0x1d6   : > { %1834 = vmatpush.msra.mxu2 %v1567_v8  ;;  %1608 = vmatpush.msra.mxu0 %v1535_v57 }
 0x1d8   : > { %v834_v3 = vpop.f32.mrf.mxu2  ;;  %v947_v61 = vpop.f32.mrf.mxu3 }
 0x1d9   : > { %v835_v62 = vadd.f32 %v834_v3, %v2854_v19  ;;  %v3288_v49 = vpop.f32.mrf.mxu0  ;;  %v3290_v56 = vpop.f32.mrf.mxu1  ;;  %v1583_v19 = vld [vmem:[#allocation8 + $0x1a8] sm:$0xff] }
 0x1da   : > { %1947 = vmatpush.msra.mxu3 %v1583_v19 }
 0x1db   : > { %v3292_v48 = vadd.f32 %v947_v61, %v835_v62 }
 0x1dc   : > { %1014 = vmatmul.f32.gmra.mxu0 %v2842_v12  ;;  %1127 = vmatmul.f32.gmra.mxu1 %v2845_v13 }
 0x1dd   : > { %4090 = vst [vmem:[#allocation122_spill] sm:$0xff] %v3292_v48  ;;  %1240 = vmatmul.f32.gmra.mxu2 %v2842_v12  ;;  %1353 = vmatmul.f32.gmra.mxu3 %v2845_v13  ;;  %v1551_v13 = vld [vmem:[#allocation8 + $0xa8] sm:$0xff] }
 0x1de   : > { %1721 = vmatpush.msra.mxu1 %v1551_v13 }
 0x1e0   : > { %v1193_v2 = vpop.f32.mrf.mxu2  ;;  %v1306_v3 = vpop.f32.mrf.mxu3 }
 0x1e1   : > { %v1194_v61 = vadd.f32 %v1193_v2, %v3299_v7  ;;  %v3302_v62 = vpop.f32.mrf.mxu0  ;;  %v3304_v48 = vpop.f32.mrf.mxu1 }
 0x1e3   : > { %v3306_v12 = vadd.f32 %v1306_v3, %v1194_v61  ;;  %v1582_v61 = vld [vmem:[#allocation8 + $0x1a0] sm:$0xff] }
 0x1e4   : > { %1017 = vmatmul.f32.gmra.mxu0 %v2862_v36  ;;  %1130 = vmatmul.f32.gmra.mxu1 %v2865_v37 }
 0x1e5   : > { %1243 = vmatmul.f32.gmra.mxu2 %v2862_v36  ;;  %1356 = vmatmul.f32.gmra.mxu3 %v2865_v37  ;;  %v1566_v36 = vld [vmem:[#allocation8 + $0x120] sm:$0xff] }
 0x1e6   : > { %v1534_v37 = vld [vmem:[#allocation8 + $0x20] sm:$0xff]  ;;  %1835 = vmatpush.msra.mxu2 %v1566_v36  ;;  %1948 = vmatpush.msra.mxu3 %v1582_v61 }
 0x1e7   : > { %1609 = vmatpush.msra.mxu0 %v1534_v37 }
 0x1e8   : > { %v1196_v18 = vpop.f32.mrf.mxu2  ;;  %v1309_v8 = vpop.f32.mrf.mxu3 }
 0x1e9   : > { %v1197_v57 = vadd.f32 %v1196_v18, %v3299_v7  ;;  %v3313_v19 = vpop.f32.mrf.mxu0  ;;  %v3315_v2 = vpop.f32.mrf.mxu1 }
 0x1eb   : > { %v3317_v3 = vadd.f32 %v1309_v8, %v1197_v57 }
 0x1ec   : > { %1020 = vmatmul.f32.gmra.mxu0 %v2879_v53  ;;  %1133 = vmatmul.f32.gmra.mxu1 %v2882_v58 }
 0x1ed   : > { %1246 = vmatmul.f32.gmra.mxu2 %v2879_v53  ;;  %1359 = vmatmul.f32.gmra.mxu3 %v2882_v58  ;;  %v1550_v53 = vld [vmem:[#allocation8 + $0xa0] sm:$0xff] }
 0x1ee   : > { %1722 = vmatpush.msra.mxu1 %v1550_v53 }
 0x1f0   : > { %v1199_v13 = vpop.f32.mrf.mxu2  ;;  %v1312_v18 = vpop.f32.mrf.mxu3 }
 0x1f1   : > { %v1200_v55 = vadd.f32 %v1199_v13, %v3299_v7  ;;  %v3324_v8 = vpop.f32.mrf.mxu0  ;;  %v3326_v57 = vpop.f32.mrf.mxu1 }
 0x1f3   : > { %v3328_v54 = vadd.f32 %v1312_v18, %v1200_v55  ;;  %v1581_v18 = vld [vmem:[#allocation8 + $0x198] sm:$0xff] }
 0x1f4   : > { %1023 = vmatmul.f32.gmra.mxu0 %v2896_v26  ;;  %1136 = vmatmul.f32.gmra.mxu1 %v2899_v27 }
 0x1f5   : > { %1249 = vmatmul.f32.gmra.mxu2 %v2896_v26  ;;  %1362 = vmatmul.f32.gmra.mxu3 %v2899_v27  ;;  %v1565_v26 = vld [vmem:[#allocation8 + $0x118] sm:$0xff] }
 0x1f6   : > { %v1533_v27 = vld [vmem:[#allocation8 + $0x18] sm:$0xff]  ;;  %1836 = vmatpush.msra.mxu2 %v1565_v26  ;;  %1949 = vmatpush.msra.mxu3 %v1581_v18 }
 0x1f7   : > { %1610 = vmatpush.msra.mxu0 %v1533_v27 }
 0x1f8   : > { %v1202_v58 = vpop.f32.mrf.mxu2  ;;  %v1315_v36 = vpop.f32.mrf.mxu3 }
 0x1f9   : > { %v1203_v37 = vadd.f32 %v1202_v58, %v3299_v7  ;;  %v3335_v61 = vpop.f32.mrf.mxu0  ;;  %v3337_v13 = vpop.f32.mrf.mxu1 }
 0x1fb   : > { %v3339_v55 = vadd.f32 %v1315_v36, %v1203_v37 }
 0x1fc   : > { %1026 = vmatmul.f32.gmra.mxu0 %v2913_v63  ;;  %1139 = vmatmul.f32.gmra.mxu1 %v2916_v4 }
 0x1fd   : > { %1252 = vmatmul.f32.gmra.mxu2 %v2913_v63  ;;  %1365 = vmatmul.f32.gmra.mxu3 %v2916_v4  ;;  %v1549_v63 = vld [vmem:[#allocation8 + $0x98] sm:$0xff] }
 0x1fe   : > { %1723 = vmatpush.msra.mxu1 %v1549_v63 }
 0x200   : > { %v1205_v53 = vpop.f32.mrf.mxu2  ;;  %v1318_v58 = vpop.f32.mrf.mxu3 }
 0x201   : > { %v1206_v41 = vadd.f32 %v1205_v53, %v3299_v7  ;;  %v3346_v36 = vpop.f32.mrf.mxu0  ;;  %v3348_v37 = vpop.f32.mrf.mxu1 }
 0x203   : > { %v3350_v40 = vadd.f32 %v1318_v58, %v1206_v41  ;;  %v1580_v58 = vld [vmem:[#allocation8 + $0x190] sm:$0xff] }
 0x204   : > { %1029 = vmatmul.f32.gmra.mxu0 %v2930_v5  ;;  %1142 = vmatmul.f32.gmra.mxu1 %v2933_v21 }
 0x205   : > { %1255 = vmatmul.f32.gmra.mxu2 %v2930_v5  ;;  %1368 = vmatmul.f32.gmra.mxu3 %v2933_v21  ;;  %v1564_v21 = vld [vmem:[#allocation8 + $0x110] sm:$0xff] }
 0x206   : > { %v1532_v5 = vld [vmem:[#allocation8 + $0x10] sm:$0xff]  ;;  %1837 = vmatpush.msra.mxu2 %v1564_v21  ;;  %1950 = vmatpush.msra.mxu3 %v1580_v58 }
 0x207   : > { %1611 = vmatpush.msra.mxu0 %v1532_v5 }
 0x208   : > { %v1208_v4 = vpop.f32.mrf.mxu2  ;;  %v1321_v26 = vpop.f32.mrf.mxu3 }
 0x209   : > { %v1209_v27 = vadd.f32 %v1208_v4, %v3299_v7  ;;  %v3357_v18 = vpop.f32.mrf.mxu0  ;;  %v3359_v53 = vpop.f32.mrf.mxu1 }
 0x20b   : > { %v3361_v41 = vadd.f32 %v1321_v26, %v1209_v27 }
 0x20c   : > { %1032 = vmatmul.f32.gmra.mxu0 %v2947_v60  ;;  %1145 = vmatmul.f32.gmra.mxu1 %v2950_v44 }
 0x20d   : > { %1258 = vmatmul.f32.gmra.mxu2 %v2947_v60  ;;  %1371 = vmatmul.f32.gmra.mxu3 %v2950_v44  ;;  %v1548_v60 = vld [vmem:[#allocation8 + $0x90] sm:$0xff] }
 0x20e   : > { %1724 = vmatpush.msra.mxu1 %v1548_v60 }
 0x210   : > { %v1211_v63 = vpop.f32.mrf.mxu2  ;;  %v1324_v4 = vpop.f32.mrf.mxu3 }
 0x211   : > { %v1212_v47 = vadd.f32 %v1211_v63, %v3299_v7  ;;  %v3368_v26 = vpop.f32.mrf.mxu0  ;;  %v3370_v27 = vpop.f32.mrf.mxu1 }
 0x213   : > { %v3372_v46 = vadd.f32 %v1324_v4, %v1212_v47  ;;  %v1579_v4 = vld [vmem:[#allocation8 + $0x188] sm:$0xff] }
 0x214   : > { %1035 = vmatmul.f32.gmra.mxu0 %v2964_v52  ;;  %1148 = vmatmul.f32.gmra.mxu1 %v2967_v51 }
 0x215   : > { %1261 = vmatmul.f32.gmra.mxu2 %v2964_v52  ;;  %1374 = vmatmul.f32.gmra.mxu3 %v2967_v51  ;;  %v1563_v51 = vld [vmem:[#allocation8 + $0x108] sm:$0xff] }
 0x216   : > { %v1531_v52 = vld [vmem:[#allocation8 + $0x8] sm:$0xff]  ;;  %1838 = vmatpush.msra.mxu2 %v1563_v51  ;;  %1951 = vmatpush.msra.mxu3 %v1579_v4 }
 0x217   : > { %1612 = vmatpush.msra.mxu0 %v1531_v52 }
 0x218   : > { %v1214_v44 = vpop.f32.mrf.mxu2  ;;  %v1327_v21 = vpop.f32.mrf.mxu3 }
 0x219   : > { %v1215_v5 = vadd.f32 %v1214_v44, %v3299_v7  ;;  %v3379_v58 = vpop.f32.mrf.mxu0  ;;  %v3381_v63 = vpop.f32.mrf.mxu1 }
 0x21b   : > { %v3383_v47 = vadd.f32 %v1327_v21, %v1215_v5 }
 0x21c   : > { %1038 = vmatmul.f32.gmra.mxu0 %v2981_v28  ;;  %1151 = vmatmul.f32.gmra.mxu1 %v2984_v29 }
 0x21d   : > { %1264 = vmatmul.f32.gmra.mxu2 %v2981_v28  ;;  %1377 = vmatmul.f32.gmra.mxu3 %v2984_v29  ;;  %v4092_v28 = vld [vmem:[#allocation44_spill] sm:$0xff] }
 0x21e   : > { %v1547_v29 = vld [vmem:[#allocation8 + $0x88] sm:$0xff] }
 0x21f   : > { %1725 = vmatpush.msra.mxu1 %v1547_v29  ;;  %v1578_v29 = vld [vmem:[#allocation8 + $0x180] sm:$0xff] }
 0x220   : > { %v1217_v60 = vpop.f32.mrf.mxu2  ;;  %v1330_v44 = vpop.f32.mrf.mxu3  ;;  %1952 = vmatpush.msra.mxu3 %v1578_v29 }
 0x221   : > { %v1218_v33 = vadd.f32 %v1217_v60, %v3299_v7  ;;  %v3390_v21 = vpop.f32.mrf.mxu0  ;;  %v3392_v5 = vpop.f32.mrf.mxu1 }
 0x223   : > { %v3394_v32 = vadd.f32 %v1330_v44, %v1218_v33  ;;  %v4093_v44 = vld [vmem:[#allocation48_spill] sm:$0xff] }
 0x224   : > { %1041 = vmatmul.f32.gmra.mxu0 %v4091_v39  ;;  %1154 = vmatmul.f32.gmra.mxu1 %v4092_v28 }
 0x225   : > { %1267 = vmatmul.f32.gmra.mxu2 %v4091_v39  ;;  %1380 = vmatmul.f32.gmra.mxu3 %v4092_v28  ;;  %v1562_v39 = vld [vmem:[#allocation8 + $0x100] sm:$0xff] }
 0x226   : > { %v1530_v28 = vld [vmem:[#allocation8] sm:$0xff]  ;;  %1839 = vmatpush.msra.mxu2 %v1562_v39 }
 0x227   : > { %1613 = vmatpush.msra.mxu0 %v1530_v28 }
 0x228   : > { %v1220_v51 = vpop.f32.mrf.mxu2  ;;  %v1333_v52 = vpop.f32.mrf.mxu3 }
 0x229   : > { %v1221_v4 = vadd.f32 %v1220_v51, %v3299_v7  ;;  %v3401_v60 = vpop.f32.mrf.mxu0  ;;  %v3403_v38 = vpop.f32.mrf.mxu1 }
 0x22b   : > { %v3405_v33 = vadd.f32 %v1333_v52, %v1221_v4 }
 0x22c   : > { %1044 = vmatmul.f32.gmra.mxu0 %v4093_v44  ;;  %1157 = vmatmul.f32.gmra.mxu1 %v4094_v25 }
 0x22d   : > { %1270 = vmatmul.f32.gmra.mxu2 %v4093_v44  ;;  %1383 = vmatmul.f32.gmra.mxu3 %v4094_v25  ;;  %v4096_v44 = vld [vmem:[#allocation54_spill] sm:$0xff]  ;;  %v1546_v25 = vld [vmem:[#allocation8 + $0x80] sm:$0xff] }
 0x22e   : > { %1726 = vmatpush.msra.mxu1 %v1546_v25 }
 0x230   : > { %v1223_v51 = vpop.f32.mrf.mxu2  ;;  %v1336_v24 = vpop.f32.mrf.mxu3 }
 0x231   : > { %v1224_v31 = vadd.f32 %v1223_v51, %v3299_v7  ;;  %v3412_v52 = vpop.f32.mrf.mxu0  ;;  %v3414_v4 = vpop.f32.mrf.mxu1 }
 0x233   : > { %v3416_v30 = vadd.f32 %v1336_v24, %v1224_v31  ;;  %v4097_v24 = vld [vmem:[#allocation58_spill] sm:$0xff] }
 0x234   : > { %1047 = vmatmul.f32.gmra.mxu0 %v4095_v17  ;;  %1160 = vmatmul.f32.gmra.mxu1 %v4096_v44 }
 0x235   : > { %1273 = vmatmul.f32.gmra.mxu2 %v4095_v17  ;;  %1386 = vmatmul.f32.gmra.mxu3 %v4096_v44 }
 0x238   : > { %v1226_v39 = vpop.f32.mrf.mxu2  ;;  %v1339_v28 = vpop.f32.mrf.mxu3 }
 0x239   : > { %v1227_v29 = vadd.f32 %v1226_v39, %v3299_v7  ;;  %v3423_v51 = vpop.f32.mrf.mxu0  ;;  %v3425_v16 = vpop.f32.mrf.mxu1 }
 0x23b   : > { %v3427_v31 = vadd.f32 %v1339_v28, %v1227_v29  ;;  %v4099_v28 = vld [vmem:[#allocation63_spill] sm:$0xff]  ;;  %v4100_v29 = vld [vmem:[#allocation64_spill] sm:$0xff] }
 0x23c   : > { %1050 = vmatmul.f32.gmra.mxu0 %v4097_v24  ;;  %1163 = vmatmul.f32.gmra.mxu1 %v4098_v23 }
 0x23d   : > { %1276 = vmatmul.f32.gmra.mxu2 %v4097_v24  ;;  %1389 = vmatmul.f32.gmra.mxu3 %v4098_v23 }
 0x240   : > { %v1229_v17 = vpop.f32.mrf.mxu2  ;;  %v1342_v44 = vpop.f32.mrf.mxu3 }
 0x241   : > { %v1230_v25 = vadd.f32 %v1229_v17, %v3299_v7  ;;  %v3434_v22 = vpop.f32.mrf.mxu0  ;;  %v3436_v39 = vpop.f32.mrf.mxu1 }
 0x243   : > { %v3438_v1 = vadd.f32 %v1342_v44, %v1230_v25  ;;  %v4101_v44 = vld [vmem:[#allocation68_spill] sm:$0xff]  ;;  %v2310_v25 = vld [vmem:[#allocation7] sm:$0xf] }
 0x244   : > { %1053 = vmatmul.f32.gmra.mxu0 %v4099_v28  ;;  %1166 = vmatmul.f32.gmra.mxu1 %v4100_v29 }
 0x245   : > { %1279 = vmatmul.f32.gmra.mxu2 %v4099_v28  ;;  %1392 = vmatmul.f32.gmra.mxu3 %v4100_v29  ;;  %v3455_v28 = vperm.slane %v2310_v25, 0  ;;  %v3457_v29 = vperm.slane %v2310_v25, 2  ;;  %v4105_v25 = vld [vmem:[#allocation72_spill] sm:$0xff] }
 0x248   : > { %v1232_v24 = vpop.f32.mrf.mxu2  ;;  %v1345_v23 = vpop.f32.mrf.mxu3 }
 0x249   : > { %v1233_v0 = vadd.f32 %v1232_v24, %v3299_v7  ;;  %v3445_v15 = vpop.f32.mrf.mxu0  ;;  %v3447_v17 = vpop.f32.mrf.mxu1 }
 0x24b   : > { %v3449_v14 = vadd.f32 %v1345_v23, %v1233_v0  ;;  %v4104_v23 = vld [vmem:[#allocation15_spill] sm:$0xff] }
 0x24c   : > { %1056 = vmatmul.f32.gmra.mxu0 %v4101_v44  ;;  %1169 = vmatmul.f32.gmra.mxu1 %v3086_v20  ;;  %v516_v35 = vadd.f32 %v4104_v23, %v3455_v28 }
 0x24d   : > { %1282 = vmatmul.f32.gmra.mxu2 %v4101_v44  ;;  %1395 = vmatmul.f32.gmra.mxu3 %v3086_v20  ;;  %v968_v44 = vadd.f32 %v3288_v49, %v3457_v29  ;;  %v4108_v49 = vld [vmem:[#allocation19_spill] sm:$0xff] }
 0x24e   : > { %v1403_v10 = vmax.f32 %v4108_v49, 0.0 }
 0x24f   : > { %v1081_v34 = vadd.f32 %v3290_v56, %v968_v44 }
 0x250   : > { %v1235_v24 = vpop.f32.mrf.mxu2  ;;  %v1348_v9 = vpop.f32.mrf.mxu3 }
 0x251   : > { %v1236_v43 = vadd.f32 %v1235_v24, %v3299_v7  ;;  %v3460_v59 = vpop.f32.mrf.mxu0  ;;  %v3462_v0 = vpop.f32.mrf.mxu1  ;;  %v4106_v24 = vld [vmem:[#allocation16_spill] sm:$0xff] }
 0x252   : > { %4102 = vst [vmem:[#allocation43_spill] sm:$0xff] %v3460_v59  ;;  %v629_v6 = vadd.f32 %v4106_v24, %v516_v35  ;;  %v1404_v59 = vmax.f32 %v1081_v34, 0.0  ;;  %v971_v35 = vadd.f32 %v3302_v62, %v3457_v29  ;;  %v4111_v62 = vld [vmem:[#allocation22_spill] sm:$0xff] }
 0x253   : > { %4103 = vst [vmem:[#allocation44_spill] sm:$0xff] %v3462_v0  ;;  %v3468_v20 = vadd.f32 %v1348_v9, %v1236_v43  ;;  %v4109_v0 = vld [vmem:[#allocation17_spill] sm:$0xff] }
 0x254   : > { %1059 = vmatmul.f32.gmra.mxu0 %v3100_v42  ;;  %1172 = vmatmul.f32.gmra.mxu1 %v4105_v25  ;;  %v1402_v43 = vmax.f32 %v629_v6, 0.0  ;;  %v1084_v6 = vadd.f32 %v3304_v48, %v971_v35  ;;  %v974_v48 = vadd.f32 %v3313_v19, %v3457_v29  ;;  %v4114_v19 = vld [vmem:[#allocation25_spill] sm:$0xff] }
 0x255   : > { %1285 = vmatmul.f32.gmra.mxu2 %v3100_v42  ;;  %1398 = vmatmul.f32.gmra.mxu3 %v4105_v25  ;;  %v519_v42 = vadd.f32 %v4109_v0, %v3455_v28  ;;  %v1405_v25 = vmax.f32 %v3306_v12, 0.0 }
 0x258   : > { %v1238_v45 = vpop.f32.mrf.mxu2  ;;  %v1351_v11 = vpop.f32.mrf.mxu3 }
 0x259   : > { %v1239_v23 = vadd.f32 %v1238_v45, %v3299_v7  ;;  %v3477_v50 = vpop.f32.mrf.mxu0  ;;  %v3479_v9 = vpop.f32.mrf.mxu1  ;;  %v4110_v45 = vld [vmem:[#allocation18_spill] sm:$0xff] }
 0x25a   : > { %4107 = vst [vmem:[#allocation48_spill] sm:$0xff] %v3479_v9  ;;  %v632_v44 = vadd.f32 %v4110_v45, %v519_v42  ;;  %v1087_v45 = vadd.f32 %v3315_v2, %v974_v48  ;;  %v977_v2 = vadd.f32 %v3324_v8, %v3457_v29  ;;  %v4117_v8 = vld [vmem:[#allocation28_spill] sm:$0xff] }
 0x25b   : > { %v3487_v56 = vadd.f32 %v1351_v11, %v1239_v23  ;;  %v1407_v11 = vmax.f32 %v4111_v62, 0.0  ;;  %v4112_v23 = vld [vmem:[#allocation20_spill] sm:$0xff] }
 0x25c   : > { %1614 = vmatmul.f32.vlgmr.msra.gmra.mxu0 %v1402_v43  ;;  %1727 = vmatmul.f32.vlgmr.msra.gmra.mxu1 %v1403_v10  ;;  %v1406_v9 = vmax.f32 %v632_v44, 0.0  ;;  %v522_v10 = vadd.f32 %v4112_v23, %v3455_v28  ;;  %v1409_v43 = vmax.f32 %v3317_v3, 0.0 }
 0x25d   : > { %1840 = vmatmul.f32.vlgmr.msra.gmra.mxu2 %v1404_v59  ;;  %1953 = vmatmul.f32.vlgmr.msra.gmra.mxu3 %v1405_v25  ;;  %v1408_v59 = vmax.f32 %v1084_v6, 0.0  ;;  %v4113_v25 = vld [vmem:[#allocation21_spill] sm:$0xff] }
 0x25e   : > { %v635_v35 = vadd.f32 %v4113_v25, %v522_v10  ;;  %v1090_v25 = vadd.f32 %v3326_v57, %v977_v2  ;;  %v980_v57 = vadd.f32 %v3335_v61, %v3457_v29  ;;  %v4120_v61 = vld [vmem:[#allocation31_spill] sm:$0xff] }
 0x260   : > { %v1241_v24 = vpop.f32.mrf.mxu2  ;;  %v1354_v49 = vpop.f32.mrf.mxu3  ;;  %v1410_v23 = vmax.f32 %v635_v35, 0.0 }
 0x261   : > { %v1242_v0 = vadd.f32 %v1241_v24, %v3299_v7  ;;  %v3492_v34 = vpop.f32.mrf.mxu0  ;;  %v3494_v12 = vpop.f32.mrf.mxu1 }
 0x263   : > { %v3502_v42 = vadd.f32 %v1354_v49, %v1242_v0  ;;  %v1411_v49 = vmax.f32 %v4114_v19, 0.0 }
 0x264   : > { %1617 = vmatmul.f32.gmra.mxu0 %v1406_v9  ;;  %1730 = vmatmul.f32.gmra.mxu1 %v1407_v11  ;;  %v4115_v9 = vld [vmem:[#allocation23_spill] sm:$0xff]  ;;  %v1412_v11 = vmax.f32 %v1087_v45, 0.0 }
 0x265   : > { %1843 = vmatmul.f32.gmra.mxu2 %v1408_v59  ;;  %1956 = vmatmul.f32.gmra.mxu3 %v1409_v43  ;;  %v525_v0 = vadd.f32 %v4115_v9, %v3455_v28  ;;  %v1413_v59 = vmax.f32 %v3328_v54, 0.0  ;;  %v4116_v43 = vld [vmem:[#allocation24_spill] sm:$0xff] }
 0x267   : > { %v638_v48 = vadd.f32 %v4116_v43, %v525_v0  ;;  %v1093_v43 = vadd.f32 %v3337_v13, %v980_v57  ;;  %v983_v13 = vadd.f32 %v3346_v36, %v3457_v29  ;;  %v4123_v36 = vld [vmem:[#allocation34_spill] sm:$0xff] }
 0x268   : > { %v1244_v44 = vpop.f32.mrf.mxu2  ;;  %v1357_v24 = vpop.f32.mrf.mxu3 }
 0x269   : > { %v1245_v62 = vadd.f32 %v1244_v44, %v3299_v7  ;;  %v3507_v6 = vpop.f32.mrf.mxu0  ;;  %v3509_v3 = vpop.f32.mrf.mxu1  ;;  %v1414_v9 = vmax.f32 %v638_v48, 0.0 }
 0x26b   : > { %v3517_v10 = vadd.f32 %v1357_v24, %v1245_v62  ;;  %v1415_v24 = vmax.f32 %v4117_v8, 0.0  ;;  %v4118_v62 = vld [vmem:[#allocation26_spill] sm:$0xff] }
 0x26c   : > { %1620 = vmatmul.f32.gmra.mxu0 %v1410_v23  ;;  %1733 = vmatmul.f32.gmra.mxu1 %v1411_v49  ;;  %v528_v23 = vadd.f32 %v4118_v62, %v3455_v28  ;;  %v1416_v49 = vmax.f32 %v1090_v25, 0.0 }
 0x26d   : > { %1846 = vmatmul.f32.gmra.mxu2 %v1412_v11  ;;  %1959 = vmatmul.f32.gmra.mxu3 %v1413_v59  ;;  %v1417_v11 = vmax.f32 %v3339_v55, 0.0  ;;  %v4119_v59 = vld [vmem:[#allocation27_spill] sm:$0xff] }
 0x26e   : > { %v641_v2 = vadd.f32 %v4119_v59, %v528_v23  ;;  %v1096_v59 = vadd.f32 %v3348_v37, %v983_v13  ;;  %v986_v37 = vadd.f32 %v3357_v18, %v3457_v29  ;;  %v4126_v18 = vld [vmem:[#allocation37_spill] sm:$0xff] }
 0x270   : > { %v1247_v35 = vpop.f32.mrf.mxu2  ;;  %v1360_v44 = vpop.f32.mrf.mxu3  ;;  %v1418_v62 = vmax.f32 %v641_v2, 0.0 }
 0x271   : > { %v1248_v19 = vadd.f32 %v1247_v35, %v3299_v7  ;;  %v3522_v45 = vpop.f32.mrf.mxu0  ;;  %v3524_v54 = vpop.f32.mrf.mxu1 }
 0x273   : > { %v3532_v0 = vadd.f32 %v1360_v44, %v1248_v19  ;;  %v1419_v44 = vmax.f32 %v4120_v61, 0.0  ;;  %v4121_v19 = vld [vmem:[#allocation29_spill] sm:$0xff] }
 0x274   : > { %1623 = vmatmul.f32.gmra.mxu0 %v1414_v9  ;;  %1736 = vmatmul.f32.gmra.mxu1 %v1415_v24  ;;  %v531_v9 = vadd.f32 %v4121_v19, %v3455_v28  ;;  %v1420_v24 = vmax.f32 %v1093_v43, 0.0 }
 0x275   : > { %1849 = vmatmul.f32.gmra.mxu2 %v1416_v49  ;;  %1962 = vmatmul.f32.gmra.mxu3 %v1417_v11  ;;  %v1421_v49 = vmax.f32 %v3350_v40, 0.0  ;;  %v4122_v11 = vld [vmem:[#allocation30_spill] sm:$0xff] }
 0x276   : > { %v644_v57 = vadd.f32 %v4122_v11, %v531_v9  ;;  %v1099_v11 = vadd.f32 %v3359_v53, %v986_v37  ;;  %v989_v53 = vadd.f32 %v3368_v26, %v3457_v29  ;;  %v4129_v26 = vld [vmem:[#allocation40_spill] sm:$0xff] }
 0x278   : > { %v1250_v48 = vpop.f32.mrf.mxu2  ;;  %v1363_v35 = vpop.f32.mrf.mxu3  ;;  %v1422_v19 = vmax.f32 %v644_v57, 0.0 }
 0x279   : > { %v1251_v8 = vadd.f32 %v1250_v48, %v3299_v7  ;;  %v3537_v25 = vpop.f32.mrf.mxu0  ;;  %v3539_v55 = vpop.f32.mrf.mxu1 }
 0x27b   : > { %v3547_v23 = vadd.f32 %v1363_v35, %v1251_v8  ;;  %v1423_v35 = vmax.f32 %v4123_v36, 0.0  ;;  %v4124_v8 = vld [vmem:[#allocation32_spill] sm:$0xff] }
 0x27c   : > { %1626 = vmatmul.f32.gmra.mxu0 %v1418_v62  ;;  %1739 = vmatmul.f32.gmra.mxu1 %v1419_v44  ;;  %v534_v62 = vadd.f32 %v4124_v8, %v3455_v28  ;;  %v1424_v44 = vmax.f32 %v1096_v59, 0.0 }
 0x27d   : > { %1852 = vmatmul.f32.gmra.mxu2 %v1420_v24  ;;  %1965 = vmatmul.f32.gmra.mxu3 %v1421_v49  ;;  %v1425_v24 = vmax.f32 %v3361_v41, 0.0  ;;  %v4125_v49 = vld [vmem:[#allocation33_spill] sm:$0xff] }
 0x27e   : > { %v647_v13 = vadd.f32 %v4125_v49, %v534_v62  ;;  %v1102_v49 = vadd.f32 %v3370_v27, %v989_v53  ;;  %v992_v27 = vadd.f32 %v3379_v58, %v3457_v29  ;;  %v4132_v58 = vld [vmem:[#allocation45_spill] sm:$0xff] }
 0x280   : > { %v1253_v2 = vpop.f32.mrf.mxu2  ;;  %v1366_v48 = vpop.f32.mrf.mxu3  ;;  %v1426_v8 = vmax.f32 %v647_v13, 0.0 }
 0x281   : > { %v1254_v61 = vadd.f32 %v1253_v2, %v3299_v7  ;;  %v3552_v43 = vpop.f32.mrf.mxu0  ;;  %v3554_v40 = vpop.f32.mrf.mxu1 }
 0x283   : > { %v3562_v9 = vadd.f32 %v1366_v48, %v1254_v61  ;;  %v1427_v48 = vmax.f32 %v4126_v18, 0.0  ;;  %v4127_v61 = vld [vmem:[#allocation35_spill] sm:$0xff] }
 0x284   : > { %1629 = vmatmul.f32.gmra.mxu0 %v1422_v19  ;;  %1742 = vmatmul.f32.gmra.mxu1 %v1423_v35  ;;  %v537_v19 = vadd.f32 %v4127_v61, %v3455_v28  ;;  %v1428_v35 = vmax.f32 %v1099_v11, 0.0 }
 0x285   : > { %1855 = vmatmul.f32.gmra.mxu2 %v1424_v44  ;;  %1968 = vmatmul.f32.gmra.mxu3 %v1425_v24  ;;  %v1429_v44 = vmax.f32 %v3372_v46, 0.0  ;;  %v4128_v24 = vld [vmem:[#allocation36_spill] sm:$0xff] }
 0x286   : > { %v650_v37 = vadd.f32 %v4128_v24, %v537_v19  ;;  %v1105_v24 = vadd.f32 %v3381_v63, %v992_v27  ;;  %v995_v63 = vadd.f32 %v3390_v21, %v3457_v29  ;;  %v4135_v21 = vld [vmem:[#allocation50_spill] sm:$0xff] }
 0x288   : > { %v1256_v57 = vpop.f32.mrf.mxu2  ;;  %v1369_v2 = vpop.f32.mrf.mxu3  ;;  %v1430_v61 = vmax.f32 %v650_v37, 0.0 }
 0x289   : > { %v1257_v36 = vadd.f32 %v1256_v57, %v3299_v7  ;;  %v3567_v59 = vpop.f32.mrf.mxu0  ;;  %v3569_v41 = vpop.f32.mrf.mxu1 }
 0x28b   : > { %v3577_v62 = vadd.f32 %v1369_v2, %v1257_v36  ;;  %v1431_v2 = vmax.f32 %v4129_v26, 0.0  ;;  %v4130_v36 = vld [vmem:[#allocation38_spill] sm:$0xff] }
 0x28c   : > { %1632 = vmatmul.f32.gmra.mxu0 %v1426_v8  ;;  %1745 = vmatmul.f32.gmra.mxu1 %v1427_v48  ;;  %v540_v8 = vadd.f32 %v4130_v36, %v3455_v28  ;;  %v1432_v48 = vmax.f32 %v1102_v49, 0.0 }
 0x28d   : > { %1858 = vmatmul.f32.gmra.mxu2 %v1428_v35  ;;  %1971 = vmatmul.f32.gmra.mxu3 %v1429_v44  ;;  %v1433_v35 = vmax.f32 %v3383_v47, 0.0  ;;  %v4131_v44 = vld [vmem:[#allocation39_spill] sm:$0xff] }
 0x28e   : > { %v653_v53 = vadd.f32 %v4131_v44, %v540_v8  ;;  %v1108_v44 = vadd.f32 %v3392_v5, %v995_v63  ;;  %v998_v5 = vadd.f32 %v3401_v60, %v3457_v29  ;;  %v4138_v60 = vld [vmem:[#allocation55_spill] sm:$0xff] }
 0x290   : > { %v1259_v13 = vpop.f32.mrf.mxu2  ;;  %v1372_v57 = vpop.f32.mrf.mxu3  ;;  %v1434_v36 = vmax.f32 %v653_v53, 0.0 }
 0x291   : > { %v1260_v18 = vadd.f32 %v1259_v13, %v3299_v7  ;;  %v3582_v11 = vpop.f32.mrf.mxu0  ;;  %v3584_v46 = vpop.f32.mrf.mxu1 }
 0x293   : > { %v3592_v19 = vadd.f32 %v1372_v57, %v1260_v18  ;;  %v1435_v57 = vmax.f32 %v4132_v58, 0.0  ;;  %v4133_v18 = vld [vmem:[#allocation41_spill] sm:$0xff] }
 0x294   : > { %1635 = vmatmul.f32.gmra.mxu0 %v1430_v61  ;;  %1748 = vmatmul.f32.gmra.mxu1 %v1431_v2  ;;  %v543_v61 = vadd.f32 %v4133_v18, %v3455_v28  ;;  %v1436_v2 = vmax.f32 %v1105_v24, 0.0 }
 0x295   : > { %1861 = vmatmul.f32.gmra.mxu2 %v1432_v48  ;;  %1974 = vmatmul.f32.gmra.mxu3 %v1433_v35  ;;  %v1437_v48 = vmax.f32 %v3394_v32, 0.0  ;;  %v4134_v35 = vld [vmem:[#allocation42_spill] sm:$0xff] }
 0x296   : > { %v656_v27 = vadd.f32 %v4134_v35, %v543_v61  ;;  %v1111_v35 = vadd.f32 %v3403_v38, %v998_v5  ;;  %v1001_v38 = vadd.f32 %v3412_v52, %v3457_v29  ;;  %v4141_v52 = vld [vmem:[#allocation60_spill] sm:$0xff] }
 0x298   : > { %v1262_v37 = vpop.f32.mrf.mxu2  ;;  %v1375_v13 = vpop.f32.mrf.mxu3  ;;  %v1438_v18 = vmax.f32 %v656_v27, 0.0 }
 0x299   : > { %v1263_v26 = vadd.f32 %v1262_v37, %v3299_v7  ;;  %v3597_v49 = vpop.f32.mrf.mxu0  ;;  %v3599_v47 = vpop.f32.mrf.mxu1 }
 0x29b   : > { %v3607_v8 = vadd.f32 %v1375_v13, %v1263_v26  ;;  %v1439_v13 = vmax.f32 %v4135_v21, 0.0  ;;  %v4136_v26 = vld [vmem:[#allocation46_spill] sm:$0xff] }
 0x29c   : > { %1638 = vmatmul.f32.gmra.mxu0 %v1434_v36  ;;  %1751 = vmatmul.f32.gmra.mxu1 %v1435_v57  ;;  %v546_v36 = vadd.f32 %v4136_v26, %v3455_v28  ;;  %v1440_v57 = vmax.f32 %v1108_v44, 0.0 }
 0x29d   : > { %1864 = vmatmul.f32.gmra.mxu2 %v1436_v2  ;;  %1977 = vmatmul.f32.gmra.mxu3 %v1437_v48  ;;  %v1441_v2 = vmax.f32 %v3405_v33, 0.0  ;;  %v4137_v48 = vld [vmem:[#allocation47_spill] sm:$0xff] }
 0x29e   : > { %v659_v63 = vadd.f32 %v4137_v48, %v546_v36  ;;  %v1114_v48 = vadd.f32 %v3414_v4, %v1001_v38  ;;  %v1004_v4 = vadd.f32 %v3423_v51, %v3457_v29  ;;  %v4144_v51 = vld [vmem:[#allocation65_spill] sm:$0xff] }
 0x2a0   : > { %v1265_v53 = vpop.f32.mrf.mxu2  ;;  %v1378_v37 = vpop.f32.mrf.mxu3  ;;  %v1442_v26 = vmax.f32 %v659_v63, 0.0 }
 0x2a1   : > { %v1266_v58 = vadd.f32 %v1265_v53, %v3299_v7  ;;  %v3612_v24 = vpop.f32.mrf.mxu0  ;;  %v3614_v32 = vpop.f32.mrf.mxu1 }
 0x2a3   : > { %v3622_v61 = vadd.f32 %v1378_v37, %v1266_v58  ;;  %v1443_v37 = vmax.f32 %v4138_v60, 0.0  ;;  %v4139_v58 = vld [vmem:[#allocation51_spill] sm:$0xff] }
 0x2a4   : > { %1641 = vmatmul.f32.gmra.mxu0 %v1438_v18  ;;  %1754 = vmatmul.f32.gmra.mxu1 %v1439_v13  ;;  %v549_v18 = vadd.f32 %v4139_v58, %v3455_v28  ;;  %v1444_v13 = vmax.f32 %v1111_v35, 0.0 }
 0x2a5   : > { %1867 = vmatmul.f32.gmra.mxu2 %v1440_v57  ;;  %1980 = vmatmul.f32.gmra.mxu3 %v1441_v2  ;;  %v1445_v57 = vmax.f32 %v3416_v30, 0.0  ;;  %v4140_v2 = vld [vmem:[#allocation52_spill] sm:$0xff] }
 0x2a6   : > { %v662_v5 = vadd.f32 %v4140_v2, %v549_v18  ;;  %v1117_v2 = vadd.f32 %v3425_v16, %v1004_v4  ;;  %v1007_v16 = vadd.f32 %v3434_v22, %v3457_v29  ;;  %v4147_v22 = vld [vmem:[#allocation69_spill] sm:$0xff] }
 0x2a8   : > { %v1268_v27 = vpop.f32.mrf.mxu2  ;;  %v1381_v53 = vpop.f32.mrf.mxu3  ;;  %v1446_v58 = vmax.f32 %v662_v5, 0.0 }
 0x2a9   : > { %v1269_v21 = vadd.f32 %v1268_v27, %v3299_v7  ;;  %v3627_v44 = vpop.f32.mrf.mxu0  ;;  %v3629_v33 = vpop.f32.mrf.mxu1 }
 0x2ab   : > { %v3637_v36 = vadd.f32 %v1381_v53, %v1269_v21  ;;  %v1447_v53 = vmax.f32 %v4141_v52, 0.0  ;;  %v4142_v21 = vld [vmem:[#allocation56_spill] sm:$0xff] }
 0x2ac   : > { %1644 = vmatmul.f32.gmra.mxu0 %v1442_v26  ;;  %1757 = vmatmul.f32.gmra.mxu1 %v1443_v37  ;;  %v552_v26 = vadd.f32 %v4142_v21, %v3455_v28  ;;  %v1448_v37 = vmax.f32 %v1114_v48, 0.0 }
 0x2ad   : > { %1870 = vmatmul.f32.gmra.mxu2 %v1444_v13  ;;  %1983 = vmatmul.f32.gmra.mxu3 %v1445_v57  ;;  %v1449_v13 = vmax.f32 %v3427_v31, 0.0  ;;  %v4143_v57 = vld [vmem:[#allocation57_spill] sm:$0xff] }
 0x2ae   : > { %v665_v38 = vadd.f32 %v4143_v57, %v552_v26  ;;  %v1120_v57 = vadd.f32 %v3436_v39, %v1007_v16  ;;  %v1010_v39 = vadd.f32 %v3445_v15, %v3457_v29  ;;  %v4152_v15 = vld [vmem:[#allocation73_spill] sm:$0xff] }
 0x2b0   : > { %v1271_v63 = vpop.f32.mrf.mxu2  ;;  %v1384_v27 = vpop.f32.mrf.mxu3  ;;  %v1450_v21 = vmax.f32 %v665_v38, 0.0 }
 0x2b1   : > { %v1272_v60 = vadd.f32 %v1271_v63, %v3299_v7  ;;  %v3642_v35 = vpop.f32.mrf.mxu0  ;;  %v3644_v30 = vpop.f32.mrf.mxu1 }
 0x2b3   : > { %v3652_v18 = vadd.f32 %v1384_v27, %v1272_v60  ;;  %v1451_v27 = vmax.f32 %v4144_v51, 0.0  ;;  %v4145_v60 = vld [vmem:[#allocation61_spill] sm:$0xff] }
 0x2b4   : > { %1647 = vmatmul.f32.gmra.mxu0 %v1446_v58  ;;  %1760 = vmatmul.f32.gmra.mxu1 %v1447_v53  ;;  %v555_v58 = vadd.f32 %v4145_v60, %v3455_v28  ;;  %v1452_v53 = vmax.f32 %v1117_v2, 0.0 }
 0x2b5   : > { %1873 = vmatmul.f32.gmra.mxu2 %v1448_v37  ;;  %1986 = vmatmul.f32.gmra.mxu3 %v1449_v13  ;;  %v1453_v37 = vmax.f32 %v3438_v1, 0.0  ;;  %v4146_v13 = vld [vmem:[#allocation62_spill] sm:$0xff] }
 0x2b6   : > { %v668_v4 = vadd.f32 %v4146_v13, %v555_v58  ;;  %v1123_v13 = vadd.f32 %v3447_v17, %v1010_v39  ;;  %v4155_v39 = vld [vmem:[#allocation71_spill] sm:$0xff] }
 0x2b8   : > { %v1274_v5 = vpop.f32.mrf.mxu2  ;;  %v1387_v63 = vpop.f32.mrf.mxu3  ;;  %v1454_v60 = vmax.f32 %v668_v4, 0.0 }
 0x2b9   : > { %v1275_v52 = vadd.f32 %v1274_v5, %v3299_v7  ;;  %v3657_v48 = vpop.f32.mrf.mxu0  ;;  %v3659_v31 = vpop.f32.mrf.mxu1 }
 0x2bb   : > { %v3667_v26 = vadd.f32 %v1387_v63, %v1275_v52  ;;  %v1455_v63 = vmax.f32 %v4147_v22, 0.0  ;;  %v4148_v52 = vld [vmem:[#allocation66_spill] sm:$0xff] }
 0x2bc   : > { %1650 = vmatmul.f32.gmra.mxu0 %v1450_v21  ;;  %1763 = vmatmul.f32.gmra.mxu1 %v1451_v27  ;;  %v558_v21 = vadd.f32 %v4148_v52, %v3455_v28  ;;  %v1456_v27 = vmax.f32 %v1120_v57, 0.0 }
 0x2bd   : > { %1876 = vmatmul.f32.gmra.mxu2 %v1452_v53  ;;  %1989 = vmatmul.f32.gmra.mxu3 %v1453_v37  ;;  %v1457_v53 = vmax.f32 %v3449_v14, 0.0  ;;  %v4149_v37 = vld [vmem:[#allocation67_spill] sm:$0xff] }
 0x2be   : > { %v671_v16 = vadd.f32 %v4149_v37, %v558_v21  ;;  %v4154_v21 = vld [vmem:[#allocation43_spill] sm:$0xff] }
 0x2bf   : > { %v1013_v17 = vadd.f32 %v4154_v21, %v3457_v29  ;;  %v4159_v21 = vld [vmem:[#allocation76_spill] sm:$0xff] }
 0x2c0   : > { %v1277_v38 = vpop.f32.mrf.mxu2  ;;  %v1390_v5 = vpop.f32.mrf.mxu3  ;;  %v1458_v52 = vmax.f32 %v671_v16, 0.0  ;;  %v4156_v16 = vld [vmem:[#allocation44_spill] sm:$0xff] }
 0x2c1   : > { %v1278_v51 = vadd.f32 %v1277_v38, %v3299_v7  ;;  %v3672_v2 = vpop.f32.mrf.mxu0  ;;  %v3674_v1 = vpop.f32.mrf.mxu1 }
 0x2c3   : > { %v3682_v58 = vadd.f32 %v1390_v5, %v1278_v51  ;;  %v1459_v5 = vmax.f32 %v4152_v15, 0.0  ;;  %v4153_v51 = vld [vmem:[#allocation70_spill] sm:$0xff] }
 0x2c4   : > { %1653 = vmatmul.f32.gmra.mxu0 %v1454_v60  ;;  %1766 = vmatmul.f32.gmra.mxu1 %v1455_v63  ;;  %v561_v60 = vadd.f32 %v4153_v51, %v3455_v28  ;;  %v1460_v63 = vmax.f32 %v1123_v13, 0.0 }
 0x2c5   : > { %1879 = vmatmul.f32.gmra.mxu2 %v1456_v27  ;;  %1992 = vmatmul.f32.gmra.mxu3 %v1457_v53  ;;  %v1461_v27 = vmax.f32 %v3468_v20, 0.0 }
 0x2c6   : > { %v674_v37 = vadd.f32 %v4155_v39, %v561_v60 }
 0x2c8   : > { %v1280_v4 = vpop.f32.mrf.mxu2  ;;  %v1393_v38 = vpop.f32.mrf.mxu3 }
 0x2c9   : > { %v1281_v22 = vadd.f32 %v1280_v4, %v3299_v7  ;;  %v3687_v57 = vpop.f32.mrf.mxu0  ;;  %v3689_v14 = vpop.f32.mrf.mxu1  ;;  %v1126_v4 = vadd.f32 %v4156_v16, %v1013_v17  ;;  %v4161_v17 = vld [vmem:[#allocation75_spill] sm:$0xff] }
 0x2ca   : > { %4150 = vst [vmem:[#allocation49_spill] sm:$0xff] %v3687_v57  ;;  %v1462_v57 = vmax.f32 %v674_v37, 0.0  ;;  %v4162_v37 = vld [vmem:[#allocation48_spill] sm:$0xff] }
 0x2cb   : > { %4151 = vst [vmem:[#allocation53_spill] sm:$0xff] %v3689_v14  ;;  %v3697_v53 = vadd.f32 %v1393_v38, %v1281_v22  ;;  %v1463_v38 = vmax.f32 %v4159_v21, 0.0  ;;  %v4160_v22 = vld [vmem:[#allocation74_spill] sm:$0xff]  ;;  %v1464_v60 = vmax.f32 %v1126_v4, 0.0 }
 0x2cc   : > { %1656 = vmatmul.f32.gmra.mxu0 %v1458_v52  ;;  %1769 = vmatmul.f32.gmra.mxu1 %v1459_v5  ;;  %v564_v52 = vadd.f32 %v4160_v22, %v3455_v28  ;;  %v1016_v5 = vadd.f32 %v3477_v50, %v3457_v29  ;;  %v4164_v22 = vld [vmem:[#allocation77_spill] sm:$0xff] }
 0x2cd   : > { %1882 = vmatmul.f32.gmra.mxu2 %v1460_v63  ;;  %1995 = vmatmul.f32.gmra.mxu3 %v1461_v27  ;;  %v1465_v63 = vmax.f32 %v3487_v56, 0.0 }
 0x2ce   : > { %v677_v39 = vadd.f32 %v4161_v17, %v564_v52  ;;  %v1129_v16 = vadd.f32 %v4162_v37, %v1016_v5  ;;  %v567_v52 = vadd.f32 %v4164_v22, %v3455_v28  ;;  %v1469_v5 = vmax.f32 %v3502_v42, 0.0 }
 0x2d0   : > { %v1283_v15 = vpop.f32.mrf.mxu2  ;;  %v1396_v14 = vpop.f32.mrf.mxu3 }
 0x2d1   : > { %v1284_v51 = vadd.f32 %v1283_v15, %v3299_v7  ;;  %v3702_v13 = vpop.f32.mrf.mxu0  ;;  %v3704_v20 = vpop.f32.mrf.mxu1  ;;  %v3719_v15 = vld [vmem:[%s3951_s4] ss:$0 sm:$0xff] }
 0x2d2   : > { %4157 = vst [vmem:[#allocation54_spill] sm:$0xff] %v3702_v13 }
 0x2d3   : > { %4158 = vst [vmem:[#allocation58_spill] sm:$0xff] %v3704_v20  ;;  %v3712_v27 = vadd.f32 %v1396_v14, %v1284_v51  ;;  %v4163_v51 = vld [vmem:[#allocation79_spill] sm:$0xff] }
 0x2d4   : > { %1659 = vmatmul.f32.gmra.mxu0 %v1462_v57  ;;  %1772 = vmatmul.f32.gmra.mxu1 %v1463_v38  ;;  %v1466_v57 = vmax.f32 %v677_v39, 0.0  ;;  %v1467_v38 = vmax.f32 %v4163_v51, 0.0 }
 0x2d5   : > { %1885 = vmatmul.f32.gmra.mxu2 %v1464_v60  ;;  %1998 = vmatmul.f32.gmra.mxu3 %v1465_v63  ;;  %v1468_v60 = vmax.f32 %v1129_v16, 0.0  ;;  %v1019_v63 = vadd.f32 %v3492_v34, %v3457_v29 }
 0x2d8   : > { %v1286_v21 = vpop.f32.mrf.mxu2  ;;  %v1399_v50 = vpop.f32.mrf.mxu3 }
 0x2d9   : > { %v1287_v4 = vadd.f32 %v1286_v21, %v3299_v7  ;;  %v1615_v56 = vpop.f32.mrf.mxu0  ;;  %v1728_v14 = vpop.f32.mrf.mxu1  ;;  %v4165_v7 = vld [vmem:[#allocation78_spill] sm:$0xff]  ;;  %v1132_v21 = vadd.f32 %v3494_v12, %v1019_v63 }
 0x2da   : > { %v1616_v37 = vadd.f32 %v3719_v15, %v1615_v56  ;;  %v680_v39 = vadd.f32 %v4165_v7, %v567_v52  ;;  %v4167_v56 = vld [vmem:[#allocation80_spill] sm:$0xff]  ;;  %v1473_v52 = vmax.f32 %v3517_v10, 0.0 }
 0x2db   : > { %v3728_v17 = vadd.f32 %v1399_v50, %v1287_v4  ;;  %v4166_v50 = vld [vmem:[#allocation82_spill] sm:$0xff] }
 0x2dc   : > { %1662 = vmatmul.f32.gmra.mxu0 %v1466_v57  ;;  %1775 = vmatmul.f32.gmra.mxu1 %v1467_v38  ;;  %v1729_v51 = vadd.f32 %v1728_v14, %v1616_v37  ;;  %v1470_v34 = vmax.f32 %v680_v39, 0.0  ;;  %v1471_v4 = vmax.f32 %v4166_v50, 0.0  ;;  %v570_v57 = vadd.f32 %v4167_v56, %v3455_v28 }
 0x2dd   : > { %1888 = vmatmul.f32.gmra.mxu2 %v1468_v60  ;;  %2001 = vmatmul.f32.gmra.mxu3 %v1469_v5  ;;  %v1022_v38 = vadd.f32 %v3507_v6, %v3457_v29  ;;  %v1472_v60 = vmax.f32 %v1132_v21, 0.0  ;;  %v4168_v5 = vld [vmem:[#allocation81_spill] sm:$0xff]  ;;  %v1025_v56 = vadd.f32 %v3522_v45, %v3457_v29 }
 0x2de   : > { %v683_v63 = vadd.f32 %v4168_v5, %v570_v57  ;;  %v4171_v57 = vld [vmem:[#allocation84_spill] sm:$0xff] }
 0x2df   : > { %v1135_v37 = vadd.f32 %v3509_v3, %v1022_v38 }
 0x2e0   : > { %v1841_v16 = vpop.f32.mrf.mxu2  ;;  %v1954_v22 = vpop.f32.mrf.mxu3 }
 0x2e1   : > { %v1842_v42 = vadd.f32 %v1841_v16, %v1729_v51  ;;  %v1618_v20 = vpop.f32.mrf.mxu0  ;;  %v1731_v13 = vpop.f32.mrf.mxu1  ;;  %v4169_v16 = vld [vmem:[#allocation85_spill] sm:$0xff]  ;;  %v1476_v50 = vmax.f32 %v1135_v37, 0.0  ;;  %v4172_v37 = vld [vmem:[#allocation88_spill] sm:$0xff] }
 0x2e2   : > { %v1619_v14 = vadd.f32 %v3719_v15, %v1618_v20  ;;  %v1474_v20 = vmax.f32 %v683_v63, 0.0 }
 0x2e3   : > { %v1955_v12 = vadd.f32 %v1954_v22, %v1842_v42  ;;  %v1475_v22 = vmax.f32 %v4169_v16, 0.0  ;;  %v4170_v42 = vld [vmem:[#allocation83_spill] sm:$0xff] }
 0x2e4   : > { %1665 = vmatmul.f32.gmra.mxu0 %v1470_v34  ;;  %1778 = vmatmul.f32.gmra.mxu1 %v1471_v4  ;;  %v1732_v7 = vadd.f32 %v1731_v13, %v1619_v14  ;;  %v573_v34 = vadd.f32 %v4170_v42, %v3455_v28  ;;  %v1477_v4 = vmax.f32 %v3532_v0, 0.0  ;;  %v4174_v16 = vld [vmem:[#allocation87_spill] sm:$0xff] }
 0x2e5   : > { %2050 = vst [vmem:[%s3741_s23] sm:$0xff] %v1955_v12  ;;  %1891 = vmatmul.f32.gmra.mxu2 %v1472_v60  ;;  %2004 = vmatmul.f32.gmra.mxu3 %v1473_v52  ;;  %v1138_v60 = vadd.f32 %v3524_v54, %v1025_v56 }
 0x2e6   : > { %v686_v38 = vadd.f32 %v4171_v57, %v573_v34 }
 0x2e8   : > { %v1844_v6 = vpop.f32.mrf.mxu2  ;;  %v1957_v39 = vpop.f32.mrf.mxu3  ;;  %v1478_v45 = vmax.f32 %v686_v38, 0.0  ;;  %v4176_v38 = vld [vmem:[#allocation89_spill] sm:$0xff] }
 0x2e9   : > { %v1845_v10 = vadd.f32 %v1844_v6, %v1732_v7  ;;  %v1621_v21 = vpop.f32.mrf.mxu0  ;;  %v1734_v51 = vpop.f32.mrf.mxu1  ;;  %v1479_v7 = vmax.f32 %v4172_v37, 0.0  ;;  %v4173_v6 = vld [vmem:[#allocation86_spill] sm:$0xff] }
 0x2ea   : > { %v1622_v13 = vadd.f32 %v3719_v15, %v1621_v21  ;;  %v1480_v21 = vmax.f32 %v1138_v60, 0.0  ;;  %v579_v60 = vadd.f32 %v4176_v38, %v3455_v28  ;;  %v4181_v38 = vld [vmem:[#allocation97_spill] sm:$0xff] }
 0x2eb   : > { %v1958_v3 = vadd.f32 %v1957_v39, %v1845_v10  ;;  %v576_v39 = vadd.f32 %v4173_v6, %v3455_v28  ;;  %v1028_v10 = vadd.f32 %v3537_v25, %v3457_v29 }
 0x2ec   : > { %1668 = vmatmul.f32.gmra.mxu0 %v1474_v20  ;;  %1781 = vmatmul.f32.gmra.mxu1 %v1475_v22  ;;  %v1735_v52 = vadd.f32 %v1734_v51, %v1622_v13  ;;  %v1481_v20 = vmax.f32 %v3547_v23, 0.0  ;;  %v4175_v13 = vld [vmem:[#allocation91_spill] sm:$0xff] }
 0x2ed   : > { %2051 = vst [vmem:[%s3741_s23 + $0x8] sm:$0xff] %v1958_v3  ;;  %1894 = vmatmul.f32.gmra.mxu2 %v1476_v50  ;;  %2007 = vmatmul.f32.gmra.mxu3 %v1477_v4  ;;  %v689_v22 = vadd.f32 %v4174_v16, %v576_v39  ;;  %v1141_v42 = vadd.f32 %v3539_v55, %v1028_v10  ;;  %v1483_v57 = vmax.f32 %v4175_v13, 0.0 }
 0x2ee   : > { %v1034_v16 = vadd.f32 %v3567_v59, %v3457_v29 }
 0x2ef   : > { %v1482_v23 = vmax.f32 %v689_v22, 0.0 }
 0x2f0   : > { %v1847_v12 = vpop.f32.mrf.mxu2  ;;  %v1960_v14 = vpop.f32.mrf.mxu3 }
 0x2f1   : > { %v1848_v0 = vadd.f32 %v1847_v12, %v1735_v52  ;;  %v1624_v5 = vpop.f32.mrf.mxu0  ;;  %v1737_v63 = vpop.f32.mrf.mxu1  ;;  %v1484_v52 = vmax.f32 %v1141_v42, 0.0  ;;  %v1485_v12 = vmax.f32 %v3562_v9, 0.0  ;;  %v1489_v42 = vmax.f32 %v3577_v62, 0.0 }
 0x2f2   : > { %v1625_v51 = vadd.f32 %v3719_v15, %v1624_v5  ;;  %v4177_v5 = vld [vmem:[#allocation90_spill] sm:$0xff] }
 0x2f3   : > { %v1961_v54 = vadd.f32 %v1960_v14, %v1848_v0  ;;  %v1031_v14 = vadd.f32 %v3552_v43, %v3457_v29 }
 0x2f4   : > { %1671 = vmatmul.f32.gmra.mxu0 %v1478_v45  ;;  %1784 = vmatmul.f32.gmra.mxu1 %v1479_v7  ;;  %v1738_v34 = vadd.f32 %v1737_v63, %v1625_v51  ;;  %v692_v63 = vadd.f32 %v4177_v5, %v579_v60  ;;  %v1491_v60 = vmax.f32 %v4181_v38, 0.0 }
 0x2f5   : > { %2052 = vst [vmem:[%s3741_s23 + $0x10] sm:$0xff] %v1961_v54  ;;  %1897 = vmatmul.f32.gmra.mxu2 %v1480_v21  ;;  %2010 = vmatmul.f32.gmra.mxu3 %v1481_v20  ;;  %v1144_v45 = vadd.f32 %v3554_v40, %v1031_v14  ;;  %v4178_v21 = vld [vmem:[#allocation94_spill] sm:$0xff]  ;;  %v4179_v54 = vld [vmem:[#allocation92_spill] sm:$0xff] }
 0x2f6   : > { %v1486_v43 = vmax.f32 %v692_v63, 0.0  ;;  %v1487_v20 = vmax.f32 %v4178_v21, 0.0  ;;  %v582_v51 = vadd.f32 %v4179_v54, %v3455_v28  ;;  %v4183_v63 = vld [vmem:[#allocation96_spill] sm:$0xff] }
 0x2f7   : > { %v1488_v22 = vmax.f32 %v1144_v45, 0.0 }
 0x2f8   : > { %v1850_v50 = vpop.f32.mrf.mxu2  ;;  %v1963_v4 = vpop.f32.mrf.mxu3 }
 0x2f9   : > { %v1851_v25 = vadd.f32 %v1850_v50, %v1738_v34  ;;  %v1627_v56 = vpop.f32.mrf.mxu0  ;;  %v1740_v3 = vpop.f32.mrf.mxu1  ;;  %v4180_v50 = vld [vmem:[#allocation93_spill] sm:$0xff] }
 0x2fa   : > { %v1628_v0 = vadd.f32 %v3719_v15, %v1627_v56 }
 0x2fb   : > { %v1964_v55 = vadd.f32 %v1963_v4, %v1851_v25  ;;  %v695_v4 = vadd.f32 %v4180_v50, %v582_v51  ;;  %v1147_v25 = vadd.f32 %v3569_v41, %v1034_v16  ;;  %v1040_v51 = vadd.f32 %v3597_v49, %v3457_v29 }
 0x2fc   : > { %1674 = vmatmul.f32.gmra.mxu0 %v1482_v23  ;;  %1787 = vmatmul.f32.gmra.mxu1 %v1483_v57  ;;  %v1741_v37 = vadd.f32 %v1740_v3, %v1628_v0  ;;  %v1037_v0 = vadd.f32 %v3582_v11, %v3457_v29 }
 0x2fd   : > { %2053 = vst [vmem:[%s3741_s23 + $0x18] sm:$0xff] %v1964_v55  ;;  %1900 = vmatmul.f32.gmra.mxu2 %v1484_v52  ;;  %2013 = vmatmul.f32.gmra.mxu3 %v1485_v12  ;;  %v1490_v62 = vmax.f32 %v695_v4, 0.0  ;;  %v4182_v52 = vld [vmem:[#allocation95_spill] sm:$0xff]  ;;  %v1492_v14 = vmax.f32 %v1147_v25, 0.0  ;;  %v1493_v55 = vmax.f32 %v3592_v19, 0.0  ;;  %v1153_v50 = vadd.f32 %v3599_v47, %v1040_v51 }
 0x2fe   : > { %v585_v12 = vadd.f32 %v4182_v52, %v3455_v28  ;;  %v1043_v52 = vadd.f32 %v3612_v24, %v3457_v29 }
 0x2ff   : > { %v1500_v38 = vmax.f32 %v1153_v50, 0.0  ;;  %v4194_v50 = vld [vmem:[#allocation107_spill] sm:$0xff] }
 0x300   : > { %v1853_v7 = vpop.f32.mrf.mxu2  ;;  %v1966_v6 = vpop.f32.mrf.mxu3  ;;  %v698_v45 = vadd.f32 %v4183_v63, %v585_v12 }
 0x301   : > { %v1854_v9 = vadd.f32 %v1853_v7, %v1741_v37  ;;  %v1630_v39 = vpop.f32.mrf.mxu0  ;;  %v1743_v10 = vpop.f32.mrf.mxu1  ;;  %v1150_v37 = vadd.f32 %v3584_v46, %v1037_v0  ;;  %v1156_v0 = vadd.f32 %v3614_v32, %v1043_v52  ;;  %v4196_v52 = vld [vmem:[#allocation112_spill] sm:$0xff] }
 0x302   : > { %v1631_v34 = vadd.f32 %v3719_v15, %v1630_v39  ;;  %v1494_v11 = vmax.f32 %v698_v45, 0.0 }
 0x303   : > { %v1967_v40 = vadd.f32 %v1966_v6, %v1854_v9  ;;  %v1496_v16 = vmax.f32 %v1150_v37, 0.0 }
 0x304   : > { %1677 = vmatmul.f32.gmra.mxu0 %v1486_v43  ;;  %1790 = vmatmul.f32.gmra.mxu1 %v1487_v20  ;;  %v1744_v56 = vadd.f32 %v1743_v10, %v1631_v34  ;;  %v4184_v43 = vld [vmem:[#allocation100_spill] sm:$0xff]  ;;  %v4185_v20 = vld [vmem:[#allocation98_spill] sm:$0xff] }
 0x305   : > { %2054 = vst [vmem:[%s3741_s23 + $0x20] sm:$0xff] %v1967_v40  ;;  %1903 = vmatmul.f32.gmra.mxu2 %v1488_v22  ;;  %2016 = vmatmul.f32.gmra.mxu3 %v1489_v42  ;;  %v1495_v21 = vmax.f32 %v4184_v43, 0.0  ;;  %v588_v54 = vadd.f32 %v4185_v20, %v3455_v28  ;;  %v1497_v22 = vmax.f32 %v3607_v8, 0.0  ;;  %v4186_v40 = vld [vmem:[#allocation99_spill] sm:$0xff] }
 0x307   : > { %v701_v34 = vadd.f32 %v4186_v40, %v588_v54  ;;  %v4193_v40 = vld [vmem:[#allocation109_spill] sm:$0xff] }
 0x308   : > { %v1856_v3 = vpop.f32.mrf.mxu2  ;;  %v1969_v23 = vpop.f32.mrf.mxu3 }
 0x309   : > { %v1857_v59 = vadd.f32 %v1856_v3, %v1744_v56  ;;  %v1633_v13 = vpop.f32.mrf.mxu0  ;;  %v1746_v57 = vpop.f32.mrf.mxu1  ;;  %v1498_v8 = vmax.f32 %v701_v34, 0.0  ;;  %v1507_v34 = vmax.f32 %v4193_v40, 0.0  ;;  %v4202_v40 = vld [vmem:[#allocation118_spill] sm:$0xff] }
 0x30a   : > { %v1634_v5 = vadd.f32 %v3719_v15, %v1633_v13 }
 0x30b   : > { %v1970_v41 = vadd.f32 %v1969_v23, %v1857_v59  ;;  %v4187_v59 = vld [vmem:[#allocation103_spill] sm:$0xff] }
 0x30c   : > { %1680 = vmatmul.f32.gmra.mxu0 %v1490_v62  ;;  %1793 = vmatmul.f32.gmra.mxu1 %v1491_v60  ;;  %v1747_v7 = vadd.f32 %v1746_v57, %v1634_v5  ;;  %v1499_v13 = vmax.f32 %v4187_v59, 0.0  ;;  %v4188_v57 = vld [vmem:[#allocation101_spill] sm:$0xff]  ;;  %v1501_v60 = vmax.f32 %v3622_v61, 0.0 }
 0x30d   : > { %2055 = vst [vmem:[%s3741_s23 + $0x28] sm:$0xff] %v1970_v41  ;;  %1906 = vmatmul.f32.gmra.mxu2 %v1492_v14  ;;  %2019 = vmatmul.f32.gmra.mxu3 %v1493_v55  ;;  %v591_v62 = vadd.f32 %v4188_v57, %v3455_v28  ;;  %v4189_v14 = vld [vmem:[#allocation102_spill] sm:$0xff] }
 0x30f   : > { %v704_v55 = vadd.f32 %v4189_v14, %v591_v62 }
 0x310   : > { %v1859_v6 = vpop.f32.mrf.mxu2  ;;  %v1972_v9 = vpop.f32.mrf.mxu3 }
 0x311   : > { %v1860_v19 = vadd.f32 %v1859_v6, %v1747_v7  ;;  %v1636_v39 = vpop.f32.mrf.mxu0  ;;  %v1749_v10 = vpop.f32.mrf.mxu1  ;;  %v1502_v24 = vmax.f32 %v704_v55, 0.0  ;;  %v4190_v7 = vld [vmem:[#allocation106_spill] sm:$0xff]  ;;  %v1052_v55 = vadd.f32 %v3657_v48, %v3457_v29 }
 0x312   : > { %v1637_v42 = vadd.f32 %v3719_v15, %v1636_v39  ;;  %v1503_v6 = vmax.f32 %v4190_v7, 0.0  ;;  %v1046_v39 = vadd.f32 %v3627_v44, %v3457_v29 }
 0x313   : > { %v1973_v46 = vadd.f32 %v1972_v9, %v1860_v19  ;;  %v4191_v9 = vld [vmem:[#allocation104_spill] sm:$0xff] }
 0x314   : > { %1683 = vmatmul.f32.gmra.mxu0 %v1494_v11  ;;  %1796 = vmatmul.f32.gmra.mxu1 %v1495_v21  ;;  %v1750_v4 = vadd.f32 %v1749_v10, %v1637_v42  ;;  %v594_v19 = vadd.f32 %v4191_v9, %v3455_v28  ;;  %v1504_v10 = vmax.f32 %v1156_v0, 0.0  ;;  %v1505_v11 = vmax.f32 %v3637_v36, 0.0  ;;  %v4192_v21 = vld [vmem:[#allocation105_spill] sm:$0xff] }
 0x315   : > { %2056 = vst [vmem:[%s3741_s23 + $0x30] sm:$0xff] %v1973_v46  ;;  %1909 = vmatmul.f32.gmra.mxu2 %v1496_v16  ;;  %2022 = vmatmul.f32.gmra.mxu3 %v1497_v22  ;;  %v1159_v54 = vadd.f32 %v3629_v33, %v1046_v39 }
 0x316   : > { %v707_v20 = vadd.f32 %v4192_v21, %v594_v19  ;;  %v4199_v19 = vld [vmem:[#allocation115_spill] sm:$0xff]  ;;  %v1055_v21 = vadd.f32 %v3672_v2, %v3457_v29 }
 0x317   : > { %v1515_v39 = vmax.f32 %v4199_v19, 0.0 }
 0x318   : > { %v1862_v25 = vpop.f32.mrf.mxu2  ;;  %v1975_v56 = vpop.f32.mrf.mxu3  ;;  %v1506_v36 = vmax.f32 %v707_v20, 0.0 }
 0x319   : > { %v1863_v49 = vadd.f32 %v1862_v25, %v1750_v4  ;;  %v1639_v3 = vpop.f32.mrf.mxu0  ;;  %v1752_v23 = vpop.f32.mrf.mxu1  ;;  %v597_v4 = vadd.f32 %v4194_v50, %v3455_v28  ;;  %v1508_v25 = vmax.f32 %v1159_v54, 0.0  ;;  %v4201_v54 = vld [vmem:[#allocation114_spill] sm:$0xff]  ;;  %v4203_v50 = vld [vmem:[#allocation116_spill] sm:$0xff] }
 0x31a   : > { %v1640_v12 = vadd.f32 %v3719_v15, %v1639_v3 }
 0x31b   : > { %v1976_v47 = vadd.f32 %v1975_v56, %v1863_v49  ;;  %v1509_v56 = vmax.f32 %v3652_v18, 0.0  ;;  %v1049_v49 = vadd.f32 %v3642_v35, %v3457_v29 }
 0x31c   : > { %1686 = vmatmul.f32.gmra.mxu0 %v1498_v8  ;;  %1799 = vmatmul.f32.gmra.mxu1 %v1499_v13  ;;  %v1753_v41 = vadd.f32 %v1752_v23, %v1640_v12  ;;  %v4195_v23 = vld [vmem:[#allocation108_spill] sm:$0xff]  ;;  %v4197_v12 = vld [vmem:[#allocation110_spill] sm:$0xff] }
 0x31d   : > { %2057 = vst [vmem:[%s3741_s23 + $0x38] sm:$0xff] %v1976_v47  ;;  %1912 = vmatmul.f32.gmra.mxu2 %v1500_v38  ;;  %2025 = vmatmul.f32.gmra.mxu3 %v1501_v60  ;;  %v710_v8 = vadd.f32 %v4195_v23, %v597_v4  ;;  %v1162_v59 = vadd.f32 %v3644_v30, %v1049_v49  ;;  %v1511_v47 = vmax.f32 %v4196_v52, 0.0  ;;  %v4205_v23 = vld [vmem:[#allocation117_spill] sm:$0xff] }
 0x31e   : > { %v600_v14 = vadd.f32 %v4197_v12, %v3455_v28  ;;  %v606_v4 = vadd.f32 %v4203_v50, %v3455_v28  ;;  %v4207_v52 = vld [vmem:[#allocation121_spill] sm:$0xff]  ;;  %v4208_v12 = vld [vmem:[#allocation119_spill] sm:$0xff] }
 0x31f   : > { %v1510_v35 = vmax.f32 %v710_v8, 0.0  ;;  %v1512_v0 = vmax.f32 %v1162_v59, 0.0  ;;  %v4206_v59 = vld [vmem:[#allocation53_spill] sm:$0xff] }
 0x320   : > { %v1865_v5 = vpop.f32.mrf.mxu2  ;;  %v1978_v63 = vpop.f32.mrf.mxu3  ;;  %v719_v8 = vadd.f32 %v4205_v23, %v606_v4 }
 0x321   : > { %v1866_v61 = vadd.f32 %v1865_v5, %v1753_v41  ;;  %v1642_v45 = vpop.f32.mrf.mxu0  ;;  %v1755_v37 = vpop.f32.mrf.mxu1  ;;  %v1513_v41 = vmax.f32 %v3667_v26, 0.0 }
 0x322   : > { %v1643_v43 = vadd.f32 %v3719_v15, %v1642_v45  ;;  %v1165_v45 = vadd.f32 %v3659_v31, %v1052_v55 }
 0x323   : > { %v1979_v32 = vadd.f32 %v1978_v63, %v1866_v61  ;;  %v4198_v63 = vld [vmem:[#allocation111_spill] sm:$0xff] }
 0x324   : > { %1689 = vmatmul.f32.gmra.mxu0 %v1502_v24  ;;  %1802 = vmatmul.f32.gmra.mxu1 %v1503_v6  ;;  %v1756_v51 = vadd.f32 %v1755_v37, %v1643_v43  ;;  %v713_v61 = vadd.f32 %v4198_v63, %v600_v14  ;;  %v1517_v43 = vmax.f32 %v3682_v58, 0.0  ;;  %v609_v14 = vadd.f32 %v4208_v12, %v3455_v28 }
 0x325   : > { %2058 = vst [vmem:[%s3741_s23 + $0x40] sm:$0xff] %v1979_v32  ;;  %1915 = vmatmul.f32.gmra.mxu2 %v1504_v10  ;;  %2028 = vmatmul.f32.gmra.mxu3 %v1505_v11  ;;  %v4200_v10 = vld [vmem:[#allocation113_spill] sm:$0xff]  ;;  %v1516_v32 = vmax.f32 %v1165_v45, 0.0 }
 0x326   : > { %v1514_v26 = vmax.f32 %v713_v61, 0.0  ;;  %v603_v11 = vadd.f32 %v4200_v10, %v3455_v28  ;;  %v4210_v61 = vld [vmem:[#allocation120_spill] sm:$0xff]  ;;  %v1529_v10 = vmax.f32 %v3728_v17, 0.0 }
 0x327   : > { %v722_v45 = vadd.f32 %v4210_v61, %v609_v14 }
 0x328   : > { %v1868_v16 = vpop.f32.mrf.mxu2  ;;  %v1981_v22 = vpop.f32.mrf.mxu3 }
 0x329   : > { %v1869_v44 = vadd.f32 %v1868_v16, %v1756_v51  ;;  %v1645_v46 = vpop.f32.mrf.mxu0  ;;  %v1758_v42 = vpop.f32.mrf.mxu1  ;;  %v716_v51 = vadd.f32 %v4201_v54, %v603_v11  ;;  %v1168_v16 = vadd.f32 %v3674_v1, %v1055_v21 }
 0x32a   : > { %v1646_v3 = vadd.f32 %v3719_v15, %v1645_v46 }
 0x32b   : > { %v1982_v33 = vadd.f32 %v1981_v22, %v1869_v44  ;;  %v1518_v2 = vmax.f32 %v716_v51, 0.0  ;;  %v1520_v49 = vmax.f32 %v1168_v16, 0.0 }
 0x32c   : > { %1692 = vmatmul.f32.gmra.mxu0 %v1506_v36  ;;  %1805 = vmatmul.f32.gmra.mxu1 %v1507_v34  ;;  %v1759_v13 = vadd.f32 %v1758_v42, %v1646_v3  ;;  %v1519_v34 = vmax.f32 %v4202_v40, 0.0 }
 0x32d   : > { %2059 = vst [vmem:[%s3741_s23 + $0x48] sm:$0xff] %v1982_v33  ;;  %1918 = vmatmul.f32.gmra.mxu2 %v1508_v25  ;;  %2031 = vmatmul.f32.gmra.mxu3 %v1509_v56  ;;  %v4204_v25 = vld [vmem:[#allocation49_spill] sm:$0xff]  ;;  %v1521_v33 = vmax.f32 %v3697_v53, 0.0  ;;  %v1522_v53 = vmax.f32 %v719_v8, 0.0 }
 0x32e   : > { %v1058_v56 = vadd.f32 %v4204_v25, %v3457_v29 }
 0x330   : > { %v1871_v57 = vpop.f32.mrf.mxu2  ;;  %v1984_v62 = vpop.f32.mrf.mxu3 }
 0x331   : > { %v1872_v18 = vadd.f32 %v1871_v57, %v1759_v13  ;;  %v1648_v38 = vpop.f32.mrf.mxu0  ;;  %v1761_v60 = vpop.f32.mrf.mxu1  ;;  %v1171_v13 = vadd.f32 %v4206_v59, %v1058_v56 }
 0x332   : > { %v1649_v5 = vadd.f32 %v3719_v15, %v1648_v38 }
 0x333   : > { %v1985_v30 = vadd.f32 %v1984_v62, %v1872_v18  ;;  %v1524_v55 = vmax.f32 %v1171_v13, 0.0 }
 0x334   : > { %1695 = vmatmul.f32.gmra.mxu0 %v1510_v35  ;;  %1808 = vmatmul.f32.gmra.mxu1 %v1511_v47  ;;  %v1762_v37 = vadd.f32 %v1761_v60, %v1649_v5  ;;  %v1523_v47 = vmax.f32 %v4207_v52, 0.0 }
 0x335   : > { %2060 = vst [vmem:[%s3741_s23 + $0x50] sm:$0xff] %v1985_v30  ;;  %1921 = vmatmul.f32.gmra.mxu2 %v1512_v0  ;;  %2034 = vmatmul.f32.gmra.mxu3 %v1513_v41  ;;  %v1525_v0 = vmax.f32 %v3712_v27, 0.0  ;;  %v4209_v41 = vld [vmem:[#allocation54_spill] sm:$0xff] }
 0x336   : > { %v1061_v30 = vadd.f32 %v4209_v41, %v3457_v29  ;;  %v1526_v29 = vmax.f32 %v722_v45, 0.0 }
 0x338   : > { %v1874_v24 = vpop.f32.mrf.mxu2  ;;  %v1987_v7 = vpop.f32.mrf.mxu3 }
 0x339   : > { %v1875_v48 = vadd.f32 %v1874_v24, %v1762_v37  ;;  %v1651_v6 = vpop.f32.mrf.mxu0  ;;  %v1764_v9 = vpop.f32.mrf.mxu1  ;;  %v4211_v37 = vld [vmem:[#allocation58_spill] sm:$0xff] }
 0x33a   : > { %v1652_v20 = vadd.f32 %v3719_v15, %v1651_v6  ;;  %v1174_v24 = vadd.f32 %v4211_v37, %v1061_v30 }
 0x33b   : > { %v1988_v31 = vadd.f32 %v1987_v7, %v1875_v48 }
 0x33c   : > { %1698 = vmatmul.f32.gmra.mxu0 %v1514_v26  ;;  %1811 = vmatmul.f32.gmra.mxu1 %v1515_v39  ;;  %v1765_v22 = vadd.f32 %v1764_v9, %v1652_v20  ;;  %v4212_v26 = vld [vmem:[#allocation122_spill] sm:$0xff]  ;;  %v1528_v39 = vmax.f32 %v1174_v24, 0.0 }
 0x33d   : > { %2061 = vst [vmem:[%s3741_s23 + $0x58] sm:$0xff] %v1988_v31  ;;  %1924 = vmatmul.f32.gmra.mxu2 %v1516_v32  ;;  %2037 = vmatmul.f32.gmra.mxu3 %v1517_v43  ;;  %v1527_v19 = vmax.f32 %v4212_v26, 0.0 }
 0x340   : > { %v1877_v44 = vpop.f32.mrf.mxu2  ;;  %v1990_v46 = vpop.f32.mrf.mxu3 }
 0x341   : > { %v1878_v58 = vadd.f32 %v1877_v44, %v1765_v22  ;;  %v1654_v42 = vpop.f32.mrf.mxu0  ;;  %v1767_v36 = vpop.f32.mrf.mxu1 }
 0x342   : > { %v1655_v3 = vadd.f32 %v3719_v15, %v1654_v42 }
 0x343   : > { %v1991_v1 = vadd.f32 %v1990_v46, %v1878_v58 }
 0x344   : > { %1701 = vmatmul.f32.gmra.mxu0 %v1518_v2  ;;  %1814 = vmatmul.f32.gmra.mxu1 %v1519_v34  ;;  %v1768_v57 = vadd.f32 %v1767_v36, %v1655_v3 }
 0x345   : > { %2062 = vst [vmem:[%s3741_s23 + $0x60] sm:$0xff] %v1991_v1  ;;  %1927 = vmatmul.f32.gmra.mxu2 %v1520_v49  ;;  %2040 = vmatmul.f32.gmra.mxu3 %v1521_v33 }
 0x348   : > { %v1880_v62 = vpop.f32.mrf.mxu2  ;;  %v1993_v18 = vpop.f32.mrf.mxu3 }
 0x349   : > { %v1881_v38 = vadd.f32 %v1880_v62, %v1768_v57  ;;  %v1657_v60 = vpop.f32.mrf.mxu0  ;;  %v1770_v35 = vpop.f32.mrf.mxu1 }
 0x34a   : > { %v1658_v63 = vadd.f32 %v3719_v15, %v1657_v60 }
 0x34b   : > { %v1994_v5 = vadd.f32 %v1993_v18, %v1881_v38 }
 0x34c   : > { %1704 = vmatmul.f32.gmra.mxu0 %v1522_v53  ;;  %1817 = vmatmul.f32.gmra.mxu1 %v1523_v47  ;;  %v1771_v28 = vadd.f32 %v1770_v35, %v1658_v63 }
 0x34d   : > { %2063 = vst [vmem:[%s3741_s23 + $0x68] sm:$0xff] %v1994_v5  ;;  %1930 = vmatmul.f32.gmra.mxu2 %v1524_v55  ;;  %2043 = vmatmul.f32.gmra.mxu3 %v1525_v0 }
 0x350   : > { %v1883_v7 = vpop.f32.mrf.mxu2  ;;  %v1996_v48 = vpop.f32.mrf.mxu3 }
 0x351   : > { %v1884_v27 = vadd.f32 %v1883_v7, %v1771_v28  ;;  %v1660_v6 = vpop.f32.mrf.mxu0  ;;  %v1773_v9 = vpop.f32.mrf.mxu1 }
 0x352   : > { %v1661_v32 = vadd.f32 %v3719_v15, %v1660_v6 }
 0x353   : > { %v1997_v11 = vadd.f32 %v1996_v48, %v1884_v27 }
 0x354   : > { %1707 = vmatmul.f32.gmra.mxu0 %v1526_v29  ;;  %1820 = vmatmul.f32.gmra.mxu1 %v1527_v19  ;;  %v1774_v43 = vadd.f32 %v1773_v9, %v1661_v32 }
 0x355   : > { %2064 = vst [vmem:[%s3741_s23 + $0x70] sm:$0xff] %v1997_v11  ;;  %1933 = vmatmul.f32.gmra.mxu2 %v1528_v39  ;;  %2046 = vmatmul.f32.gmra.mxu3 %v1529_v10 }
 0x358   : > { %v1886_v21 = vpop.f32.mrf.mxu2  ;;  %v1999_v31 = vpop.f32.mrf.mxu3 }
 0x359   : > { %v1887_v20 = vadd.f32 %v1886_v21, %v1774_v43  ;;  %v1663_v54 = vpop.f32.mrf.mxu0  ;;  %v1776_v51 = vpop.f32.mrf.mxu1 }
 0x35a   : > { %v1664_v22 = vadd.f32 %v3719_v15, %v1663_v54 }
 0x35b   : > { %v2000_v16 = vadd.f32 %v1999_v31, %v1887_v20 }
 0x35c   : > { %v1777_v17 = vadd.f32 %v1776_v51, %v1664_v22 }
 0x35d   : > { %2065 = vst [vmem:[%s3741_s23 + $0x78] sm:$0xff] %v2000_v16 }
 0x360   : > { %v1889_v44 = vpop.f32.mrf.mxu2  ;;  %v2002_v46 = vpop.f32.mrf.mxu3 }
 0x361   : > { %v1890_v58 = vadd.f32 %v1889_v44, %v1777_v17  ;;  %v1666_v42 = vpop.f32.mrf.mxu0  ;;  %v1779_v36 = vpop.f32.mrf.mxu1 }
 0x362   : > { %v1667_v40 = vadd.f32 %v3719_v15, %v1666_v42 }
 0x363   : > { %v2003_v2 = vadd.f32 %v2002_v46, %v1890_v58 }
 0x364   : > { %v1780_v34 = vadd.f32 %v1779_v36, %v1667_v40 }
 0x365   : > { %2066 = vst [vmem:[%s3741_s23 + $0x80] sm:$0xff] %v2003_v2 }
 0x368   : > { %v1892_v50 = vpop.f32.mrf.mxu2  ;;  %v2005_v4 = vpop.f32.mrf.mxu3 }
 0x369   : > { %v1893_v25 = vadd.f32 %v1892_v50, %v1780_v34  ;;  %v1669_v56 = vpop.f32.mrf.mxu0  ;;  %v1782_v49 = vpop.f32.mrf.mxu1 }
 0x36a   : > { %v1670_v1 = vadd.f32 %v3719_v15, %v1669_v56 }
 0x36b   : > { %v2006_v33 = vadd.f32 %v2005_v4, %v1893_v25 }
 0x36c   : > { %v1783_v3 = vadd.f32 %v1782_v49, %v1670_v1 }
 0x36d   : > { %2067 = vst [vmem:[%s3741_s23 + $0x88] sm:$0xff] %v2006_v33 }
 0x370   : > { %v1895_v23 = vpop.f32.mrf.mxu2  ;;  %v2008_v8 = vpop.f32.mrf.mxu3 }
 0x371   : > { %v1896_v59 = vadd.f32 %v1895_v23, %v1783_v3  ;;  %v1672_v13 = vpop.f32.mrf.mxu0  ;;  %v1785_v57 = vpop.f32.mrf.mxu1 }
 0x372   : > { %v1673_v18 = vadd.f32 %v3719_v15, %v1672_v13 }
 0x373   : > { %v2009_v62 = vadd.f32 %v2008_v8, %v1896_v59 }
 0x374   : > { %v1786_v38 = vadd.f32 %v1785_v57, %v1673_v18 }
 0x375   : > { %2068 = vst [vmem:[%s3741_s23 + $0x90] sm:$0xff] %v2009_v62 }
 0x378   : > { %v1898_v60 = vpop.f32.mrf.mxu2  ;;  %v2011_v35 = vpop.f32.mrf.mxu3 }
 0x379   : > { %v1899_v53 = vadd.f32 %v1898_v60, %v1786_v38  ;;  %v1675_v52 = vpop.f32.mrf.mxu0  ;;  %v1788_v47 = vpop.f32.mrf.mxu1 }
 0x37a   : > { %v1676_v14 = vadd.f32 %v3719_v15, %v1675_v52 }
 0x37b   : > { %v2012_v12 = vadd.f32 %v2011_v35, %v1899_v53 }
 0x37c   : > { %v1789_v55 = vadd.f32 %v1788_v47, %v1676_v14 }
 0x37d   : > { %2069 = vst [vmem:[%s3741_s23 + $0x98] sm:$0xff] %v2012_v12 }
 0x380   : > { %v1901_v0 = vpop.f32.mrf.mxu2  ;;  %v2014_v41 = vpop.f32.mrf.mxu3 }
 0x381   : > { %v1902_v30 = vadd.f32 %v1901_v0, %v1789_v55  ;;  %v1678_v5 = vpop.f32.mrf.mxu0  ;;  %v1791_v63 = vpop.f32.mrf.mxu1 }
 0x382   : > { %v1679_v45 = vadd.f32 %v3719_v15, %v1678_v5 }
 0x383   : > { %v2015_v61 = vadd.f32 %v2014_v41, %v1902_v30 }
 0x384   : > { %v1792_v37 = vadd.f32 %v1791_v63, %v1679_v45 }
 0x385   : > { %2070 = vst [vmem:[%s3741_s23 + $0xa0] sm:$0xff] %v2015_v61 }
 0x388   : > { %v1904_v24 = vpop.f32.mrf.mxu2  ;;  %v2017_v28 = vpop.f32.mrf.mxu3 }
 0x389   : > { %v1905_v7 = vadd.f32 %v1904_v24, %v1792_v37  ;;  %v1681_v48 = vpop.f32.mrf.mxu0  ;;  %v1794_v27 = vpop.f32.mrf.mxu1 }
 0x38a   : > { %v1682_v9 = vadd.f32 %v3719_v15, %v1681_v48 }
 0x38b   : > { %v2018_v6 = vadd.f32 %v2017_v28, %v1905_v7 }
 0x38c   : > { %v1795_v29 = vadd.f32 %v1794_v27, %v1682_v9 }
 0x38d   : > { %2071 = vst [vmem:[%s3741_s23 + $0xa8] sm:$0xff] %v2018_v6 }
 0x390   : > { %v1907_v26 = vpop.f32.mrf.mxu2  ;;  %v2020_v19 = vpop.f32.mrf.mxu3 }
 0x391   : > { %v1908_v39 = vadd.f32 %v1907_v26, %v1795_v29  ;;  %v1684_v10 = vpop.f32.mrf.mxu0  ;;  %v1797_v11 = vpop.f32.mrf.mxu1 }
 0x392   : > { %v1685_v43 = vadd.f32 %v3719_v15, %v1684_v10 }
 0x393   : > { %v2021_v32 = vadd.f32 %v2020_v19, %v1908_v39 }
 0x394   : > { %v1798_v21 = vadd.f32 %v1797_v11, %v1685_v43 }
 0x395   : > { %2072 = vst [vmem:[%s3741_s23 + $0xb0] sm:$0xff] %v2021_v32 }
 0x398   : > { %v1910_v31 = vpop.f32.mrf.mxu2  ;;  %v2023_v20 = vpop.f32.mrf.mxu3 }
 0x399   : > { %v1911_v54 = vadd.f32 %v1910_v31, %v1798_v21  ;;  %v1687_v51 = vpop.f32.mrf.mxu0  ;;  %v1800_v16 = vpop.f32.mrf.mxu1 }
 0x39a   : > { %v1688_v17 = vadd.f32 %v3719_v15, %v1687_v51 }
 0x39b   : > { %v2024_v22 = vadd.f32 %v2023_v20, %v1911_v54 }
 0x39c   : > { %v1801_v44 = vadd.f32 %v1800_v16, %v1688_v17 }
 0x39d   : > { %2073 = vst [vmem:[%s3741_s23 + $0xb8] sm:$0xff] %v2024_v22 }
 0x3a0   : > { %v1913_v46 = vpop.f32.mrf.mxu2  ;;  %v2026_v58 = vpop.f32.mrf.mxu3 }
 0x3a1   : > { %v1914_v42 = vadd.f32 %v1913_v46, %v1801_v44  ;;  %v1690_v36 = vpop.f32.mrf.mxu0  ;;  %v1803_v2 = vpop.f32.mrf.mxu1 }
 0x3a2   : > { %v1691_v34 = vadd.f32 %v3719_v15, %v1690_v36 }
 0x3a3   : > { %v2027_v40 = vadd.f32 %v2026_v58, %v1914_v42 }
 0x3a4   : > { %v1804_v50 = vadd.f32 %v1803_v2, %v1691_v34 }
 0x3a5   : > { %2074 = vst [vmem:[%s3741_s23 + $0xc0] sm:$0xff] %v2027_v40 }
 0x3a8   : > { %v1916_v4 = vpop.f32.mrf.mxu2  ;;  %v2029_v25 = vpop.f32.mrf.mxu3 }
 0x3a9   : > { %v1917_v56 = vadd.f32 %v1916_v4, %v1804_v50  ;;  %v1693_v49 = vpop.f32.mrf.mxu0  ;;  %v1806_v33 = vpop.f32.mrf.mxu1 }
 0x3aa   : > { %v1694_v3 = vadd.f32 %v3719_v15, %v1693_v49 }
 0x3ab   : > { %v2030_v1 = vadd.f32 %v2029_v25, %v1917_v56 }
 0x3ac   : > { %v1807_v23 = vadd.f32 %v1806_v33, %v1694_v3 }
 0x3ad   : > { %2075 = vst [vmem:[%s3741_s23 + $0xc8] sm:$0xff] %v2030_v1 }
 0x3b0   : > { %v1919_v8 = vpop.f32.mrf.mxu2  ;;  %v2032_v59 = vpop.f32.mrf.mxu3 }
 0x3b1   : > { %v1920_v13 = vadd.f32 %v1919_v8, %v1807_v23  ;;  %v1696_v57 = vpop.f32.mrf.mxu0  ;;  %v1809_v62 = vpop.f32.mrf.mxu1 }
 0x3b2   : > { %v1697_v38 = vadd.f32 %v3719_v15, %v1696_v57 }
 0x3b3   : > { %v2033_v18 = vadd.f32 %v2032_v59, %v1920_v13 }
 0x3b4   : > { %v1810_v60 = vadd.f32 %v1809_v62, %v1697_v38 }
 0x3b5   : > { %2076 = vst [vmem:[%s3741_s23 + $0xd0] sm:$0xff] %v2033_v18 }
 0x3b8   : > { %v1922_v35 = vpop.f32.mrf.mxu2  ;;  %v2035_v53 = vpop.f32.mrf.mxu3 }
 0x3b9   : > { %v1923_v52 = vadd.f32 %v1922_v35, %v1810_v60  ;;  %v1699_v47 = vpop.f32.mrf.mxu0  ;;  %v1812_v12 = vpop.f32.mrf.mxu1 }
 0x3ba   : > { %v1700_v55 = vadd.f32 %v3719_v15, %v1699_v47 }
 0x3bb   : > { %v2036_v14 = vadd.f32 %v2035_v53, %v1923_v52 }
 0x3bc   : > { %v1813_v0 = vadd.f32 %v1812_v12, %v1700_v55 }
 0x3bd   : > { %2077 = vst [vmem:[%s3741_s23 + $0xd8] sm:$0xff] %v2036_v14 }
 0x3c0   : > { %v1925_v41 = vpop.f32.mrf.mxu2  ;;  %v2038_v30 = vpop.f32.mrf.mxu3 }
 0x3c1   : > { %v1926_v5 = vadd.f32 %v1925_v41, %v1813_v0  ;;  %v1702_v63 = vpop.f32.mrf.mxu0  ;;  %v1815_v61 = vpop.f32.mrf.mxu1 }
 0x3c2   : > { %v1703_v37 = vadd.f32 %v3719_v15, %v1702_v63 }
 0x3c3   : > { %v2039_v45 = vadd.f32 %v2038_v30, %v1926_v5 }
 0x3c4   : > { %v1816_v24 = vadd.f32 %v1815_v61, %v1703_v37 }
 0x3c5   : > { %2078 = vst [vmem:[%s3741_s23 + $0xe0] sm:$0xff] %v2039_v45 }
 0x3c8   : > { %v1928_v28 = vpop.f32.mrf.mxu2  ;;  %v2041_v7 = vpop.f32.mrf.mxu3 }
 0x3c9   : > { %v1929_v48 = vadd.f32 %v1928_v28, %v1816_v24  ;;  %v1705_v27 = vpop.f32.mrf.mxu0  ;;  %v1818_v29 = vpop.f32.mrf.mxu1 }
 0x3ca   : > { %v1706_v9 = vadd.f32 %v3719_v15, %v1705_v27 }
 0x3cb   : > { %v2042_v6 = vadd.f32 %v2041_v7, %v1929_v48 }
 0x3cc   : > { %v1819_v26 = vadd.f32 %v1818_v29, %v1706_v9 }
 0x3cd   : > { %2079 = vst [vmem:[%s3741_s23 + $0xe8] sm:$0xff] %v2042_v6 }
 0x3d0   : > { %v1931_v19 = vpop.f32.mrf.mxu2  ;;  %v2044_v39 = vpop.f32.mrf.mxu3 }
 0x3d1   : > { %v1932_v10 = vadd.f32 %v1931_v19, %v1819_v26  ;;  %v1708_v11 = vpop.f32.mrf.mxu0  ;;  %v1821_v21 = vpop.f32.mrf.mxu1 }
 0x3d2   : > { %v1709_v43 = vadd.f32 %v3719_v15, %v1708_v11 }
 0x3d3   : > { %v2045_v32 = vadd.f32 %v2044_v39, %v1932_v10 }
 0x3d4   : > { %v1822_v31 = vadd.f32 %v1821_v21, %v1709_v43 }
 0x3d5   : > { %2080 = vst [vmem:[%s3741_s23 + $0xf0] sm:$0xff] %v2045_v32 }
 0x3d8   : > { %v1934_v20 = vpop.f32.mrf.mxu2  ;;  %v2047_v51 = vpop.f32.mrf.mxu3 }
 0x3d9   : > { %v1935_v54 = vadd.f32 %v1934_v20, %v1822_v31 }
 0x3db   : > { %v2048_v16 = vadd.f32 %v2047_v51, %v1935_v54 }
 0x3dd   : > { %2081 = vst [vmem:[%s3741_s23 + $0xf8] sm:$0xff] %v2048_v16 }
 0x3de   : > { %2458 = shalt.err (!%p2455_p10)
}
 0x3df   : > { %s2516_s17 = smov 128   ;;  %s2517_s16 = smov 8  }
 0x3e0   : > { %2238 = dma.vmem_to_hbm [thread:$0]  (%p2631_p7), %s2096_s13, 4096, %s2098_s14, %s2083_s22, %s2516_s17, %s2516_s17, %s2517_s16  }
 0x3e1 PF: > { %s2112_s23 = sand.u32 1, %s2493_s18   ;;  %p4213_p12 = scmp.ge.s32.totalorder %s2505_s21, 2 }
 0x3e2   : > { %s2113_s26 = scalar_lea.sflag [#allocation4], %s2112_s23 }
 0x3e3   : > { %p2255_p13 = pnand %p4213_p12, %p2583_p6 }
 0x3e5   : > { %p2256_p0 = pneg %p2255_p13 }
 0x3e7   : > { %2488 = dma.done.wait (%p2256_p0), %s2113_s26, 4096  }
 0x3e8   : > { %2490 = vsyncadd (%p2256_p0), %s2113_s26, 4294963200  ;;  %p20_p3 = scmp.ge.s32.totalorder %s2617_s30, 4   ;;  %s4214_s18 = smov %s2497_s19 }
 0x3e9   : > { %s4215_s19 = smov %s2501_s20  ;;  %s4216_s20 = smov %s2627_s9 }
 0x3ea   : > { %s4217_s21 = smov %s2617_s30  ;;  %22 = sbr.rel (!%p20_p3) target bundleno = 7 (0x7), region = 97 }
 0x3ef   :  { %2119 = vsyncpa [#allocation3], 1 }
 0x3f0   :  { %2121 = vsyncpa [#allocation3 + $0x1], 1 }
 0x3f1   :  { %2122 = vsyncpa [#allocation6], 1 }
 0x3f2   :  { %2123 = vsyncpa [#allocation9], 1 }
 0x3f3   :  { %2124 = vsyncpa [#allocation4], 1 }
 0x3f4   :  { %2126 = vsyncpa [#allocation4 + $0x1], 1 }

</bundles_post_ra>
